<compile_context>
chip_gen: v7x
topology: tpu7x:2x2x1
jax: 0.10.0
libtpu: 0.0.40
codegen_flags: <defaults>
</compile_context>

<pallas_src>
import jax
import jax.numpy as jnp
from jax.experimental import pallas as pl
from jax.experimental.pallas import tpu as pltpu


def residual_mlp_kernel(x_ref, w1_ref, b1_ref, w2_ref, b2_ref, o_ref):
    # x_ref: (tm, D) token tile; weights are full, resident (D, H) / (H, D).
    x = x_ref[...]                                   # native dtype (f32 / bf16)
    # MXU consumes native operands, accumulates in f32.
    h = jnp.dot(x, w1_ref[...], preferred_element_type=jnp.float32)
    h = h + b1_ref[...].astype(jnp.float32)
    # tanh GELU -> EUP slot (nearly free next to MXU/VPU work).
    h = jax.nn.gelu(h, approximate=True)
    # Cast activation to the weight dtype so bf16 weights hit the bf16 MXU path.
    y = jnp.dot(h.astype(w2_ref.dtype), w2_ref[...],
                preferred_element_type=jnp.float32)
    y = y + b2_ref[...].astype(jnp.float32)
    # ResidualAdd fused: add in f32, single downcast at the store.
    o_ref[...] = (y + x.astype(jnp.float32)).astype(o_ref.dtype)


def _build_call(T_pad, D, H, tm, x_dtype, itemsizes, *, weight_buffers):
    """Build the pallas_call. weight_buffers=1 -> single-buffered resident
    weights (constant index_map); None -> default (double-buffered)."""

    def wspec(shape):
        if weight_buffers is None:
            return pl.BlockSpec(shape, lambda i: (0, 0))
        return pl.BlockSpec(shape, lambda i: (0, 0),
                            pipeline_mode=pl.Buffered(weight_buffers))

    x_isz, w_isz = itemsizes
    cost = pl.CostEstimate(
        flops=4 * T_pad * D * H,                       # two matmuls
        transcendentals=T_pad * H,                     # tanh in GELU
        bytes_accessed=(2 * T_pad * D * x_isz          # x in + out
                        + (D * H + H * D + H + D) * w_isz),
    )

    return pl.pallas_call(
        residual_mlp_kernel,
        out_shape=jax.ShapeDtypeStruct((T_pad, D), x_dtype),
        grid_spec=pltpu.PrefetchScalarGridSpec(
            num_scalar_prefetch=0,
            grid=(T_pad // tm,),
            in_specs=[
                pl.BlockSpec((tm, D), lambda i: (i, 0)),   # x tile (pipelined)
                wspec((D, H)),                             # W1 (resident)
                wspec((1, H)),                             # b1
                wspec((H, D)),                             # W2 (resident)
                wspec((1, D)),                             # b2
            ],
            out_specs=pl.BlockSpec((tm, D), lambda i: (i, 0)),
        ),
        compiler_params=pltpu.CompilerParams(
            dimension_semantics=("parallel",),
            # 64 MiB: above v5e (16 MiB) / v6e (32 MiB) defaults, within v7x's
            # 64 MiB physical VMEM.
            vmem_limit_bytes=64 * 1024 * 1024,
        ),
        cost_estimate=cost,
    )


def residual_add_ffn(x, w1, b1, w2, b2, *, tm=256):
    """y = GELU(x @ w1 + b1) @ w2 + b2 + x, fused in one Pallas kernel.

    x : (T, D) tokens x hidden.  D (and H) should be multiples of 128 for
    lane-dense loads/stores (true for real ViT dims).  T is padded to a
    multiple of tm; padded rows are dropped from the output.
    """
    T, D = x.shape
    H = w1.shape[1]

    T_pad = pl.cdiv(T, tm) * tm
    x_in = jnp.pad(x, ((0, T_pad - T), (0, 0))) if T_pad != T else x
    itemsizes = (jnp.dtype(x.dtype).itemsize, jnp.dtype(w1.dtype).itemsize)

    try:
        call = _build_call(T_pad, D, H, tm, x.dtype, itemsizes,
                           weight_buffers=1)
        out = jax.block_until_ready(call(x_in, w1, b1, w2, b2))
    except Exception:
        # Fallback if single-buffering via pipeline_mode is unsupported on this
        # jax version: default (double-buffered) constant-index weight blocks.
        call = _build_call(T_pad, D, H, tm, x.dtype, itemsizes,
                           weight_buffers=None)
        out = jax.block_until_ready(call(x_in, w1, b1, w2, b2))

    return out[:T] if T_pad != T else out


def reference(x, w1, b1, w2, b2):
    # Same math / precision path as the kernel (tanh GELU, f32 accumulation).
    h = jnp.dot(x, w1, preferred_element_type=jnp.float32)
    h = jax.nn.gelu(h + b1.astype(jnp.float32), approximate=True)
    y = jnp.dot(h.astype(w2.dtype), w2, preferred_element_type=jnp.float32)
    y = y + b2.astype(jnp.float32)
    return (y + x.astype(jnp.float32)).astype(x.dtype)


if __name__ == "__main__":
    # Small but lane-dense shapes: batch=4, seq=128, hidden=128, expansion=2.
    # T = 512 with tm=256 -> grid of 2 (shards across both v7x TensorCores).
    batch, seq, hidden, expansion = 4, 128, 128, 2
    T, D, H = batch * seq, hidden, hidden * expansion

    key = jax.random.PRNGKey(0)
    kx, k1, k2 = jax.random.split(key, 3)

    x = jax.random.normal(kx, (T, D), dtype=jnp.float32)
    # Deterministic synthetic parameters (not a checkpoint).
    w1 = jax.random.normal(k1, (D, H), dtype=jnp.float32) * (1.0 / D ** 0.5)
    b1 = jnp.zeros((1, H), dtype=jnp.float32)
    w2 = jax.random.normal(k2, (H, D), dtype=jnp.float32) * (1.0 / H ** 0.5)
    b2 = jnp.zeros((1, D), dtype=jnp.float32)

    out = residual_add_ffn(x, w1, b1, w2, b2)
    out = jax.block_until_ready(out)

    ref = reference(x, w1, b1, w2, b2)
    assert out.shape == (T, D) and out.dtype == x.dtype
    # Both paths go through the MXU with f32 accumulation; tolerance covers
    # accumulation-order differences.
    assert jnp.allclose(out, ref, atol=2e-3, rtol=2e-3), "mismatch vs reference"

    print("KERNEL_OK")
</pallas_src>

<mosaic_0001>
module attributes {stable_mosaic.version = 11 : i64} {
  func.func @residual_mlp_kernel(%arg0: i32, %arg1: memref<256x128xf32, #tpu.memory_space<vmem>>, %arg2: memref<128x256xf32, #tpu.memory_space<vmem>>, %arg3: memref<1x256xf32, #tpu.memory_space<vmem>>, %arg4: memref<256x128xf32, #tpu.memory_space<vmem>>, %arg5: memref<1x128xf32, #tpu.memory_space<vmem>>, %arg6: memref<256x128xf32, #tpu.memory_space<vmem>>) attributes {dimension_semantics = [#tpu.dimension_semantics<parallel>], iteration_bounds = array<i64: 2>, scalar_prefetch = 0 : i64, scratch_operands = 0 : i64, tpu.core_type = #tpu.core_type<tc>, window_params = [{transform_indices = @transform_0, window_bounds = array<i64: 256, 128>}, {pipeline_mode = #tpu.pipeline_mode<synchronous>, transform_indices = @transform_1, window_bounds = array<i64: 128, 256>}, {pipeline_mode = #tpu.pipeline_mode<synchronous>, transform_indices = @transform_2, window_bounds = array<i64: 1, 256>}, {pipeline_mode = #tpu.pipeline_mode<synchronous>, transform_indices = @transform_3, window_bounds = array<i64: 256, 128>}, {pipeline_mode = #tpu.pipeline_mode<synchronous>, transform_indices = @transform_4, window_bounds = array<i64: 1, 128>}, {transform_indices = @transform_5, window_bounds = array<i64: 256, 128>}]} {
    %c0 = arith.constant 0 : index
    %c0_0 = arith.constant 0 : index
    %0 = vector.load %arg1[%c0, %c0_0] : memref<256x128xf32, #tpu.memory_space<vmem>>, vector<256x128xf32>
    %c0_1 = arith.constant 0 : index
    %c0_2 = arith.constant 0 : index
    %1 = vector.load %arg2[%c0_1, %c0_2] : memref<128x256xf32, #tpu.memory_space<vmem>>, vector<128x256xf32>
    %cst = arith.constant dense<0.000000e+00> : vector<256x256xf32>
    %2 = tpu.matmul %0, %1, %cst {dimension_numbers = #tpu.dot_dimension_numbers<[1], [0], [0], [1], [0, 0, 1, 1], [], []>} : vector<256x128xf32>, vector<128x256xf32>, vector<256x256xf32> -> vector<256x256xf32>
    %c0_3 = arith.constant 0 : index
    %c0_4 = arith.constant 0 : index
    %3 = vector.load %arg3[%c0_3, %c0_4] : memref<1x256xf32, #tpu.memory_space<vmem>>, vector<1x256xf32>
    %4 = vector.broadcast %3 : vector<1x256xf32> to vector<256x256xf32>
    %5 = arith.addf %2, %4 : vector<256x256xf32>
    %6 = arith.mulf %5, %5 : vector<256x256xf32>
    %7 = arith.mulf %5, %6 : vector<256x256xf32>
    %cst_5 = arith.constant 4.471500e-02 : f32
    %8 = vector.broadcast %cst_5 : f32 to vector<256x256xf32>
    %9 = arith.mulf %8, %7 : vector<256x256xf32>
    %10 = arith.addf %5, %9 : vector<256x256xf32>
    %cst_6 = arith.constant 0.797884583 : f32
    %11 = vector.broadcast %cst_6 : f32 to vector<256x256xf32>
    %12 = arith.mulf %11, %10 : vector<256x256xf32>
    %13 = math.tanh %12 : vector<256x256xf32>
    %cst_7 = arith.constant 1.000000e+00 : f32
    %14 = vector.broadcast %cst_7 : f32 to vector<256x256xf32>
    %15 = arith.addf %14, %13 : vector<256x256xf32>
    %cst_8 = arith.constant 5.000000e-01 : f32
    %16 = vector.broadcast %cst_8 : f32 to vector<256x256xf32>
    %17 = arith.mulf %16, %15 : vector<256x256xf32>
    %18 = arith.mulf %5, %17 : vector<256x256xf32>
    %c0_9 = arith.constant 0 : index
    %c0_10 = arith.constant 0 : index
    %19 = vector.load %arg4[%c0_9, %c0_10] : memref<256x128xf32, #tpu.memory_space<vmem>>, vector<256x128xf32>
    %cst_11 = arith.constant dense<0.000000e+00> : vector<256x128xf32>
    %20 = tpu.matmul %18, %19, %cst_11 {dimension_numbers = #tpu.dot_dimension_numbers<[1], [0], [0], [1], [0, 0, 1, 1], [], []>} : vector<256x256xf32>, vector<256x128xf32>, vector<256x128xf32> -> vector<256x128xf32>
    %c0_12 = arith.constant 0 : index
    %c0_13 = arith.constant 0 : index
    %21 = vector.load %arg5[%c0_12, %c0_13] : memref<1x128xf32, #tpu.memory_space<vmem>>, vector<1x128xf32>
    %22 = vector.broadcast %21 : vector<1x128xf32> to vector<256x128xf32>
    %23 = arith.addf %20, %22 : vector<256x128xf32>
    %24 = arith.addf %23, %0 : vector<256x128xf32>
    %c0_14 = arith.constant 0 : index
    %c0_15 = arith.constant 0 : index
    %25 = vector.load %arg6[%c0_14, %c0_15] : memref<256x128xf32, #tpu.memory_space<vmem>>, vector<256x128xf32>
    tpu.vector_store %arg6[%c0_14, %c0_15], %24 {strides = array<i32>} : memref<256x128xf32, #tpu.memory_space<vmem>>, vector<256x128xf32>,
    return
  }
  func.func @transform_0(%arg0: i32) -> (i32, i32) {
    %c0_i32 = arith.constant 0 : i32
    %c0_i32_0 = arith.constant 0 : i32
    return %arg0, %c0_i32 : i32, i32
  }
  func.func @transform_1(%arg0: i32) -> (i32, i32) {
    %c0_i32 = arith.constant 0 : i32
    %c0_i32_0 = arith.constant 0 : i32
    %c0_i32_1 = arith.constant 0 : i32
    return %c0_i32, %c0_i32_0 : i32, i32
  }
  func.func @transform_2(%arg0: i32) -> (i32, i32) {
    %c0_i32 = arith.constant 0 : i32
    %c0_i32_0 = arith.constant 0 : i32
    %c0_i32_1 = arith.constant 0 : i32
    return %c0_i32, %c0_i32_0 : i32, i32
  }
  func.func @transform_3(%arg0: i32) -> (i32, i32) {
    %c0_i32 = arith.constant 0 : i32
    %c0_i32_0 = arith.constant 0 : i32
    %c0_i32_1 = arith.constant 0 : i32
    return %c0_i32, %c0_i32_0 : i32, i32
  }
  func.func @transform_4(%arg0: i32) -> (i32, i32) {
    %c0_i32 = arith.constant 0 : i32
    %c0_i32_0 = arith.constant 0 : i32
    %c0_i32_1 = arith.constant 0 : i32
    return %c0_i32, %c0_i32_0 : i32, i32
  }
  func.func @transform_5(%arg0: i32) -> (i32, i32) {
    %c0_i32 = arith.constant 0 : i32
    %c0_i32_0 = arith.constant 0 : i32
    return %arg0, %c0_i32 : i32, i32
  }
}

module attributes {stable_mosaic.version = 11 : i64} {
  func.func @residual_mlp_kernel(%arg0: i32, %arg1: memref<256x128xf32, #tpu.memory_space<vmem>>, %arg2: memref<128x256xf32, #tpu.memory_space<vmem>>, %arg3: memref<1x256xf32, #tpu.memory_space<vmem>>, %arg4: memref<256x128xf32, #tpu.memory_space<vmem>>, %arg5: memref<1x128xf32, #tpu.memory_space<vmem>>, %arg6: memref<256x128xf32, #tpu.memory_space<vmem>>) attributes {dimension_semantics = [#tpu.dimension_semantics<parallel>], iteration_bounds = array<i64: 2>, scalar_prefetch = 0 : i64, scratch_operands = 0 : i64, tpu.core_type = #tpu.core_type<tc>, window_params = [{transform_indices = @transform_0, window_bounds = array<i64: 256, 128>}, {pipeline_mode = #tpu.pipeline_mode<synchronous>, transform_indices = @transform_1, window_bounds = array<i64: 128, 256>}, {pipeline_mode = #tpu.pipeline_mode<synchronous>, transform_indices = @transform_2, window_bounds = array<i64: 1, 256>}, {pipeline_mode = #tpu.pipeline_mode<synchronous>, transform_indices = @transform_3, window_bounds = array<i64: 256, 128>}, {pipeline_mode = #tpu.pipeline_mode<synchronous>, transform_indices = @transform_4, window_bounds = array<i64: 1, 128>}, {transform_indices = @transform_5, window_bounds = array<i64: 256, 128>}]} {
    %c0 = arith.constant 0 : index
    %c0_0 = arith.constant 0 : index
    %0 = vector.load %arg1[%c0, %c0_0] : memref<256x128xf32, #tpu.memory_space<vmem>>, vector<256x128xf32>
    %c0_1 = arith.constant 0 : index
    %c0_2 = arith.constant 0 : index
    %1 = vector.load %arg2[%c0_1, %c0_2] : memref<128x256xf32, #tpu.memory_space<vmem>>, vector<128x256xf32>
    %cst = arith.constant dense<0.000000e+00> : vector<256x256xf32>
    %2 = tpu.matmul %0, %1, %cst {dimension_numbers = #tpu.dot_dimension_numbers<[1], [0], [0], [1], [0, 0, 1, 1], [], []>} : vector<256x128xf32>, vector<128x256xf32>, vector<256x256xf32> -> vector<256x256xf32>
    %c0_3 = arith.constant 0 : index
    %c0_4 = arith.constant 0 : index
    %3 = vector.load %arg3[%c0_3, %c0_4] : memref<1x256xf32, #tpu.memory_space<vmem>>, vector<1x256xf32>
    %4 = vector.broadcast %3 : vector<1x256xf32> to vector<256x256xf32>
    %5 = arith.addf %2, %4 : vector<256x256xf32>
    %6 = arith.mulf %5, %5 : vector<256x256xf32>
    %7 = arith.mulf %5, %6 : vector<256x256xf32>
    %cst_5 = arith.constant 4.471500e-02 : f32
    %8 = vector.broadcast %cst_5 : f32 to vector<256x256xf32>
    %9 = arith.mulf %8, %7 : vector<256x256xf32>
    %10 = arith.addf %5, %9 : vector<256x256xf32>
    %cst_6 = arith.constant 0.797884583 : f32
    %11 = vector.broadcast %cst_6 : f32 to vector<256x256xf32>
    %12 = arith.mulf %11, %10 : vector<256x256xf32>
    %13 = math.tanh %12 : vector<256x256xf32>
    %cst_7 = arith.constant 1.000000e+00 : f32
    %14 = vector.broadcast %cst_7 : f32 to vector<256x256xf32>
    %15 = arith.addf %14, %13 : vector<256x256xf32>
    %cst_8 = arith.constant 5.000000e-01 : f32
    %16 = vector.broadcast %cst_8 : f32 to vector<256x256xf32>
    %17 = arith.mulf %16, %15 : vector<256x256xf32>
    %18 = arith.mulf %5, %17 : vector<256x256xf32>
    %c0_9 = arith.constant 0 : index
    %c0_10 = arith.constant 0 : index
    %19 = vector.load %arg4[%c0_9, %c0_10] : memref<256x128xf32, #tpu.memory_space<vmem>>, vector<256x128xf32>
    %cst_11 = arith.constant dense<0.000000e+00> : vector<256x128xf32>
    %20 = tpu.matmul %18, %19, %cst_11 {dimension_numbers = #tpu.dot_dimension_numbers<[1], [0], [0], [1], [0, 0, 1, 1], [], []>} : vector<256x256xf32>, vector<256x128xf32>, vector<256x128xf32> -> vector<256x128xf32>
    %c0_12 = arith.constant 0 : index
    %c0_13 = arith.constant 0 : index
    %21 = vector.load %arg5[%c0_12, %c0_13] : memref<1x128xf32, #tpu.memory_space<vmem>>, vector<1x128xf32>
    %22 = vector.broadcast %21 : vector<1x128xf32> to vector<256x128xf32>
    %23 = arith.addf %20, %22 : vector<256x128xf32>
    %24 = arith.addf %23, %0 : vector<256x128xf32>
    %c0_14 = arith.constant 0 : index
    %c0_15 = arith.constant 0 : index
    %25 = vector.load %arg6[%c0_14, %c0_15] : memref<256x128xf32, #tpu.memory_space<vmem>>, vector<256x128xf32>
    tpu.vector_store %arg6[%c0_14, %c0_15], %24 {strides = array<i32>} : memref<256x128xf32, #tpu.memory_space<vmem>>, vector<256x128xf32>,
    return
  }
  func.func @transform_0(%arg0: i32) -> (i32, i32) {
    %c0_i32 = arith.constant 0 : i32
    %c0_i32_0 = arith.constant 0 : i32
    return %arg0, %c0_i32 : i32, i32
  }
  func.func @transform_1(%arg0: i32) -> (i32, i32) {
    %c0_i32 = arith.constant 0 : i32
    %c0_i32_0 = arith.constant 0 : i32
    %c0_i32_1 = arith.constant 0 : i32
    return %c0_i32, %c0_i32_0 : i32, i32
  }
  func.func @transform_2(%arg0: i32) -> (i32, i32) {
    %c0_i32 = arith.constant 0 : i32
    %c0_i32_0 = arith.constant 0 : i32
    %c0_i32_1 = arith.constant 0 : i32
    return %c0_i32, %c0_i32_0 : i32, i32
  }
  func.func @transform_3(%arg0: i32) -> (i32, i32) {
    %c0_i32 = arith.constant 0 : i32
    %c0_i32_0 = arith.constant 0 : i32
    %c0_i32_1 = arith.constant 0 : i32
    return %c0_i32, %c0_i32_0 : i32, i32
  }
  func.func @transform_4(%arg0: i32) -> (i32, i32) {
    %c0_i32 = arith.constant 0 : i32
    %c0_i32_0 = arith.constant 0 : i32
    %c0_i32_1 = arith.constant 0 : i32
    return %c0_i32, %c0_i32_0 : i32, i32
  }
  func.func @transform_5(%arg0: i32) -> (i32, i32) {
    %c0_i32 = arith.constant 0 : i32
    %c0_i32_0 = arith.constant 0 : i32
    return %arg0, %c0_i32 : i32, i32
  }
}

</mosaic_0001>

<bundles_post_ra>
// kernel: tpu_custom_call.1
= control target key start
LH: loop header
LB: loop body
LE: loop exit
PB: predicated region body
PF: predicated region fallthrough
CT: control target
= control target key end

     0   :  { %10 = vsyncpa [#allocation3], 0  ;;  %s3484_s0 = inlined_call_operand.hbm [shape: f32[512,128], index: 0, kind: input, shape index: {}]   ;;  %s3485_s1 = inlined_call_operand.hbm [shape: f32[128,256], index: 1, kind: input, shape index: {}]   ;;  %s3486_s2 = inlined_call_operand.hbm [shape: f32[1,256], index: 2, kind: input, shape index: {}]   ;;  %s3487_s3 = inlined_call_operand.hbm [shape: f32[256,128], index: 3, kind: input, shape index: {}]   ;;  %s3488_s4 = inlined_call_operand.hbm [shape: f32[1,128], index: 4, kind: input, shape index: {}]   ;;  %s3489_s5 = inlined_call_operand.hbm [shape: f32[512,128], index: 5, kind: output, shape index: {}]  }
   0x1   :  { %12 = vsyncpa [#allocation3 + $0x1], 0 }
   0x2   :  { %13 = vsyncpa [#allocation6], 0 }
   0x3   :  { %14 = vsyncpa [#allocation9], 0 }
   0x4   :  { %15 = vsyncpa [#allocation4], 0 }
   0x5   :  { %17 = vsyncpa [#allocation4 + $0x1], 0  ;;  %s2315_s18 = smov 0   ;;  %s2317_s19 = smov 0  }
   0x6   :  { %s2319_s20 = smov 0   ;;  %s2321_s21 = smov 0  }
   0x7 LB: > { %s2336_s22 = sadd.s32 4294967295, %s2269_s21   ;;  %s1661_s23 = sadd.s32 4294967294, %s2269_s21   ;;  %s2269_s21 = sphi %s2321_s21, %s3512_s21   ;;  %s2265_s20 = sphi %s2319_s20, %s3511_s20   ;;  %s2261_s19 = sphi %s2317_s19, %s3510_s19   ;;  %s2257_s18 = sphi %s2315_s18, %s3509_s18  }
   0x8   : > { %p43_p0 = scmp.ne.s32.totalorder %s2261_s19, %s2257_s18  ;;  %p3490_p1 = scmp.eq.s32.totalorder %s2336_s22, 0 }
   0x9   : > { %p157_p3 = scmp.eq.s32.totalorder %s1661_s23, 1  ;;  %p1662_p5 = scmp.ge.s32.totalorder %s2269_s21, 1 }
   0xa   : > { %p2345_p4 = por %p3490_p1, %p43_p0  ;;  %p164_p7 = scmp.lt.s32.totalorder %s2269_s21, 3 }
   0xb   : > { %p2350_p6 = por %p157_p3, %p43_p0  ;;  %s2271_s27 = smov [#allocation5]  }
   0xc   : > { %s3493_s24 = scalar_select %p2345_p4, 1, 0 }
   0xd   : > { %s3494_s25 = scalar_select %p2350_p6, 1, 0 }
   0xe   : > { %p2355_p8 = pnand %p1662_p5, %p164_p7  ;;  %s176_s28 = sshll.u32 %s2271_s27, 4  ;;  %s2359_s28 = int_to_ptr.vmem [resolvable:$true] %s176_s28 }
   0xf   : > { %s2272_s30 = smov [#allocation8]   ;;  %s2053_s9 = scalar_lea.hbm %s3485_s1, 4096 }
  0x10   : > { %s3495_s26 = scalar_select %p2355_p8, 1, 0 }
  0x11   : > { %p1818_p9 = pneg %p2355_p8  ;;  %s200_s6 = sshll.u32 %s2272_s30, 4  ;;  %s2370_s6 = int_to_ptr.vmem [resolvable:$true] %s200_s6 }
  0x12   : > { %p2054_p12 = scmp.ne.s32.totalorder %s3485_s1, %s2053_s9  ;;  %p2060_p5 = scmp.lt.u32.totalorder %s2053_s9, %s3485_s1 }
  0x13   : > { %p2366_p11 = pnand %p1818_p9, %p3490_p1 }
  0x15   : > { %p2380_p13 = pneg %p2366_p11 }
  0x17   : > { %p2056_p0 = pnand %p2380_p13, %p2054_p12 }
  0x19   : > { %p2057_p3 = pneg %p2056_p0 }
  0x1b   : > { %p2062_p7 = pnand %p2060_p5, %p2057_p3 }
  0x1d   : > { %2065 = shalt.err (!%p2062_p7)
}
  0x1e   : > { %s2066_s15 = scalar_lea.vmem %s2359_s28, 4096  ;;  %p2074_p2 = scmp.lt.s32.totalorder %s2359_s28, %s2359_s28 }
  0x1f   : > { %p2067_p9 = scmp.ne.s32.totalorder %s2359_s28, %s2066_s15  ;;  %p2075_p6 = scmp.lt.s32.totalorder %s2066_s15, %s2066_s15 }
  0x21   : > { %p2069_p10 = pnand %p2067_p9, %p2380_p13  ;;  %p2076_p12 = por %p2075_p6, %p2074_p2 }
  0x23   : > { %p2070_p1 = pneg %p2069_p10 }
  0x25   : > { %p2077_p0 = pnand %p2076_p12, %p2070_p1 }
  0x27   : > { %2080 = shalt.err (!%p2077_p0)
}
  0x28   : > { %s2273_s16 = smov 256   ;;  %s2274_s17 = smov 16  }
  0x29   : > { %1821 = dma.hbm_to_vmem [thread:$0]  (!%p2366_p11), %s3485_s1, 4096, %s2359_s28, [#allocation6], %s2273_s16, %s2273_s16, %s2274_s17  }
  0x2a   : > { %s2081_s8 = scalar_lea.hbm %s3487_s3, 4096 }
  0x2b   : > { %p2082_p2 = scmp.ne.s32.totalorder %s3487_s3, %s2081_s8  ;;  %p2088_p10 = scmp.lt.u32.totalorder %s2081_s8, %s3487_s3 }
  0x2d   : > { %p2084_p1 = pnand %p2082_p2, %p2380_p13 }
  0x2f   : > { %p2085_p6 = pneg %p2084_p1 }
  0x31   : > { %p2090_p3 = pnand %p2088_p10, %p2085_p6 }
  0x33   : > { %2093 = shalt.err (!%p2090_p3)
}
  0x34   : > { %s2094_s28 = scalar_lea.vmem %s2370_s6, 4096  ;;  %p2102_p12 = scmp.lt.s32.totalorder %s2370_s6, %s2370_s6 }
  0x35   : > { %p2095_p5 = scmp.ne.s32.totalorder %s2370_s6, %s2094_s28  ;;  %p2103_p0 = scmp.lt.s32.totalorder %s2094_s28, %s2094_s28 }
  0x37   : > { %p2097_p7 = pnand %p2095_p5, %p2380_p13  ;;  %p2104_p2 = por %p2103_p0, %p2102_p12 }
  0x39   : > { %p2098_p9 = pneg %p2097_p7 }
  0x3b   : > { %p2105_p1 = pnand %p2104_p2, %p2098_p9 }
  0x3d   : > { %2108 = shalt.err (!%p2105_p1)
}
  0x3e   : > { %s2275_s14 = smov 128   ;;  %s2276_s15 = smov 8  }
  0x3f   : > { %1827 = dma.hbm_to_vmem [thread:$0]  (!%p2366_p11), %s3487_s3, 4096, %s2370_s6, [#allocation9], %s2275_s14, %s2275_s14, %s2276_s15  }
  0x40   : > { %s2277_s23 = smov [#allocation7]   ;;  %s2278_s30 = smov [#allocation10]  }
  0x41   : > { %s190_s27 = sshll.u32 %s2277_s23, 4  ;;  %s214_s7 = sshll.u32 %s2278_s30, 4  ;;  %s191_s27 = int_to_ptr.vmem [resolvable:$true] %s190_s27  ;;  %s2427_s7 = int_to_ptr.vmem [resolvable:$true] %s214_s7 }
  0x42   : > { %s2109_s10 = scalar_lea.hbm %s3486_s2, 32 }
  0x43   : > { %p2110_p6 = scmp.ne.s32.totalorder %s3486_s2, %s2109_s10  ;;  %p2116_p5 = scmp.lt.u32.totalorder %s2109_s10, %s3486_s2 }
  0x45   : > { %p2112_p10 = pnand %p2110_p6, %p2380_p13 }
  0x47   : > { %p2113_p3 = pneg %p2112_p10 }
  0x49   : > { %p2118_p7 = pnand %p2116_p5, %p2113_p3 }
  0x4b   : > { %2121 = shalt.err (!%p2118_p7)
}
  0x4c   : > { %s2122_s16 = scalar_lea.vmem %s191_s27, 32  ;;  %p2130_p2 = scmp.lt.s32.totalorder %s191_s27, %s191_s27 }
  0x4d   : > { %p2123_p9 = scmp.ne.s32.totalorder %s191_s27, %s2122_s16  ;;  %p2131_p1 = scmp.lt.s32.totalorder %s2122_s16, %s2122_s16 }
  0x4f   : > { %p2125_p12 = pnand %p2123_p9, %p2380_p13  ;;  %p2132_p4 = por %p2131_p1, %p2130_p2 }
  0x51   : > { %p2126_p0 = pneg %p2125_p12 }
  0x53   : > { %p2133_p8 = pnand %p2132_p4, %p2126_p0 }
  0x55   : > { %2136 = shalt.err (!%p2133_p8)
}
  0x56   : > { %1824 = dma.hbm_to_vmem [thread:$0]  (!%p2366_p11), %s3486_s2, 32, %s191_s27, [#allocation6]  }
  0x57   : > { %s2137_s9 = scalar_lea.hbm %s3488_s4, 16 }
  0x58   : > { %p2138_p6 = scmp.ne.s32.totalorder %s3488_s4, %s2137_s9  ;;  %p2144_p4 = scmp.lt.u32.totalorder %s2137_s9, %s3488_s4 }
  0x5a   : > { %p2140_p10 = pnand %p2138_p6, %p2380_p13 }
  0x5c   : > { %p2141_p3 = pneg %p2140_p10 }
  0x5e   : > { %p2146_p8 = pnand %p2144_p4, %p2141_p3 }
  0x60   : > { %2149 = shalt.err (!%p2146_p8)
}
  0x61   : > { %s2150_s27 = scalar_lea.vmem %s2427_s7, 16  ;;  %s2157_s6 = scalar_lea.vmem %s2427_s7, 32 }
  0x62   : > { %p2151_p5 = scmp.ne.s32.totalorder %s2427_s7, %s2150_s27  ;;  %p2158_p12 = scmp.lt.s32.totalorder %s2427_s7, %s2427_s7 }
  0x63   : > { %p2159_p0 = scmp.lt.s32.totalorder %s2157_s6, %s2150_s27 }
  0x64   : > { %p2153_p7 = pnand %p2151_p5, %p2380_p13 }
  0x65   : > { %p2160_p2 = por %p2159_p0, %p2158_p12 }
  0x66   : > { %p2154_p9 = pneg %p2153_p7 }
  0x68   : > { %p2161_p1 = pnand %p2160_p2, %p2154_p9 }
  0x6a   : > { %2164 = shalt.err (!%p2161_p1)
}
  0x6b   : > { %1830 = dma.hbm_to_vmem [thread:$0]  (!%p2366_p11), %s3488_s4, 16, %s2427_s7, [#allocation9]  }
  0x6c   : > { %s2472_s12 = sadd.s32 1, %s2269_s21   ;;  %s30_s23 = sadd.s32 1, %s2265_s20 }
  0x6d   : > { %s27_s29 = ssub.s32 %s2269_s21, %s2472_s12  ;;  %p37_p6 = scmp.ne.s32.totalorder %s2265_s20, %s2261_s19 }
  0x6e   : > { %p28_p13 = scmp.eq.s32.totalorder %s27_s29, 0  ;;  %p38_p10 = scmp.eq.s32.totalorder %s2269_s21, 0 }
  0x6f   : > { %p3498_p4 = scmp.eq.s32.totalorder %s2336_s22, 1  ;;  %p1843_p5 = scmp.lt.s32.totalorder %s2269_s21, 2 }
  0x70   : > { %s2481_s30 = scalar_select %p28_p13, %s2265_s20, %s30_s23  }
  0x71   : > { %p39_p3 = por %p38_p10, %p37_p6  ;;  %p2485_p8 = por %p3498_p4, %p37_p6 }
  0x72   : > { %s225_s9 = sand.u32 1, %s2265_s20   ;;  %s1684_s7 = sshll.u32 %s2269_s21, 12 }
  0x73   : > { %s1668_s10 = sshll.u32 %s225_s9, 8  ;;  %s2495_s28 = scalar_lea.hbm %s3484_s0, %s1684_s7 }
  0x74   : > { %s229_s27 = scalar_lea.vmem [#allocation2], %s1668_s10  ;;  %p2499_p11 = pnand %p1843_p5, %p39_p3 }
  0x75   : > { %s236_s6 = sshll.u32 %s229_s27, 4  ;;  %s2503_s17 = scalar_lea.sflag [#allocation3], %s225_s9  ;;  %s2497_s6 = int_to_ptr.vmem [resolvable:$true] %s236_s6 }
  0x76   : > { %s2165_s29 = scalar_lea.hbm %s2495_s28, 4096  ;;  %p2167_p9 = pneg %p2499_p11 }
  0x77   : > { %p2166_p7 = scmp.ne.s32.totalorder %s2495_s28, %s2165_s29  ;;  %s2170_s7 = scalar_lea.hbm %s3484_s0, 8192 }
  0x78   : > { %p2171_p2 = scmp.lt.u32.totalorder %s2495_s28, %s3484_s0  ;;  %p2172_p1 = scmp.lt.u32.totalorder %s2170_s7, %s2165_s29 }
  0x79   : > { %p2168_p12 = pnand %p2167_p9, %p2166_p7  ;;  %p2174_p6 = scmp.lt.u32.totalorder %s2165_s29, %s2495_s28 }
  0x7a   : > { %p2173_p13 = por %p2172_p1, %p2171_p2 }
  0x7b   : > { %p2169_p0 = pneg %p2168_p12 }
  0x7c   : > { %p2175_p10 = por %p2174_p6, %p2173_p13 }
  0x7e   : > { %p2176_p3 = pnand %p2175_p10, %p2169_p0 }
  0x80   : > { %2179 = shalt.err (!%p2176_p3)
}
  0x81   : > { %s2180_s9 = scalar_lea.vmem %s2497_s6, 4096  ;;  %s2279_s27 = smov [#allocation2]  }
  0x82   : > { %p2181_p4 = scmp.ne.s32.totalorder %s2497_s6, %s2180_s9  ;;  %s2185_s23 = sshll.u32 %s2279_s27, 4  ;;  %s2186_s23 = int_to_ptr.vmem [resolvable:$false] %s2185_s23 }
  0x83   : > { %s2187_s10 = scalar_lea.vmem %s2186_s23, 8192  ;;  %p2188_p12 = scmp.lt.s32.totalorder %s2497_s6, %s2186_s23 }
  0x84   : > { %p2183_p5 = pnand %p2181_p4, %p2167_p9  ;;  %p2189_p2 = scmp.lt.s32.totalorder %s2187_s10, %s2180_s9 }
  0x86   : > { %p2184_p7 = pneg %p2183_p5  ;;  %p2190_p1 = por %p2189_p2, %p2188_p12 }
  0x88   : > { %p2191_p13 = pnand %p2190_p1, %p2184_p7 }
  0x8a   : > { %2194 = shalt.err (!%p2191_p13)
}
  0x8b   : > { %1834 = dma.hbm_to_vmem [thread:$0]  (!%p2499_p11), %s2495_s28, 4096, %s2497_s6, %s2503_s17, %s2275_s14, %s2275_s14, %s2276_s15  }
  0x8c   : > { %p3501_p9 = scmp.ne.s32.totalorder %s3495_s26, 0 }
  0x8d   : > { %s2537_s29 = sand.u32 (!%p3501_p9), 1, %s2261_s19   ;;  %p3502_p0 = scmp.ne.s32.totalorder (!%p3501_p9), %s3493_s24, 0 }
  0x8e   : > { %248 = sbr.rel (%p3501_p9) target bundleno = 824 (0x338), region = 40  ;;  %s1672_s7 = sshll.u32 (!%p3501_p9), %s2537_s29, 8 }
  0x8f   : > { %s251_s11 = scalar_lea.sflag (!%p3501_p9), [#allocation3], %s2537_s29  ;;  %s2543_s16 = scalar_lea.vmem (!%p3501_p9), [#allocation2], %s1672_s7 }
  0x95   : > { %2240 = dma.done.wait (%p3502_p0), %s251_s11, 4096  }
  0x96   : > { %2242 = vsyncadd (%p3502_p0), %s251_s11, 4294963200  ;;  %p3503_p11 = scmp.eq.s32.totalorder %s2336_s22, 0 }
  0x98   : > { %2244 = dma.done.wait (%p3503_p11), [#allocation6], 4128   ;;  %p3504_p6 = pmov %p3503_p11 }
  0x9a   : > { %2246 = vsyncadd (%p3504_p6), [#allocation6], 4294963168  ;;  %p3505_p10 = pmov %p3504_p6 }
  0x9b   : > { %p3506_p3 = pmov %p3504_p6 }
  0x9c   : > { %2248 = dma.done.wait (%p3505_p10), [#allocation9], 4112  }
  0x9d   : > { %2250 = vsyncadd (%p3506_p3), [#allocation9], 4294963184  ;;  %v2280_v0 = vmov 0.0   ;;  %v332_v1 = vld [vmem:[#allocation5 + $0x8] sm:$0xff]  ;;  %v334_v2 = vld [vmem:[#allocation5 + $0x18] sm:$0xff]  ;;  %v2281_v53 = vmov 0.0|0.0  }
  0x9e   : > { %439 = vmatprep.mubr.f32.mxu0 %v2280_v0  ;;  %v331_v3 = vld [vmem:[#allocation5] sm:$0xff]  ;;  %v1686_v4 = vpack.c.bf16 %v334_v2, %v332_v1  ;;  %v333_v5 = vld [vmem:[#allocation5 + $0x10] sm:$0xff]  ;;  %v336_v6 = vld [vmem:[#allocation5 + $0x28] sm:$0xff]  ;;  %1766 = vmatprep.subr.bf16.mxu1 %v2281_v53  ;;  %s3337_s24 = scalar_lea.vmem [#allocation11], %s1672_s7  ;;  %s1685_s26 = sshll.u32 %s2336_s22, 12 }
  0x9f   : > { %v338_v7 = vld [vmem:[#allocation5 + $0x38] sm:$0xff]  ;;  %v1688_v8 = vpack.c.bf16 %v333_v5, %v331_v3  ;;  %v335_v10 = vld [vmem:[#allocation5 + $0x20] sm:$0xff]  ;;  %v337_v11 = vld [vmem:[#allocation5 + $0x30] sm:$0xff]  ;;  %s1550_s14 = sshll.u32 %s3337_s24, 4  ;;  %s3436_s6 = scalar_lea.hbm %s3489_s5, %s1685_s26  ;;  %s3438_s14 = int_to_ptr.vmem [resolvable:$true] %s1550_s14 }
  0xa0   : > { %v1690_v9 = vpack.c.bf16 %v338_v7, %v336_v6  ;;  %v340_v12 = vld [vmem:[#allocation5 + $0x48] sm:$0xff]  ;;  %1687 = vmatprep.subr.bf16.mxu0 %v1686_v4  ;;  %v342_v13 = vld [vmem:[#allocation5 + $0x58] sm:$0xff]  ;;  %v1692_v14 = vpack.c.bf16 %v337_v11, %v335_v10  ;;  %v339_v16 = vld [vmem:[#allocation5 + $0x40] sm:$0xff]  ;;  %s1537_s22 = scalar_lea.sflag [#allocation4], %s2537_s29  ;;  %s2195_s17 = scalar_lea.vmem %s3438_s14, 4096 }
  0xa1   : > { %1689 = vmatpush1.bf16.msra.mxu0 %v1688_v8  ;;  %v1694_v15 = vpack.c.bf16 %v342_v13, %v340_v12  ;;  %v341_v17 = vld [vmem:[#allocation5 + $0x50] sm:$0xff]  ;;  %v344_v18 = vld [vmem:[#allocation5 + $0x68] sm:$0xff]  ;;  %v346_v19 = vld [vmem:[#allocation5 + $0x78] sm:$0xff]  ;;  %p2196_p4 = scmp.ne.s32.totalorder %s3438_s14, %s2195_s17  ;;  %s2282_s13 = smov [#allocation11]  }
  0xa2   : > { %1691 = vmatprep.subr.bf16.mxu0 %v1690_v9  ;;  %v1696_v20 = vpack.c.bf16 %v341_v17, %v339_v16  ;;  %v1698_v21 = vpack.c.bf16 %v346_v19, %v344_v18  ;;  %v343_v22 = vld [vmem:[#allocation5 + $0x60] sm:$0xff]  ;;  %v345_v23 = vld [vmem:[#allocation5 + $0x70] sm:$0xff]  ;;  %v348_v24 = vld [vmem:[#allocation5 + $0x88] sm:$0xff]  ;;  %s2199_s9 = sshll.u32 %s2282_s13, 4  ;;  %s2200_s9 = int_to_ptr.vmem [resolvable:$false] %s2199_s9 }
  0xa3   : > { %v350_v25 = vld [vmem:[#allocation5 + $0x98] sm:$0xff]  ;;  %v1700_v26 = vpack.c.bf16 %v345_v23, %v343_v22  ;;  %v347_v28 = vld [vmem:[#allocation5 + $0x80] sm:$0xff]  ;;  %v349_v29 = vld [vmem:[#allocation5 + $0x90] sm:$0xff]  ;;  %p2197_p5 = pnand %p2196_p4, %p2485_p8  ;;  %s2201_s27 = scalar_lea.vmem %s2200_s9, 8192 }
  0xa4   : > { %v1702_v27 = vpack.c.bf16 %v350_v25, %v348_v24  ;;  %v352_v30 = vld [vmem:[#allocation5 + $0xa8] sm:$0xff]  ;;  %v354_v31 = vld [vmem:[#allocation5 + $0xb8] sm:$0xff]  ;;  %v1704_v32 = vpack.c.bf16 %v349_v29, %v347_v28  ;;  %v351_v34 = vld [vmem:[#allocation5 + $0xa0] sm:$0xff]  ;;  %p2202_p12 = scmp.lt.s32.totalorder %s3438_s14, %s2200_s9  ;;  %p2203_p2 = scmp.lt.s32.totalorder %s2201_s27, %s2195_s17 }
  0xa5   : > { %1693 = vmatpush1.bf16.msra.mxu0 %v1692_v14  ;;  %v1706_v33 = vpack.c.bf16 %v354_v31, %v352_v30  ;;  %v353_v35 = vld [vmem:[#allocation5 + $0xb0] sm:$0xff]  ;;  %v356_v36 = vld [vmem:[#allocation5 + $0xc8] sm:$0xff]  ;;  %v358_v37 = vld [vmem:[#allocation5 + $0xd8] sm:$0xff]  ;;  %p2198_p7 = pneg %p2197_p5 }
  0xa6   : > { %1695 = vmatprep.subr.bf16.mxu0 %v1694_v15  ;;  %v1708_v38 = vpack.c.bf16 %v353_v35, %v351_v34  ;;  %v1710_v39 = vpack.c.bf16 %v358_v37, %v356_v36  ;;  %v355_v40 = vld [vmem:[#allocation5 + $0xc0] sm:$0xff]  ;;  %v357_v41 = vld [vmem:[#allocation5 + $0xd0] sm:$0xff]  ;;  %v360_v42 = vld [vmem:[#allocation5 + $0xe8] sm:$0xff]  ;;  %p2204_p1 = por %p2203_p2, %p2202_p12 }
  0xa7   : > { %v362_v43 = vld [vmem:[#allocation5 + $0xf8] sm:$0xff]  ;;  %v1712_v44 = vpack.c.bf16 %v357_v41, %v355_v40  ;;  %v359_v46 = vld [vmem:[#allocation5 + $0xe0] sm:$0xff]  ;;  %v361_v47 = vld [vmem:[#allocation5 + $0xf0] sm:$0xff] }
  0xa8   : > { %v1714_v45 = vpack.c.bf16 %v362_v43, %v360_v42  ;;  %v1716_v48 = vpack.c.bf16 %v361_v47, %v359_v46  ;;  %v1208_v49 = vld [vmem:[#allocation8] sm:$0xff]  ;;  %v1209_v50 = vld [vmem:[#allocation8 + $0x8] sm:$0xff]  ;;  %v1210_v54 = vld [vmem:[#allocation8 + $0x10] sm:$0xff]  ;;  %p2205_p13 = pnand %p2204_p1, %p2198_p7 }
  0xa9   : > { %1697 = vmatpush1.bf16.msra.mxu0 %v1696_v20  ;;  %v299_v51 = vld [vmem:[%s2543_s16] sm:$0xff]  ;;  %v1719_v52 = vpack.c.bf16 %v1209_v50, %v1208_v49  ;;  %v300_v56 = vld [vmem:[%s2543_s16 + $0x8] sm:$0xff]  ;;  %v301_v60 = vld [vmem:[%s2543_s16 + $0x10] sm:$0xff] }
  0xaa   : > { %1699 = vmatprep.subr.bf16.mxu0 %v1698_v21  ;;  %v1211_v55 = vld [vmem:[#allocation8 + $0x18] sm:$0xff]  ;;  %v1212_v58 = vld [vmem:[#allocation8 + $0x20] sm:$0xff]  ;;  %v1213_v59 = vld [vmem:[#allocation8 + $0x28] sm:$0xff] }
  0xab   : > { %1782 = vmatpush1.bf16.msra.mxu1 %v1719_v52  ;;  %v1722_v57 = vpack.c.bf16 %v1211_v55, %v1210_v54  ;;  %v1725_v61 = vpack.c.bf16 %v1213_v59, %v1212_v58  ;;  %v1214_v62 = vld [vmem:[#allocation8 + $0x30] sm:$0xff]  ;;  %v1215_v63 = vld [vmem:[#allocation8 + $0x38] sm:$0xff]  ;;  %v1216_v3 = vld [vmem:[#allocation8 + $0x40] sm:$0xff] }
  0xac   : > { %1767 = vmatprep.subr.bf16.mxu1 %v2281_v53  ;;  %v302_v1 = vld [vmem:[%s2543_s16 + $0x18] sm:$0xff]  ;;  %v1728_v2 = vpack.c.bf16 %v1215_v63, %v1214_v62  ;;  %v1217_v4 = vld [vmem:[#allocation8 + $0x48] sm:$0xff]  ;;  %v303_v5 = vld [vmem:[%s2543_s16 + $0x20] sm:$0xff] }
  0xad   : > { %1701 = vmatpush1.bf16.msra.mxu0 %v1700_v26  ;;  %v1731_v6 = vpack.c.bf16 %v1217_v4, %v1216_v3  ;;  %v1218_v7 = vld [vmem:[#allocation8 + $0x50] sm:$0xff]  ;;  %v1219_v8 = vld [vmem:[#allocation8 + $0x58] sm:$0xff]  ;;  %v304_v9 = vld [vmem:[%s2543_s16 + $0x28] sm:$0xff] }
  0xae   : > { %1703 = vmatprep.subr.bf16.mxu0 %v1702_v27  ;;  %v1734_v10 = vpack.c.bf16 %v1219_v8, %v1218_v7  ;;  %v1220_v11 = vld [vmem:[#allocation8 + $0x60] sm:$0xff]  ;;  %v1221_v12 = vld [vmem:[#allocation8 + $0x68] sm:$0xff]  ;;  %v1222_v15 = vld [vmem:[#allocation8 + $0x70] sm:$0xff] }
  0xaf   : > { %1783 = vmatpush1.bf16.msra.mxu1 %v1722_v57  ;;  %v305_v13 = vld [vmem:[%s2543_s16 + $0x30] sm:$0xff]  ;;  %v1737_v14 = vpack.c.bf16 %v1221_v12, %v1220_v11  ;;  %v1223_v16 = vld [vmem:[#allocation8 + $0x78] sm:$0xff]  ;;  %v308_v20 = vld [vmem:[%s2543_s16 + $0x48] sm:$0xff] }
  0xb0   : > { %1768 = vmatprep.subr.bf16.mxu1 %v2281_v53  ;;  %v306_v17 = vld [vmem:[%s2543_s16 + $0x38] sm:$0xff]  ;;  %v1740_v18 = vpack.c.bf16 %v1223_v16, %v1222_v15  ;;  %v307_v19 = vld [vmem:[%s2543_s16 + $0x40] sm:$0xff]  ;;  %v309_v21 = vld [vmem:[%s2543_s16 + $0x50] sm:$0xff] }
  0xb1   : > { %1705 = vmatpush1.bf16.msra.mxu0 %v1704_v32  ;;  %v310_v22 = vld [vmem:[%s2543_s16 + $0x58] sm:$0xff]  ;;  %v311_v23 = vld [vmem:[%s2543_s16 + $0x60] sm:$0xff]  ;;  %v312_v24 = vld [vmem:[%s2543_s16 + $0x68] sm:$0xff] }
  0xb2   : > { %1707 = vmatprep.subr.bf16.mxu0 %v1706_v33  ;;  %v313_v25 = vld [vmem:[%s2543_s16 + $0x70] sm:$0xff]  ;;  %v314_v26 = vld [vmem:[%s2543_s16 + $0x78] sm:$0xff]  ;;  %v315_v27 = vld [vmem:[%s2543_s16 + $0x80] sm:$0xff] }
  0xb3   : > { %1784 = vmatpush1.bf16.msra.mxu1 %v1725_v61  ;;  %v316_v28 = vld [vmem:[%s2543_s16 + $0x88] sm:$0xff]  ;;  %v317_v29 = vld [vmem:[%s2543_s16 + $0x90] sm:$0xff]  ;;  %v318_v30 = vld [vmem:[%s2543_s16 + $0x98] sm:$0xff] }
  0xb4   : > { %1769 = vmatprep.subr.bf16.mxu1 %v2281_v53  ;;  %v319_v31 = vld [vmem:[%s2543_s16 + $0xa0] sm:$0xff]  ;;  %v320_v32 = vld [vmem:[%s2543_s16 + $0xa8] sm:$0xff]  ;;  %v321_v36 = vld [vmem:[%s2543_s16 + $0xb0] sm:$0xff] }
  0xb5   : > { %1709 = vmatpush1.bf16.msra.mxu0 %v1708_v38  ;;  %v1224_v33 = vld [vmem:[#allocation8 + $0x80] sm:$0xff]  ;;  %v1225_v34 = vld [vmem:[#allocation8 + $0x88] sm:$0xff]  ;;  %v1226_v37 = vld [vmem:[#allocation8 + $0x90] sm:$0xff] }
  0xb6   : > { %1711 = vmatprep.subr.bf16.mxu0 %v1710_v39  ;;  %v1743_v35 = vpack.c.bf16 %v1225_v34, %v1224_v33  ;;  %v1227_v38 = vld [vmem:[#allocation8 + $0x98] sm:$0xff]  ;;  %v1228_v41 = vld [vmem:[#allocation8 + $0xa0] sm:$0xff]  ;;  %v1229_v42 = vld [vmem:[#allocation8 + $0xa8] sm:$0xff] }
  0xb7   : > { %1785 = vmatpush1.bf16.msra.mxu1 %v1728_v2  ;;  %v1746_v39 = vpack.c.bf16 %v1227_v38, %v1226_v37  ;;  %v322_v40 = vld [vmem:[%s2543_s16 + $0xb8] sm:$0xff]  ;;  %v1749_v43 = vpack.c.bf16 %v1229_v42, %v1228_v41  ;;  %v1232_v49 = vld [vmem:[#allocation8 + $0xc0] sm:$0xff]  ;;  %v1233_v50 = vld [vmem:[#allocation8 + $0xc8] sm:$0xff] }
  0xb8   : > { %1770 = vmatprep.subr.bf16.mxu1 %v2281_v53  ;;  %v1231_v46 = vld [vmem:[#allocation8 + $0xb8] sm:$0xff]  ;;  %v1234_v54 = vld [vmem:[#allocation8 + $0xd0] sm:$0xff]  ;;  %v1236_v58 = vld [vmem:[#allocation8 + $0xe0] sm:$0xff] }
  0xb9   : > { %1713 = vmatpush1.bf16.msra.mxu0 %v1712_v44  ;;  %v323_v44 = vld [vmem:[%s2543_s16 + $0xc0] sm:$0xff]  ;;  %v1237_v59 = vld [vmem:[#allocation8 + $0xe8] sm:$0xff]  ;;  %v1238_v62 = vld [vmem:[#allocation8 + $0xf0] sm:$0xff] }
  0xba   : > { %1715 = vmatprep.subr.bf16.mxu0 %v1714_v45  ;;  %v1230_v45 = vld [vmem:[#allocation8 + $0xb0] sm:$0xff]  ;;  %v1235_v55 = vld [vmem:[#allocation8 + $0xd8] sm:$0xff] }
  0xbb   : > { %1786 = vmatpush1.bf16.msra.mxu1 %v1731_v6  ;;  %v1752_v47 = vpack.c.bf16 %v1231_v46, %v1230_v45  ;;  %v1239_v63 = vld [vmem:[#allocation8 + $0xf8] sm:$0xff]  ;;  %v329_v3 = vld [vmem:[%s2543_s16 + $0xf0] sm:$0xff] }
  0xbc   : > { %1771 = vmatprep.subr.bf16.mxu1 %v2281_v53  ;;  %v330_v4 = vld [vmem:[%s2543_s16 + $0xf8] sm:$0xff]  ;;  %v363_v8 = vld [vmem:[#allocation7] sm:$0x3] }
  0xbd   : > { %1717 = vmatpush1.bf16.msra.mxu0 %v1716_v48  ;;  %v324_v48 = vld [vmem:[%s2543_s16 + $0xc8] sm:$0xff] }
  0xbe   : > { %1718 = vmatprep.subr.bf16.mxu0 %v2281_v53 }
  0xbf   : > { %1787 = vmatpush1.bf16.msra.mxu1 %v1734_v10 }
  0xc0   : > { %440 = vmatmul.mubr.f32.vlgmr.msra.gmra.mrb[0].mxu0 %v299_v51  ;;  %1772 = vmatprep.subr.bf16.mxu1 %v2281_v53  ;;  %v1755_v51 = vpack.c.bf16 %v1233_v50, %v1232_v49 }
  0xc1   : > { %445 = vmatprep.mubr.f32.mxu0 %v2280_v0  ;;  %1720 = vmatpush1.bf16.msra.mxu0 %v1719_v52  ;;  %v325_v52 = vld [vmem:[%s2543_s16 + $0xd0] sm:$0xff] }
  0xc2   : > { %1721 = vmatprep.subr.bf16.mxu0 %v2281_v53 }
  0xc3   : > { %1788 = vmatpush1.bf16.msra.mxu1 %v1737_v14 }
  0xc4   : > { %446 = vmatmul.mubr.f32.gmra.mrb[2].mxu0 %v300_v56  ;;  %1773 = vmatprep.subr.bf16.mxu1 %v2281_v53  ;;  %v1758_v56 = vpack.c.bf16 %v1235_v55, %v1234_v54 }
  0xc5   : > { %451 = vmatprep.mubr.f32.mxu0 %v2280_v0  ;;  %1723 = vmatpush1.bf16.msra.mxu0 %v1722_v57  ;;  %v326_v57 = vld [vmem:[%s2543_s16 + $0xd8] sm:$0xff] }
  0xc6   : > { %1724 = vmatprep.subr.bf16.mxu0 %v2281_v53 }
  0xc7   : > { %1789 = vmatpush1.bf16.msra.mxu1 %v1740_v18 }
  0xc8   : > { %452 = vmatmul.mubr.f32.gmra.mrb[4].mxu0 %v301_v60  ;;  %1774 = vmatprep.subr.bf16.mxu1 %v2281_v53  ;;  %v1761_v60 = vpack.c.bf16 %v1237_v59, %v1236_v58 }
  0xc9   : > { %457 = vmatprep.mubr.f32.mxu0 %v2280_v0  ;;  %1726 = vmatpush1.bf16.msra.mxu0 %v1725_v61  ;;  %v327_v61 = vld [vmem:[%s2543_s16 + $0xe0] sm:$0xff] }
  0xca   : > { %1727 = vmatprep.subr.bf16.mxu0 %v2281_v53 }
  0xcb   : > { %1790 = vmatpush1.bf16.msra.mxu1 %v1743_v35 }
  0xcc   : > { %458 = vmatmul.mubr.f32.gmra.mrb[6].mxu0 %v302_v1  ;;  %1775 = vmatprep.subr.bf16.mxu1 %v2281_v53  ;;  %v1764_v1 = vpack.c.bf16 %v1239_v63, %v1238_v62 }
  0xcd   : > { %463 = vmatprep.mubr.f32.mxu0 %v2280_v0  ;;  %1729 = vmatpush1.bf16.msra.mxu0 %v1728_v2  ;;  %v328_v2 = vld [vmem:[%s2543_s16 + $0xe8] sm:$0xff] }
  0xce   : > { %1730 = vmatprep.subr.bf16.mxu0 %v2281_v53 }
  0xcf   : > { %1791 = vmatpush1.bf16.msra.mxu1 %v1746_v39 }
  0xd0   : > { %464 = vmatmul.mubr.f32.gmra.mrb[8].mxu0 %v303_v5  ;;  %1776 = vmatprep.subr.bf16.mxu1 %v2281_v53  ;;  %v365_v5 = vlaneseq }
  0xd1   : > { %469 = vmatprep.mubr.f32.mxu0 %v2280_v0  ;;  %1732 = vmatpush1.bf16.msra.mxu0 %v1731_v6 }
  0xd2   : > { %1733 = vmatprep.subr.bf16.mxu0 %v2281_v53  ;;  %v366_v6 = vshrl.u32 %v365_v5, 7 }
  0xd3   : > { %1792 = vmatpush1.bf16.msra.mxu1 %v1749_v43 }
  0xd4   : > { %470 = vmatmul.mubr.f32.gmra.mrb[10].mxu0 %v304_v9  ;;  %1777 = vmatprep.subr.bf16.mxu1 %v2281_v53  ;;  %v367_v7 = vsub.s32 0, %v366_v6 }
  0xd5   : > { %475 = vmatprep.mubr.f32.mxu0 %v2280_v0  ;;  %1735 = vmatpush1.bf16.msra.mxu0 %v1734_v10 }
  0xd6   : > { %1736 = vmatprep.subr.bf16.mxu0 %v2281_v53  ;;  %v2653_v9 = vrot.slane %v363_v8, %v367_v7 }
  0xd7   : > { %1793 = vmatpush1.bf16.msra.mxu1 %v1752_v47 }
  0xd8   : > { %476 = vmatmul.mubr.f32.gmra.mrb[12].mxu0 %v305_v13  ;;  %1778 = vmatprep.subr.bf16.mxu1 %v2281_v53 }
  0xd9   : > { %481 = vmatprep.mubr.f32.mxu0 %v2280_v0  ;;  %1738 = vmatpush1.bf16.msra.mxu0 %v1737_v14 }
  0xda   : > { %1739 = vmatprep.subr.bf16.mxu0 %v2281_v53 }
  0xdb   : > { %1794 = vmatpush1.bf16.msra.mxu1 %v1755_v51 }
  0xdc   : > { %482 = vmatmul.mubr.f32.gmra.mrb[14].mxu0 %v306_v17  ;;  %1779 = vmatprep.subr.bf16.mxu1 %v2281_v53 }
  0xdd   : > { %487 = vmatprep.mubr.f32.mxu0 %v2280_v0  ;;  %1741 = vmatpush1.bf16.msra.mxu0 %v1740_v18 }
  0xde   : > { %1742 = vmatprep.subr.bf16.mxu0 %v2281_v53 }
  0xdf   : > { %1795 = vmatpush1.bf16.msra.mxu1 %v1758_v56 }
  0xe0   : > { %488 = vmatmul.mubr.f32.gmra.mrb[16].mxu0 %v307_v19  ;;  %1780 = vmatprep.subr.bf16.mxu1 %v2281_v53 }
  0xe1   : > { %493 = vmatprep.mubr.f32.mxu0 %v2280_v0  ;;  %1744 = vmatpush1.bf16.msra.mxu0 %v1743_v35 }
  0xe2   : > { %1745 = vmatprep.subr.bf16.mxu0 %v2281_v53 }
  0xe3   : > { %1796 = vmatpush1.bf16.msra.mxu1 %v1761_v60 }
  0xe4   : > { %494 = vmatmul.mubr.f32.gmra.mrb[18].mxu0 %v308_v20  ;;  %1781 = vmatprep.subr.bf16.mxu1 %v2281_v53 }
  0xe5   : > { %499 = vmatprep.mubr.f32.mxu0 %v2280_v0  ;;  %1747 = vmatpush1.bf16.msra.mxu0 %v1746_v39 }
  0xe6   : > { %1748 = vmatprep.subr.bf16.mxu0 %v2281_v53 }
  0xe7   : > { %1797 = vmatpush1.bf16.msra.mxu1 %v1764_v1 }
  0xe8   : > { %500 = vmatmul.mubr.f32.gmra.mrb[20].mxu0 %v309_v21 }
  0xe9   : > { %505 = vmatprep.mubr.f32.mxu0 %v2280_v0  ;;  %1750 = vmatpush1.bf16.msra.mxu0 %v1749_v43 }
  0xea   : > { %1751 = vmatprep.subr.bf16.mxu0 %v2281_v53 }
  0xec   : > { %506 = vmatmul.mubr.f32.gmra.mrb[22].mxu0 %v310_v22 }
  0xed   : > { %511 = vmatprep.mubr.f32.mxu0 %v2280_v0  ;;  %1753 = vmatpush1.bf16.msra.mxu0 %v1752_v47 }
  0xee   : > { %1754 = vmatprep.subr.bf16.mxu0 %v2281_v53 }
  0xf0   : > { %512 = vmatmul.mubr.f32.gmra.mrb[24].mxu0 %v311_v23 }
  0xf1   : > { %517 = vmatprep.mubr.f32.mxu0 %v2280_v0  ;;  %1756 = vmatpush1.bf16.msra.mxu0 %v1755_v51 }
  0xf2   : > { %1757 = vmatprep.subr.bf16.mxu0 %v2281_v53 }
  0xf4   : > { %518 = vmatmul.mubr.f32.gmra.mrb[26].mxu0 %v312_v24 }
  0xf5   : > { %523 = vmatprep.mubr.f32.mxu0 %v2280_v0  ;;  %1759 = vmatpush1.bf16.msra.mxu0 %v1758_v56 }
  0xf6   : > { %1760 = vmatprep.subr.bf16.mxu0 %v2281_v53 }
  0xf8   : > { %524 = vmatmul.mubr.f32.gmra.mrb[28].mxu0 %v313_v25 }
  0xf9   : > { %529 = vmatprep.mubr.f32.mxu0 %v2280_v0  ;;  %1762 = vmatpush1.bf16.msra.mxu0 %v1761_v60 }
  0xfa   : > { %1763 = vmatprep.subr.bf16.mxu0 %v2281_v53  ;;  %v371_v53 = vsub.s32 1, %v366_v6 }
  0xfc   : > { %530 = vmatmul.mubr.f32.gmra.mrb[30].mxu0 %v314_v26  ;;  %v2655_v10 = vrot.slane %v363_v8, %v371_v53 }
  0xfd   : > { %535 = vmatprep.mubr.f32.mxu0 %v2280_v0  ;;  %1765 = vmatpush1.bf16.msra.mxu0 %v1764_v1 }
 0x100   : > { %536 = vmatmul.mubr.f32.gmra.mrb[32].mxu0 %v315_v27 }
 0x101   : > { %541 = vmatprep.mubr.f32.mxu0 %v2280_v0 }
 0x104   : > { %542 = vmatmul.mubr.f32.gmra.mrb[34].mxu0 %v316_v28 }
 0x105   : > { %547 = vmatprep.mubr.f32.mxu0 %v2280_v0 }
 0x108   : > { %548 = vmatmul.mubr.f32.gmra.mrb[36].mxu0 %v317_v29 }
 0x109   : > { %553 = vmatprep.mubr.f32.mxu0 %v2280_v0 }
 0x10c   : > { %554 = vmatmul.mubr.f32.gmra.mrb[38].mxu0 %v318_v30 }
 0x10d   : > { %559 = vmatprep.mubr.f32.mxu0 %v2280_v0 }
 0x110   : > { %560 = vmatmul.mubr.f32.gmra.mrb[40].mxu0 %v319_v31 }
 0x111   : > { %565 = vmatprep.mubr.f32.mxu0 %v2280_v0 }
 0x114   : > { %566 = vmatmul.mubr.f32.gmra.mrb[42].mxu0 %v320_v32 }
 0x115   : > { %571 = vmatprep.mubr.f32.mxu0 %v2280_v0 }
 0x118   : > { %572 = vmatmul.mubr.f32.gmra.mrb[44].mxu0 %v321_v36 }
 0x119   : > { %577 = vmatprep.mubr.f32.mxu0 %v2280_v0 }
 0x11c   : > { %578 = vmatmul.mubr.f32.gmra.mrb[46].mxu0 %v322_v40 }
 0x11d   : > { %583 = vmatprep.mubr.f32.mxu0 %v2280_v0 }
 0x120   : > { %584 = vmatmul.mubr.f32.gmra.mrb[48].mxu0 %v323_v44 }
 0x121   : > { %589 = vmatprep.mubr.f32.mxu0 %v2280_v0 }
 0x124   : > { %590 = vmatmul.mubr.f32.gmra.mrb[50].mxu0 %v324_v48 }
 0x125   : > { %595 = vmatprep.mubr.f32.mxu0 %v2280_v0 }
 0x128   : > { %596 = vmatmul.mubr.f32.gmra.mrb[52].mxu0 %v325_v52 }
 0x129   : > { %601 = vmatprep.mubr.f32.mxu0 %v2280_v0 }
 0x12c   : > { %602 = vmatmul.mubr.f32.gmra.mrb[54].mxu0 %v326_v57 }
 0x12d   : > { %607 = vmatprep.mubr.f32.mxu0 %v2280_v0 }
 0x130   : > { %608 = vmatmul.mubr.f32.gmra.mrb[56].mxu0 %v327_v61 }
 0x131   : > { %613 = vmatprep.mubr.f32.mxu0 %v2280_v0 }
 0x134   : > { %614 = vmatmul.mubr.f32.gmra.mrb[58].mxu0 %v328_v2 }
 0x135   : > { %619 = vmatprep.mubr.f32.mxu0 %v2280_v0 }
 0x138   : > { %620 = vmatmul.mubr.f32.gmra.mrb[60].mxu0 %v329_v3 }
 0x139   : > { %625 = vmatprep.mubr.f32.mxu0 %v2280_v0 }
 0x13c   : > { %626 = vmatmul.mubr.f32.gmra.mrb[62].mxu0 %v330_v4 }
 0x193   : > { %v441_v11 = vpop.f32.mrb[0].mxu0 }
 0x194   : > { %v2658_v12 = vadd.f32 %v441_v11, %v2653_v9  ;;  %v443_v13 = vpop.f32.mrb[1].mxu0 }
 0x195   : > { %v2661_v14 = vadd.f32 %v443_v13, %v2655_v10 }
 0x196   : > { %v632_v0 = vmul.f32 %v2658_v12, %v2658_v12 }
 0x197   : > { %v633_v15 = vmul.f32 %v2661_v14, %v2661_v14  ;;  %v447_v16 = vpop.f32.mrb[2].mxu0 }
 0x198   : > { %v696_v17 = vmul.f32 %v632_v0, %v2658_v12  ;;  %v2669_v18 = vadd.f32 %v447_v16, %v2653_v9  ;;  %v449_v19 = vpop.f32.mrb[3].mxu0 }
 0x199   : > { %v697_v20 = vmul.f32 %v633_v15, %v2661_v14  ;;  %v2673_v21 = vadd.f32 %v449_v19, %v2655_v10 }
 0x19a   : > { %v760_v22 = vmul.f32 0.044715, %v696_v17  ;;  %v634_v23 = vmul.f32 %v2669_v18, %v2669_v18 }
 0x19b   : > { %v761_v24 = vmul.f32 0.044715, %v697_v20  ;;  %v635_v25 = vmul.f32 %v2673_v21, %v2673_v21  ;;  %v453_v26 = vpop.f32.mrb[4].mxu0 }
 0x19c   : > { %v824_v27 = vadd.f32 %v760_v22, %v2658_v12  ;;  %v698_v28 = vmul.f32 %v634_v23, %v2669_v18  ;;  %v2682_v29 = vadd.f32 %v453_v26, %v2653_v9  ;;  %v455_v30 = vpop.f32.mrb[5].mxu0 }
 0x19d   : > { %v825_v31 = vadd.f32 %v761_v24, %v2661_v14  ;;  %v699_v32 = vmul.f32 %v635_v25, %v2673_v21  ;;  %v2687_v33 = vadd.f32 %v455_v30, %v2655_v10 }
 0x19e   : > { %v888_v34 = vmul.f32 0.7978846, %v824_v27  ;;  %v762_v35 = vmul.f32 0.044715, %v698_v28  ;;  %v636_v36 = vmul.f32 %v2682_v29, %v2682_v29 }
 0x19f   : > { %v889_v37 = vmul.f32 0.7978846, %v825_v31  ;;  %v763_v38 = vmul.f32 0.044715, %v699_v32  ;;  %v637_v39 = vmul.f32 %v2687_v33, %v2687_v33  ;;  %v459_v40 = vpop.f32.mrb[6].mxu0 }
 0x1a0   : > { %1893 = vtanh.f32 %v888_v34  ;;  %v826_v41 = vadd.f32 %v762_v35, %v2669_v18  ;;  %v700_v42 = vmul.f32 %v636_v36, %v2682_v29  ;;  %v2696_v43 = vadd.f32 %v459_v40, %v2653_v9  ;;  %v461_v44 = vpop.f32.mrb[7].mxu0 }
 0x1a1   : > { %v827_v45 = vadd.f32 %v763_v38, %v2673_v21  ;;  %v701_v46 = vmul.f32 %v637_v39, %v2687_v33  ;;  %v2701_v47 = vadd.f32 %v461_v44, %v2655_v10  ;;  %1895 = vtanh.f32 %v889_v37 }
 0x1a2   : > { %v890_v48 = vmul.f32 0.7978846, %v826_v41  ;;  %v764_v49 = vmul.f32 0.044715, %v700_v42  ;;  %v638_v56 = vmul.f32 %v2696_v43, %v2696_v43 }
 0x1a3   : > { %v891_v50 = vmul.f32 0.7978846, %v827_v45  ;;  %v765_v51 = vmul.f32 0.044715, %v701_v46  ;;  %v639_v52 = vmul.f32 %v2701_v47, %v2701_v47  ;;  %v465_v54 = vpop.f32.mrb[8].mxu0 }
 0x1a4   : > { %v828_v55 = vadd.f32 %v764_v49, %v2682_v29  ;;  %v2709_v57 = vadd.f32 %v465_v54, %v2653_v9  ;;  %v467_v58 = vpop.f32.mrb[9].mxu0  ;;  %1897 = vtanh.f32 %v890_v48  ;;  %v702_v2 = vmul.f32 %v638_v56, %v2696_v43 }
 0x1a5   : > { %v829_v59 = vadd.f32 %v765_v51, %v2687_v33  ;;  %v703_v60 = vmul.f32 %v639_v52, %v2701_v47  ;;  %1899 = vtanh.f32 %v891_v50  ;;  %v2721_v8 = vadd.f32 %v467_v58, %v2655_v10 }
 0x1a6   : > { %v892_v61 = vmul.f32 0.7978846, %v828_v55  ;;  %v640_v3 = vmul.f32 %v2709_v57, %v2709_v57  ;;  %v766_v16 = vmul.f32 0.044715, %v702_v2 }
 0x1a7   : > { %v893_v62 = vmul.f32 0.7978846, %v829_v59  ;;  %v767_v63 = vmul.f32 0.044715, %v703_v60  ;;  %v471_v1 = vpop.f32.mrb[10].mxu0  ;;  %v641_v26 = vmul.f32 %v2721_v8, %v2721_v8 }
 0x1a8   : > { %v2717_v4 = vadd.f32 %v471_v1, %v2653_v9  ;;  %v473_v5 = vpop.f32.mrb[11].mxu0  ;;  %v704_v17 = vmul.f32 %v640_v3, %v2709_v57  ;;  %v830_v36 = vadd.f32 %v766_v16, %v2696_v43 }
 0x1a9   : > { %v831_v6 = vadd.f32 %v767_v63, %v2701_v47  ;;  %1901 = vtanh.f32 %v893_v62  ;;  %v2724_v53 = vadd.f32 %v473_v5, %v2655_v10  ;;  %v705_v56 = vmul.f32 %v641_v26, %v2721_v8 }
 0x1aa   : > { %v1894_v7 = vpop.eup %1893  ;;  %1903 = vtanh.f32 %v892_v61  ;;  %v642_v19 = vmul.f32 %v2717_v4, %v2717_v4  ;;  %v768_v37 = vmul.f32 0.044715, %v704_v17  ;;  %v894_v54 = vmul.f32 0.7978846, %v830_v36 }
 0x1ab   : > { %v1896_v11 = vpop.eup %1895  ;;  %v1016_v13 = vadd.f32 1.0, %v1894_v7  ;;  %v895_v0 = vmul.f32 0.7978846, %v831_v6  ;;  %v477_v15 = vpop.f32.mrb[12].mxu0  ;;  %v643_v27 = vmul.f32 %v2724_v53, %v2724_v53  ;;  %v769_v17 = vmul.f32 0.044715, %v705_v56 }
 0x1ac   : > { %v479_v20 = vpop.f32.mrb[13].mxu0  ;;  %v1017_v22 = vadd.f32 1.0, %v1896_v11  ;;  %v2737_v31 = vadd.f32 %v477_v15, %v2653_v9  ;;  %v706_v38 = vmul.f32 %v642_v19, %v2717_v4  ;;  %v832_v55 = vadd.f32 %v768_v37, %v2709_v57 }
 0x1ad   : > { %v1080_v23 = vmul.f32 0.5, %v1016_v13  ;;  %v2730_v24 = vadd.f32 %v479_v20, %v2655_v10  ;;  %1905 = vtanh.f32 %v895_v0  ;;  %v707_v46 = vmul.f32 %v643_v27, %v2724_v53 }
 0x1ae   : > { %v1898_v25 = vpop.eup %1897  ;;  %v1081_v28 = vmul.f32 0.5, %v1017_v22  ;;  %v644_v50 = vmul.f32 %v2737_v31, %v2737_v31  ;;  %v770_v59 = vmul.f32 0.044715, %v706_v38  ;;  %v896_v0 = vmul.f32 0.7978846, %v832_v55 }
 0x1af   : > { %v1900_v30 = vpop.eup %1899  ;;  %v645_v32 = vmul.f32 %v2730_v24, %v2730_v24  ;;  %v483_v34 = vpop.f32.mrb[14].mxu0  ;;  %v1018_v35 = vadd.f32 1.0, %v1898_v25  ;;  %v1144_v41 = vmul.f32 %v1080_v23, %v2658_v12  ;;  %v771_v63 = vmul.f32 0.044715, %v707_v46 }
 0x1b0   : > { %v485_v39 = vpop.f32.mrb[15].mxu0  ;;  %v1145_v40 = vmul.f32 %v1081_v28, %v2661_v14  ;;  %v2746_v42 = vadd.f32 %v483_v34, %v2653_v9  ;;  %v1019_v45 = vadd.f32 1.0, %v1900_v30  ;;  %v708_v5 = vmul.f32 %v644_v50, %v2737_v31 }
 0x1b1   : > { %v2749_v44 = vadd.f32 %v485_v39, %v2655_v10  ;;  %v1082_v48 = vmul.f32 0.5, %v1018_v35  ;;  %v709_v51 = vmul.f32 %v645_v32, %v2730_v24  ;;  %v834_v25 = vadd.f32 %v770_v59, %v2717_v4 }
 0x1b2   : > { %1311 = vmatprep.mubr.f32.mxu0 %v1145_v40  ;;  %v1083_v12 = vmul.f32 0.5, %v1019_v45  ;;  %v646_v60 = vmul.f32 %v2746_v42, %v2746_v42  ;;  %v835_v26 = vadd.f32 %v771_v63, %v2724_v53  ;;  %v772_v30 = vmul.f32 0.044715, %v708_v5 }
 0x1b3   : > { %v1902_v49 = vpop.eup %1901  ;;  %v489_v14 = vpop.f32.mrb[16].mxu0  ;;  %1312 = vmatmul.mubr.f32.vlgmr.msra.gmra.mrb[64].mxu0 %v1144_v41  ;;  %v647_v61 = vmul.f32 %v2749_v44, %v2749_v44  ;;  %v1146_v2 = vmul.f32 %v1082_v48, %v2669_v18  ;;  %v773_v6 = vmul.f32 0.044715, %v709_v51  ;;  %1907 = vtanh.f32 %v894_v54 }
 0x1b4   : > { %v1904_v52 = vpop.eup %1903  ;;  %v491_v58 = vpop.f32.mrb[17].mxu0  ;;  %v1147_v62 = vmul.f32 %v1083_v12, %v2673_v21  ;;  %v2763_v1 = vadd.f32 %v489_v14, %v2653_v9  ;;  %v1021_v3 = vadd.f32 1.0, %v1902_v49  ;;  %v710_v18 = vmul.f32 %v646_v60, %v2746_v42 }
 0x1b5   : > { %v2768_v7 = vadd.f32 %v491_v58, %v2655_v10  ;;  %v1020_v13 = vadd.f32 1.0, %v1904_v52  ;;  %v711_v20 = vmul.f32 %v647_v61, %v2749_v44  ;;  %v837_v32 = vadd.f32 %v773_v6, %v2730_v24 }
 0x1b6   : > { %1316 = vmatprep.mubr.f32.mxu0 %v1147_v62  ;;  %v1085_v16 = vmul.f32 0.5, %v1021_v3  ;;  %v648_v27 = vmul.f32 %v2763_v1, %v2763_v1  ;;  %v774_v41 = vmul.f32 0.044715, %v710_v18  ;;  %v836_v51 = vadd.f32 %v772_v30, %v2737_v31 }
 0x1b7   : > { %v495_v11 = vpop.f32.mrb[18].mxu0  ;;  %1317 = vmatmul.mubr.f32.gmra.mrb[66].mxu0 %v1146_v2  ;;  %v1906_v19 = vpop.eup %1905  ;;  %v1084_v23 = vmul.f32 0.5, %v1020_v13  ;;  %v649_v34 = vmul.f32 %v2768_v7, %v2768_v7  ;;  %v775_v45 = vmul.f32 0.044715, %v711_v20  ;;  %v833_v55 = vadd.f32 %v769_v17, %v2721_v8 }
 0x1b8   : > { %v2771_v15 = vadd.f32 %v495_v11, %v2653_v9  ;;  %v497_v21 = vpop.f32.mrb[19].mxu0  ;;  %v1149_v28 = vmul.f32 %v1085_v16, %v2687_v33  ;;  %v1023_v40 = vadd.f32 1.0, %v1906_v19  ;;  %v712_v48 = vmul.f32 %v648_v27, %v2763_v1 }
 0x1b9   : > { %v2776_v22 = vadd.f32 %v497_v21, %v2655_v10  ;;  %v1148_v36 = vmul.f32 %v1084_v23, %v2682_v29  ;;  %v898_v29 = vmul.f32 0.7978846, %v834_v25  ;;  %v713_v14 = vmul.f32 %v649_v34, %v2768_v7 }
 0x1ba   : > { %v650_v37 = vmul.f32 %v2771_v15, %v2771_v15  ;;  %1321 = vmatprep.mubr.f32.mxu0 %v1149_v28  ;;  %v1087_v50 = vmul.f32 0.5, %v1023_v40  ;;  %v899_v56 = vmul.f32 0.7978846, %v835_v26  ;;  %v901_v61 = vmul.f32 0.7978846, %v837_v32 }
 0x1bb   : > { %v501_v35 = vpop.f32.mrb[20].mxu0  ;;  %v651_v38 = vmul.f32 %v2776_v22, %v2776_v22  ;;  %1322 = vmatmul.mubr.f32.gmra.mrb[68].mxu0 %v1148_v36  ;;  %v838_v62 = vadd.f32 %v774_v41, %v2746_v42  ;;  %v839_v63 = vadd.f32 %v775_v45, %v2749_v44  ;;  %v897_v2 = vmul.f32 0.7978846, %v833_v55 }
 0x1bc   : > { %v2792_v39 = vadd.f32 %v501_v35, %v2653_v9  ;;  %v503_v33 = vpop.f32.mrb[21].mxu0  ;;  %v714_v54 = vmul.f32 %v650_v37, %v2771_v15  ;;  %v1151_v59 = vmul.f32 %v1087_v50, %v2701_v47  ;;  %v776_v3 = vmul.f32 0.044715, %v712_v48 }
 0x1bd   : > { %v2795_v46 = vadd.f32 %v503_v33, %v2655_v10  ;;  %v715_v58 = vmul.f32 %v651_v38, %v2776_v22  ;;  %1909 = vtanh.f32 %v896_v0  ;;  %v900_v11 = vmul.f32 0.7978846, %v836_v51  ;;  %v1908_v27 = vpop.eup %1907 }
 0x1be   : > { %v652_v49 = vmul.f32 %v2792_v39, %v2792_v39  ;;  %1326 = vmatprep.mubr.f32.mxu0 %v1151_v59  ;;  %v777_v13 = vmul.f32 0.044715, %v713_v14  ;;  %1911 = vtanh.f32 %v897_v2  ;;  %v778_v16 = vmul.f32 0.044715, %v714_v54 }
 0x1bf   : > { %v653_v12 = vmul.f32 %v2795_v46, %v2795_v46  ;;  %v507_v52 = vpop.f32.mrb[22].mxu0  ;;  %v779_v17 = vmul.f32 0.044715, %v715_v58  ;;  %1913 = vtanh.f32 %v899_v56  ;;  %v902_v18 = vmul.f32 0.7978846, %v838_v62 }
 0x1c0   : > { %v509_v60 = vpop.f32.mrb[23].mxu0  ;;  %v716_v5 = vmul.f32 %v652_v49, %v2792_v39  ;;  %v2812_v6 = vadd.f32 %v507_v52, %v2653_v9  ;;  %v903_v20 = vmul.f32 0.7978846, %v839_v63  ;;  %1915 = vtanh.f32 %v898_v29 }
 0x1c1   : > { %v717_v21 = vmul.f32 %v653_v12, %v2795_v46  ;;  %v2816_v23 = vadd.f32 %v509_v60, %v2655_v10  ;;  %v840_v25 = vadd.f32 %v776_v3, %v2763_v1  ;;  %1917 = vtanh.f32 %v901_v61 }
 0x1c2   : > { %v780_v26 = vmul.f32 0.044715, %v716_v5  ;;  %v654_v0 = vmul.f32 %v2812_v6, %v2812_v6  ;;  %v841_v28 = vadd.f32 %v777_v13, %v2768_v7  ;;  %1919 = vtanh.f32 %v900_v11 }
 0x1c3   : > { %v513_v47 = vpop.f32.mrb[24].mxu0  ;;  %v781_v30 = vmul.f32 0.044715, %v717_v21  ;;  %v842_v35 = vadd.f32 %v778_v16, %v2771_v15  ;;  %v843_v36 = vadd.f32 %v779_v17, %v2776_v22  ;;  %v1022_v37 = vadd.f32 1.0, %v1908_v27 }
 0x1c4   : > { %v515_v19 = vpop.f32.mrb[25].mxu0  ;;  %v2823_v32 = vadd.f32 %v513_v47, %v2653_v9  ;;  %v655_v40 = vmul.f32 %v2816_v23, %v2816_v23  ;;  %1921 = vtanh.f32 %v903_v20  ;;  %v2835_v45 = vmul.f32 0.7978846, %v840_v25 }
 0x1c5   : > { %v2828_v38 = vadd.f32 %v515_v19, %v2655_v10  ;;  %v844_v29 = vadd.f32 %v780_v26, %v2792_v39  ;;  %v718_v48 = vmul.f32 %v654_v0, %v2812_v6  ;;  %v1086_v49 = vmul.f32 0.5, %v1022_v37 }
 0x1c6   : > { %v2839_v50 = vmul.f32 0.7978846, %v841_v28  ;;  %v845_v51 = vadd.f32 %v781_v30, %v2795_v46  ;;  %v656_v14 = vmul.f32 %v2823_v32, %v2823_v32  ;;  %1923 = vtanh.f32 %v902_v18 }
 0x1c7   : > { %v519_v34 = vpop.f32.mrb[26].mxu0  ;;  %v1910_v52 = vpop.eup %1909  ;;  %v2844_v55 = vmul.f32 0.7978846, %v842_v35  ;;  %v2846_v56 = vmul.f32 0.7978846, %v843_v36  ;;  %v1150_v54 = vmul.f32 %v1086_v49, %v2696_v43  ;;  %v657_v58 = vmul.f32 %v2828_v38, %v2828_v38 }
 0x1c8   : > { %v521_v33 = vpop.f32.mrb[27].mxu0  ;;  %v2833_v41 = vadd.f32 %v519_v34, %v2653_v9  ;;  %v1912_v60 = vpop.eup %1911  ;;  %v719_v61 = vmul.f32 %v655_v40, %v2816_v23  ;;  %v1024_v62 = vadd.f32 1.0, %v1910_v52  ;;  %v2857_v5 = vmul.f32 0.7978846, %v844_v29 }
 0x1c9   : > { %v2855_v2 = vadd.f32 %v521_v33, %v2655_v10  ;;  %v1914_v3 = vpop.eup %1913  ;;  %v782_v11 = vmul.f32 0.044715, %v718_v48  ;;  %1327 = vmatmul.mubr.f32.gmra.mrb[70].mxu0 %v1150_v54  ;;  %v1025_v43 = vadd.f32 1.0, %v1912_v60  ;;  %v2862_v47 = vmul.f32 0.7978846, %v845_v51 }
 0x1ca   : > { %v658_v63 = vmul.f32 %v2833_v41, %v2833_v41  ;;  %v1916_v21 = vpop.eup %1915  ;;  %v720_v16 = vmul.f32 %v656_v14, %v2823_v32  ;;  %v1088_v17 = vmul.f32 0.5, %v1024_v62  ;;  %v1027_v19 = vadd.f32 1.0, %v1914_v3 }
 0x1cb   : > { %v525_v12 = vpop.f32.mrb[28].mxu0  ;;  %v1918_v18 = vpop.eup %1917  ;;  %v1089_v20 = vmul.f32 0.5, %v1025_v43  ;;  %v721_v25 = vmul.f32 %v657_v58, %v2828_v38  ;;  %v1026_v26 = vadd.f32 1.0, %v1916_v21  ;;  %v659_v35 = vmul.f32 %v2855_v2, %v2855_v2 }
 0x1cc   : > { %v527_v59 = vpop.f32.mrb[29].mxu0  ;;  %v2860_v13 = vadd.f32 %v525_v12, %v2653_v9  ;;  %v1920_v28 = vpop.eup %1919  ;;  %v1091_v30 = vmul.f32 0.5, %v1027_v19  ;;  %v722_v34 = vmul.f32 %v658_v63, %v2833_v41  ;;  %v1029_v36 = vadd.f32 1.0, %v1918_v18 }
 0x1cd   : > { %v2867_v0 = vadd.f32 %v527_v59, %v2655_v10  ;;  %v783_v33 = vmul.f32 0.044715, %v719_v61  ;;  %v1153_v40 = vmul.f32 %v1089_v20, %v2721_v8  ;;  %v1090_v29 = vmul.f32 0.5, %v1026_v26 }
 0x1ce   : > { %v660_v48 = vmul.f32 %v2860_v13, %v2860_v13  ;;  %v1922_v49 = vpop.eup %1921  ;;  %v1152_v51 = vmul.f32 %v1088_v17, %v2709_v57  ;;  %v1155_v14 = vmul.f32 %v1091_v30, %v2724_v53  ;;  %v1093_v12 = vmul.f32 0.5, %v1029_v36 }
 0x1cf   : > { %v531_v27 = vpop.f32.mrb[30].mxu0  ;;  %v1028_v52 = vadd.f32 1.0, %v1920_v28  ;;  %1331 = vmatprep.mubr.f32.mxu1 %v1153_v40  ;;  %v784_v58 = vmul.f32 0.044715, %v720_v16  ;;  %v785_v59 = vmul.f32 0.044715, %v721_v25  ;;  %v661_v60 = vmul.f32 %v2867_v0, %v2867_v0 }
 0x1d0   : > { %v533_v37 = vpop.f32.mrb[31].mxu0  ;;  %v1031_v61 = vadd.f32 1.0, %v1922_v49  ;;  %v1924_v62 = vpop.eup %1923  ;;  %1332 = vmatmul.mubr.f32.vlgmr.msra.gmra.mrb[0].mxu1 %v1152_v51  ;;  %v786_v63 = vmul.f32 0.044715, %v722_v34  ;;  %v723_v3 = vmul.f32 %v659_v35, %v2855_v2  ;;  %v2881_v57 = vadd.f32 %v531_v27, %v2653_v9 }
 0x1d1   : > { %v2884_v53 = vadd.f32 %v533_v37, %v2655_v10  ;;  %1336 = vmatprep.mubr.f32.mxu1 %v1155_v14  ;;  %v1154_v43 = vmul.f32 %v1090_v29, %v2717_v4  ;;  %v1157_v21 = vmul.f32 %v1093_v12, %v2730_v24  ;;  %v724_v16 = vmul.f32 %v660_v48, %v2860_v13 }
 0x1d2   : > { %v1095_v17 = vmul.f32 0.5, %v1031_v61  ;;  %v1092_v19 = vmul.f32 0.5, %v1028_v52  ;;  %v725_v18 = vmul.f32 %v661_v60, %v2867_v0  ;;  %v1030_v20 = vadd.f32 1.0, %v1924_v62 }
 0x1d3   : > { %v537_v54 = vpop.f32.mrb[32].mxu0  ;;  %1925 = vtanh.f32 %v2839_v50  ;;  %v846_v26 = vadd.f32 %v782_v11, %v2812_v6  ;;  %v847_v27 = vadd.f32 %v783_v33, %v2816_v23  ;;  %v662_v28 = vmul.f32 %v2881_v57, %v2881_v57 }
 0x1d4   : > { %v539_v8 = vpop.f32.mrb[33].mxu0  ;;  %v663_v4 = vmul.f32 %v2884_v53, %v2884_v53  ;;  %v848_v30 = vadd.f32 %v784_v58, %v2823_v32  ;;  %v849_v34 = vadd.f32 %v785_v59, %v2828_v38  ;;  %1337 = vmatmul.mubr.f32.gmra.mrb[2].mxu1 %v1154_v43  ;;  %v2900_v35 = vadd.f32 %v537_v54, %v2653_v9 }
 0x1d5   : > { %1927 = vtanh.f32 %v2835_v45  ;;  %v850_v50 = vadd.f32 %v786_v63, %v2833_v41  ;;  %v787_v11 = vmul.f32 0.044715, %v723_v3  ;;  %1341 = vmatprep.mubr.f32.mxu1 %v1157_v21  ;;  %v1159_v36 = vmul.f32 %v1095_v17, %v2749_v44 }
 0x1d6   : > { %1929 = vtanh.f32 %v2846_v56  ;;  %v788_v37 = vmul.f32 0.044715, %v724_v16  ;;  %v1156_v33 = vmul.f32 %v1092_v19, %v2737_v31  ;;  %v789_v40 = vmul.f32 0.044715, %v725_v18 }
 0x1d7   : > { %v543_v25 = vpop.f32.mrb[34].mxu0  ;;  %v1094_v29 = vmul.f32 0.5, %v1030_v20  ;;  %v2907_v49 = vmul.f32 0.7978846, %v846_v26  ;;  %v726_v51 = vmul.f32 %v662_v28, %v2881_v57  ;;  %v727_v45 = vmul.f32 %v663_v4, %v2884_v53 }
 0x1d8   : > { %v545_v24 = vpop.f32.mrb[35].mxu0  ;;  %1931 = vtanh.f32 %v2844_v55  ;;  %v911_v12 = vmul.f32 0.7978846, %v847_v27  ;;  %v2912_v52 = vmul.f32 0.7978846, %v848_v30  ;;  %1342 = vmatmul.mubr.f32.gmra.mrb[4].mxu1 %v1156_v33  ;;  %v664_v44 = vmul.f32 %v2900_v35, %v2900_v35 }
 0x1d9   : > { %v2917_v31 = vadd.f32 %v539_v8, %v2655_v10  ;;  %v2919_v56 = vmul.f32 0.7978846, %v849_v34  ;;  %v851_v54 = vadd.f32 %v787_v11, %v2855_v2  ;;  %1346 = vmatprep.mubr.f32.mxu1 %v1159_v36  ;;  %v2923_v58 = vadd.f32 %v543_v25, %v2653_v9 }
 0x1da   : > { %1933 = vtanh.f32 %v2862_v47  ;;  %v2926_v55 = vmul.f32 0.7978846, %v850_v50  ;;  %v852_v59 = vadd.f32 %v788_v37, %v2860_v13  ;;  %v853_v60 = vadd.f32 %v789_v40, %v2867_v0 }
 0x1db   : > { %v549_v48 = vpop.f32.mrb[36].mxu0  ;;  %v1158_v61 = vmul.f32 %v1094_v29, %v2746_v42  ;;  %v790_v8 = vmul.f32 0.044715, %v726_v51  ;;  %v791_v62 = vmul.f32 0.044715, %v727_v45  ;;  %1935 = vtanh.f32 %v2857_v5 }
 0x1dc   : > { %v551_v14 = vpop.f32.mrb[37].mxu0  ;;  %v728_v43 = vmul.f32 %v664_v44, %v2900_v35  ;;  %v665_v47 = vmul.f32 %v2917_v31, %v2917_v31  ;;  %v2936_v21 = vadd.f32 %v545_v24, %v2655_v10  ;;  %1937 = vtanh.f32 %v911_v12 }
 0x1dd   : > { %v1926_v3 = vpop.eup %1925  ;;  %1347 = vmatmul.mubr.f32.gmra.mrb[6].mxu1 %v1158_v61  ;;  %v2938_v17 = vmul.f32 0.7978846, %v851_v54  ;;  %v666_v19 = vmul.f32 %v2923_v58, %v2923_v58  ;;  %v2943_v5 = vadd.f32 %v549_v48, %v2653_v9  ;;  %v2945_v20 = vmul.f32 0.7978846, %v852_v59 }
 0x1de   : > { %v1033_v42 = vadd.f32 1.0, %v1926_v3  ;;  %v2947_v25 = vmul.f32 0.7978846, %v853_v60  ;;  %v2950_v26 = vadd.f32 %v551_v14, %v2655_v10  ;;  %v2956_v24 = vadd.f32 %v790_v8, %v2881_v57 }
 0x1df   : > { %v555_v63 = vpop.f32.mrb[38].mxu0  ;;  %v1928_v18 = vpop.eup %1927  ;;  %v855_v30 = vadd.f32 %v791_v62, %v2884_v53  ;;  %v792_v36 = vmul.f32 0.044715, %v728_v43  ;;  %v729_v37 = vmul.f32 %v665_v47, %v2917_v31  ;;  %v667_v40 = vmul.f32 %v2936_v21, %v2936_v21 }
 0x1e0   : > { %v557_v16 = vpop.f32.mrb[39].mxu0  ;;  %v2953_v27 = vadd.f32 %v555_v63, %v2653_v9  ;;  %v1930_v4 = vpop.eup %1929  ;;  %v1097_v34 = vmul.f32 0.5, %v1033_v42  ;;  %v1032_v50 = vadd.f32 1.0, %v1928_v18  ;;  %v730_v45 = vmul.f32 %v666_v19, %v2923_v58 }
 0x1e1   : > { %v1035_v33 = vadd.f32 1.0, %v1930_v4  ;;  %v668_v14 = vmul.f32 %v2943_v5, %v2943_v5  ;;  %v669_v54 = vmul.f32 %v2950_v26, %v2950_v26  ;;  %v2974_v8 = vmul.f32 0.7978846, %v855_v30 }
 0x1e2   : > { %v1932_v29 = vpop.eup %1931  ;;  %v1161_v48 = vmul.f32 %v1097_v34, %v2768_v7  ;;  %v1096_v51 = vmul.f32 0.5, %v1032_v50  ;;  %v670_v59 = vmul.f32 %v2953_v27, %v2953_v27  ;;  %1939 = vtanh.f32 %v2907_v49 }
 0x1e3   : > { %v561_v28 = vpop.f32.mrb[40].mxu0  ;;  %v1099_v12 = vmul.f32 0.5, %v1035_v33  ;;  %v1034_v44 = vadd.f32 1.0, %v1932_v29  ;;  %v2979_v62 = vadd.f32 %v557_v16, %v2655_v10  ;;  %v793_v3 = vmul.f32 0.044715, %v729_v37 }
 0x1e4   : > { %v2959_v11 = vpop.f32.mrb[41].mxu0  ;;  %v1934_v61 = vpop.eup %1933  ;;  %1351 = vmatprep.mubr.f32.mxu1 %v1161_v48  ;;  %v1160_v7 = vmul.f32 %v1096_v51, %v2763_v1  ;;  %v794_v18 = vmul.f32 0.044715, %v730_v45  ;;  %v731_v4 = vmul.f32 %v667_v40, %v2936_v21  ;;  %v732_v30 = vmul.f32 %v668_v14, %v2943_v5 }
 0x1e5   : > { %v1163_v43 = vmul.f32 %v1099_v12, %v2776_v22  ;;  %v1098_v47 = vmul.f32 0.5, %v1034_v44  ;;  %v1037_v42 = vadd.f32 1.0, %v1934_v61  ;;  %v1936_v19 = vpop.eup %1935  ;;  %1941 = vtanh.f32 %v2919_v56 }
 0x1e6   : > { %1352 = vmatmul.mubr.f32.gmra.mrb[8].mxu1 %v1160_v7  ;;  %v1938_v1 = vpop.eup %1937  ;;  %v1036_v16 = vadd.f32 1.0, %v1936_v19  ;;  %v733_v34 = vmul.f32 %v669_v54, %v2950_v26  ;;  %v734_v50 = vmul.f32 %v670_v59, %v2953_v27  ;;  %v856_v37 = vadd.f32 %v792_v36, %v2900_v35 }
 0x1e7   : > { %v2972_v60 = vpop.f32.mrb[42].mxu0  ;;  %1356 = vmatprep.mubr.f32.mxu1 %v1163_v43  ;;  %v1101_v49 = vmul.f32 0.5, %v1037_v42  ;;  %v1162_v33 = vmul.f32 %v1098_v47, %v2771_v15  ;;  %v1039_v29 = vadd.f32 1.0, %v1938_v1  ;;  %v671_v40 = vmul.f32 %v2979_v62, %v2979_v62 }
 0x1e8   : > { %v2981_v63 = vpop.f32.mrb[43].mxu0  ;;  %v1100_v51 = vmul.f32 0.5, %v1036_v16  ;;  %v2995_v45 = vadd.f32 %v561_v28, %v2653_v9  ;;  %1943 = vtanh.f32 %v2912_v52  ;;  %v857_v14 = vadd.f32 %v793_v3, %v2917_v31 }
 0x1e9   : > { %v1165_v56 = vmul.f32 %v1101_v49, %v2795_v46  ;;  %v795_v12 = vmul.f32 0.044715, %v731_v4  ;;  %v796_v36 = vmul.f32 0.044715, %v732_v30  ;;  %v1103_v44 = vmul.f32 0.5, %v1039_v29 }
 0x1ea   : > { %1357 = vmatmul.mubr.f32.gmra.mrb[10].mxu1 %v1162_v33  ;;  %v858_v15 = vadd.f32 %v794_v18, %v2923_v58  ;;  %v797_v54 = vmul.f32 0.044715, %v733_v34  ;;  %v798_v59 = vmul.f32 0.044715, %v734_v50  ;;  %1945 = vtanh.f32 %v2938_v17 }
 0x1eb   : > { %v573_v22 = vpop.f32.mrb[44].mxu0  ;;  %1361 = vmatprep.mubr.f32.mxu1 %v1165_v56  ;;  %v1164_v61 = vmul.f32 %v1100_v51, %v2792_v39  ;;  %v1167_v28 = vmul.f32 %v1103_v44, %v2816_v23  ;;  %v735_v52 = vmul.f32 %v671_v40, %v2979_v62  ;;  %1947 = vtanh.f32 %v2926_v55 }
 0x1ec   : > { %v575_v48 = vpop.f32.mrb[45].mxu0  ;;  %v918_v3 = vmul.f32 0.7978846, %v2956_v24  ;;  %v672_v43 = vmul.f32 %v2995_v45, %v2995_v45  ;;  %1949 = vtanh.f32 %v2947_v25  ;;  %v1940_v47 = vpop.eup %1939  ;;  %v3009_v42 = vmul.f32 0.7978846, %v856_v37 }
 0x1ed   : > { %v859_v17 = vadd.f32 %v795_v12, %v2936_v21  ;;  %v860_v39 = vadd.f32 %v796_v36, %v2943_v5  ;;  %1951 = vtanh.f32 %v2945_v20  ;;  %v3014_v23 = vmul.f32 0.7978846, %v857_v14 }
 0x1ee   : > { %1362 = vmatmul.mubr.f32.gmra.mrb[12].mxu1 %v1164_v61  ;;  %v3016_v55 = vmul.f32 0.7978846, %v858_v15  ;;  %v861_v24 = vadd.f32 %v797_v54, %v2950_v26  ;;  %v1038_v19 = vadd.f32 1.0, %v1940_v47  ;;  %v862_v4 = vadd.f32 %v798_v59, %v2953_v27 }
 0x1ef   : > { %v579_v46 = vpop.f32.mrb[46].mxu0  ;;  %1366 = vmatprep.mubr.f32.mxu1 %v1167_v28  ;;  %v1942_v25 = vpop.eup %1941  ;;  %v799_v30 = vmul.f32 0.044715, %v735_v52  ;;  %v3024_v1 = vadd.f32 %v2959_v11, %v2655_v10  ;;  %1953 = vtanh.f32 %v2974_v8  ;;  %v736_v34 = vmul.f32 %v672_v43, %v2995_v45 }
 0x1f0   : > { %v581_v7 = vpop.f32.mrb[47].mxu0  ;;  %v1102_v49 = vmul.f32 0.5, %v1038_v19  ;;  %v1041_v16 = vadd.f32 1.0, %v1942_v25  ;;  %v3032_v50 = vadd.f32 %v2972_v60, %v2653_v9  ;;  %v3034_v37 = vmul.f32 0.7978846, %v859_v17 }
 0x1f1   : > { %v3036_v33 = vmul.f32 0.7978846, %v860_v39  ;;  %v3040_v11 = vadd.f32 %v2981_v63, %v2655_v10  ;;  %v3043_v8 = vadd.f32 %v573_v22, %v2653_v9  ;;  %v3045_v40 = vmul.f32 0.7978846, %v861_v24 }
 0x1f2   : > { %v1944_v29 = vpop.eup %1943  ;;  %v1166_v56 = vmul.f32 %v1102_v49, %v2812_v6  ;;  %v1105_v51 = vmul.f32 0.5, %v1041_v16  ;;  %v3049_v60 = vadd.f32 %v575_v48, %v2655_v10  ;;  %v3053_v12 = vmul.f32 0.7978846, %v862_v4 }
 0x1f3   : > { %v3019_v18 = vpop.f32.mrb[48].mxu0  ;;  %v3056_v36 = vadd.f32 %v799_v30, %v2979_v62  ;;  %v1040_v63 = vadd.f32 1.0, %v1944_v29  ;;  %v673_v22 = vmul.f32 %v3024_v1, %v3024_v1  ;;  %v800_v54 = vmul.f32 0.044715, %v736_v34 }
 0x1f4   : > { %v3027_v20 = vpop.f32.mrb[49].mxu0  ;;  %v1946_v15 = vpop.eup %1945  ;;  %1367 = vmatmul.mubr.f32.gmra.mrb[14].mxu1 %v1166_v56  ;;  %v1169_v6 = vmul.f32 %v1105_v51, %v2828_v38  ;;  %v674_v48 = vmul.f32 %v3032_v50, %v3032_v50  ;;  %1955 = vtanh.f32 %v918_v3  ;;  %v675_v52 = vmul.f32 %v3040_v11, %v3040_v11 }
 0x1f5   : > { %v1948_v59 = vpop.eup %1947  ;;  %v1104_v61 = vmul.f32 0.5, %v1040_v63  ;;  %v1043_v28 = vadd.f32 1.0, %v1946_v15  ;;  %v676_v43 = vmul.f32 %v3043_v8, %v3043_v8  ;;  %v677_v38 = vmul.f32 %v3049_v60, %v3049_v60 }
 0x1f6   : > { %v1950_v47 = vpop.eup %1949  ;;  %1371 = vmatprep.mubr.f32.mxu1 %v1169_v6  ;;  %v1042_v17 = vadd.f32 1.0, %v1948_v59  ;;  %v3072_v39 = vadd.f32 %v579_v46, %v2653_v9  ;;  %v3075_v3 = vadd.f32 %v581_v7, %v2655_v10  ;;  %v737_v4 = vmul.f32 %v673_v22, %v3024_v1 }
 0x1f7   : > { %v3051_v14 = vpop.f32.mrb[50].mxu0  ;;  %v1952_v19 = vpop.eup %1951  ;;  %v1168_v25 = vmul.f32 %v1104_v61, %v2823_v32  ;;  %v1107_v30 = vmul.f32 0.5, %v1043_v28  ;;  %v1045_v49 = vadd.f32 1.0, %v1950_v47  ;;  %v864_v34 = vadd.f32 %v800_v54, %v2995_v45 }
 0x1f8   : > { %v3060_v44 = vpop.f32.mrb[51].mxu0  ;;  %v738_v29 = vmul.f32 %v674_v48, %v3032_v50  ;;  %v1106_v46 = vmul.f32 0.5, %v1042_v17  ;;  %v1044_v56 = vadd.f32 1.0, %v1952_v19  ;;  %v739_v63 = vmul.f32 %v675_v52, %v3040_v11 }
 0x1f9   : > { %v1954_v51 = vpop.eup %1953  ;;  %1372 = vmatmul.mubr.f32.gmra.mrb[16].mxu1 %v1168_v25  ;;  %v1171_v7 = vmul.f32 %v1107_v30, %v2855_v2  ;;  %v1109_v15 = vmul.f32 0.5, %v1045_v49  ;;  %v740_v32 = vmul.f32 %v676_v43, %v3043_v8  ;;  %v741_v22 = vmul.f32 %v677_v38, %v3049_v60 }
 0x1fa   : > { %v1047_v6 = vadd.f32 1.0, %v1954_v51  ;;  %v678_v59 = vmul.f32 %v3072_v39, %v3072_v39  ;;  %v679_v54 = vmul.f32 %v3075_v3, %v3075_v3  ;;  %v1170_v61 = vmul.f32 %v1106_v46, %v2833_v41 }
 0x1fb   : > { %v3077_v24 = vpop.f32.mrb[52].mxu0  ;;  %1376 = vmatprep.mubr.f32.mxu1 %v1171_v7  ;;  %v1173_v2 = vmul.f32 %v1109_v15, %v2867_v0  ;;  %v1108_v28 = vmul.f32 0.5, %v1044_v56  ;;  %1957 = vtanh.f32 %v3014_v23  ;;  %v801_v43 = vmul.f32 0.044715, %v737_v4 }
 0x1fc   : > { %v3081_v16 = vpop.f32.mrb[53].mxu0  ;;  %v1111_v47 = vmul.f32 0.5, %v1047_v6  ;;  %v3102_v17 = vadd.f32 %v3019_v18, %v2653_v9  ;;  %1959 = vtanh.f32 %v3009_v42  ;;  %v802_v38 = vmul.f32 0.044715, %v738_v29 }
 0x1fd   : > { %1377 = vmatmul.mubr.f32.gmra.mrb[18].mxu1 %v1170_v61  ;;  %v803_v19 = vmul.f32 0.044715, %v739_v63  ;;  %v804_v25 = vmul.f32 0.044715, %v740_v32  ;;  %1961 = vtanh.f32 %v3034_v37  ;;  %v805_v0 = vmul.f32 0.044715, %v741_v22 }
 0x1fe   : > { %v1956_v41 = vpop.eup %1955  ;;  %1381 = vmatprep.mubr.f32.mxu1 %v1173_v2  ;;  %v1175_v23 = vmul.f32 %v1111_v47, %v2884_v53  ;;  %v742_v4 = vmul.f32 %v678_v59, %v3072_v39  ;;  %1963 = vtanh.f32 %v3016_v55  ;;  %v1172_v18 = vmul.f32 %v1108_v28, %v2860_v13 }
 0x1ff   : > { %v3093_v48 = vpop.f32.mrb[54].mxu0  ;;  %v1046_v42 = vadd.f32 1.0, %v1956_v41  ;;  %v743_v49 = vmul.f32 %v679_v54, %v3075_v3  ;;  %v3115_v29 = vadd.f32 %v3027_v20, %v2655_v10  ;;  %v927_v46 = vmul.f32 0.7978846, %v3056_v36 }
 0x200   : > { %v3098_v52 = vpop.f32.mrb[55].mxu0  ;;  %v865_v53 = vadd.f32 %v801_v43, %v3024_v1  ;;  %v680_v55 = vmul.f32 %v3102_v17, %v3102_v17  ;;  %1965 = vtanh.f32 %v3045_v40  ;;  %v866_v13 = vadd.f32 %v802_v38, %v3032_v50 }
 0x201   : > { %v867_v56 = vadd.f32 %v803_v19, %v3040_v11  ;;  %1382 = vmatmul.mubr.f32.gmra.mrb[20].mxu1 %v1172_v18  ;;  %v1110_v51 = vmul.f32 0.5, %v1046_v42  ;;  %v3128_v20 = vadd.f32 %v3051_v14, %v2653_v9  ;;  %v3130_v7 = vmul.f32 0.7978846, %v864_v34 }
 0x202   : > { %v868_v36 = vadd.f32 %v804_v25, %v3043_v8  ;;  %v869_v63 = vadd.f32 %v805_v0, %v3049_v60  ;;  %1386 = vmatprep.mubr.f32.mxu1 %v1175_v23  ;;  %1967 = vtanh.f32 %v3036_v33  ;;  %v806_v15 = vmul.f32 0.044715, %v742_v4 }
 0x203   : > { %v3109_v30 = vpop.f32.mrb[56].mxu0  ;;  %v1174_v32 = vmul.f32 %v1110_v51, %v2881_v57  ;;  %v807_v22 = vmul.f32 0.044715, %v743_v49  ;;  %v681_v6 = vmul.f32 %v3115_v29, %v3115_v29  ;;  %v929_v34 = vmul.f32 0.7978846, %v865_v53 }
 0x204   : > { %v3117_v37 = vpop.f32.mrb[57].mxu0  ;;  %v744_v59 = vmul.f32 %v680_v55, %v3102_v17  ;;  %v3145_v54 = vadd.f32 %v3060_v44, %v2655_v10  ;;  %1969 = vtanh.f32 %v927_v46  ;;  %v3147_v61 = vmul.f32 0.7978846, %v866_v13 }
 0x205   : > { %v1958_v33 = vpop.eup %1957  ;;  %v3149_v2 = vmul.f32 0.7978846, %v867_v56  ;;  %1387 = vmatmul.mubr.f32.gmra.mrb[22].mxu1 %v1174_v32  ;;  %v682_v57 = vmul.f32 %v3128_v20, %v3128_v20  ;;  %v3155_v28 = vadd.f32 %v3077_v24, %v2653_v9  ;;  %v3157_v47 = vmul.f32 0.7978846, %v868_v36 }
 0x206   : > { %v1960_v43 = vpop.eup %1959  ;;  %v3159_v38 = vmul.f32 0.7978846, %v869_v63  ;;  %v1049_v44 = vadd.f32 1.0, %v1958_v33  ;;  %v3163_v19 = vadd.f32 %v3081_v16, %v2655_v10  ;;  %v3168_v0 = vadd.f32 %v806_v15, %v3072_v39 }
 0x207   : > { %v3135_v40 = vpop.f32.mrb[58].mxu0  ;;  %v1962_v41 = vpop.eup %1961  ;;  %v871_v23 = vadd.f32 %v807_v22, %v3075_v3  ;;  %v1048_v24 = vadd.f32 1.0, %v1960_v43  ;;  %v745_v4 = vmul.f32 %v681_v6, %v3115_v29  ;;  %v808_v46 = vmul.f32 0.044715, %v744_v59 }
 0x208   : > { %v3140_v14 = vpop.f32.mrb[59].mxu0  ;;  %v1964_v42 = vpop.eup %1963  ;;  %v1113_v49 = vmul.f32 0.5, %v1049_v44  ;;  %v1051_v53 = vadd.f32 1.0, %v1962_v41  ;;  %v683_v16 = vmul.f32 %v3145_v54, %v3145_v54  ;;  %v746_v13 = vmul.f32 %v682_v57, %v3128_v20 }
 0x209   : > { %v1112_v55 = vmul.f32 0.5, %v1048_v24  ;;  %v1050_v56 = vadd.f32 1.0, %v1964_v42  ;;  %v684_v51 = vmul.f32 %v3155_v28, %v3155_v28  ;;  %v685_v32 = vmul.f32 %v3163_v19, %v3163_v19 }
 0x20a   : > { %v1966_v36 = vpop.eup %1965  ;;  %v1177_v63 = vmul.f32 %v1113_v49, %v2917_v31  ;;  %v1115_v15 = vmul.f32 0.5, %v1051_v53  ;;  %v3184_v22 = vadd.f32 %v3093_v48, %v2653_v9  ;;  %v809_v33 = vmul.f32 0.044715, %v745_v4 }
 0x20b   : > { %v3165_v25 = vpop.f32.mrb[60].mxu0  ;;  %v1176_v59 = vmul.f32 %v1112_v55, %v2900_v35  ;;  %v1114_v57 = vmul.f32 0.5, %v1050_v56  ;;  %v1053_v43 = vadd.f32 1.0, %v1966_v36  ;;  %v747_v24 = vmul.f32 %v683_v16, %v3145_v54 }
 0x20c   : > { %v3172_v18 = vpop.f32.mrb[61].mxu0  ;;  %v1968_v41 = vpop.eup %1967  ;;  %1391 = vmatprep.mubr.f32.mxu1 %v1177_v63  ;;  %v1179_v31 = vmul.f32 %v1115_v15, %v2936_v21  ;;  %1971 = vtanh.f32 %v3053_v12  ;;  %v3196_v48 = vadd.f32 %v3098_v52, %v2655_v10  ;;  %v810_v42 = vmul.f32 0.044715, %v746_v13 }
 0x20d   : > { %1392 = vmatmul.mubr.f32.gmra.mrb[24].mxu1 %v1176_v59  ;;  %v1117_v35 = vmul.f32 0.5, %v1053_v43  ;;  %v748_v4 = vmul.f32 %v684_v51, %v3155_v28  ;;  %v1052_v49 = vadd.f32 1.0, %v1968_v41  ;;  %v1178_v55 = vmul.f32 %v1114_v57, %v2923_v58 }
 0x20e   : > { %v1970_v53 = vpop.eup %1969  ;;  %1396 = vmatprep.mubr.f32.mxu1 %v1179_v31  ;;  %v749_v21 = vmul.f32 %v685_v32, %v3163_v19  ;;  %v686_v16 = vmul.f32 %v3184_v22, %v3184_v22  ;;  %1973 = vtanh.f32 %v929_v34  ;;  %v935_v13 = vmul.f32 0.7978846, %v871_v23 }
 0x20f   : > { %v3186_v6 = vpop.f32.mrb[62].mxu0  ;;  %v1181_v12 = vmul.f32 %v1117_v35, %v2950_v26  ;;  %v1116_v52 = vmul.f32 0.5, %v1052_v49  ;;  %v1055_v56 = vadd.f32 1.0, %v1970_v53  ;;  %1975 = vtanh.f32 %v3130_v7 }
 0x210   : > { %v3189_v44 = vpop.f32.mrb[63].mxu0  ;;  %v811_v36 = vmul.f32 0.044715, %v747_v24  ;;  %v687_v51 = vmul.f32 %v3196_v48, %v3196_v48  ;;  %v3209_v58 = vadd.f32 %v3109_v30, %v2653_v9  ;;  %v872_v63 = vadd.f32 %v808_v46, %v3102_v17 }
 0x211   : > { %v873_v15 = vadd.f32 %v809_v33, %v3115_v29  ;;  %1397 = vmatmul.mubr.f32.gmra.mrb[26].mxu1 %v1178_v55  ;;  %v1119_v34 = vmul.f32 0.5, %v1055_v56  ;;  %1977 = vtanh.f32 %v3149_v2  ;;  %v874_v26 = vadd.f32 %v810_v42, %v3128_v20 }
 0x212   : > { %1401 = vmatprep.mubr.f32.mxu1 %v1181_v12  ;;  %v812_v7 = vmul.f32 0.044715, %v748_v4  ;;  %v813_v23 = vmul.f32 0.044715, %v749_v21  ;;  %v3217_v32 = vadd.f32 %v3117_v37, %v2655_v10  ;;  %v1180_v30 = vmul.f32 %v1116_v52, %v2943_v5 }
 0x213   : > { %v1183_v59 = vmul.f32 %v1119_v34, %v2979_v62  ;;  %v750_v46 = vmul.f32 %v686_v16, %v3184_v22  ;;  %1979 = vtanh.f32 %v3147_v61  ;;  %v875_v33 = vadd.f32 %v811_v36, %v3145_v54 }
 0x214   : > { %v751_v2 = vmul.f32 %v687_v51, %v3196_v48  ;;  %v688_v57 = vmul.f32 %v3209_v58, %v3209_v58  ;;  %1981 = vtanh.f32 %v3159_v38  ;;  %v934_v37 = vmul.f32 0.7978846, %v3168_v0 }
 0x215   : > { %v3229_v43 = vmul.f32 0.7978846, %v872_v63  ;;  %1402 = vmatmul.mubr.f32.gmra.mrb[28].mxu1 %v1180_v30  ;;  %v3233_v5 = vadd.f32 %v3140_v14, %v2655_v10  ;;  %1983 = vtanh.f32 %v3157_v47  ;;  %v3236_v61 = vmul.f32 0.7978846, %v873_v15 }
 0x216   : > { %v1972_v62 = vpop.eup %1971  ;;  %v876_v41 = vadd.f32 %v812_v7, %v3155_v28  ;;  %v877_v31 = vadd.f32 %v813_v23, %v3163_v19  ;;  %1406 = vmatprep.mubr.f32.mxu1 %v1183_v59  ;;  %v689_v38 = vmul.f32 %v3217_v32, %v3217_v32  ;;  %v3242_v0 = vmul.f32 0.7978846, %v874_v26 }
 0x217   : > { %v814_v24 = vmul.f32 0.044715, %v750_v46  ;;  %v1054_v42 = vadd.f32 1.0, %v1972_v62  ;;  %v3246_v14 = vadd.f32 %v3135_v40, %v2653_v9  ;;  %v3248_v35 = vmul.f32 0.7978846, %v875_v33 }
 0x218   : > { %v1974_v47 = vpop.eup %1973  ;;  %v815_v4 = vmul.f32 0.044715, %v751_v2  ;;  %v752_v49 = vmul.f32 %v688_v57, %v3209_v58  ;;  %1985 = vtanh.f32 %v935_v13  ;;  %v691_v16 = vmul.f32 %v3233_v5, %v3233_v5 }
 0x219   : > { %v1976_v53 = vpop.eup %1975  ;;  %v1118_v55 = vmul.f32 0.5, %v1054_v42  ;;  %v1057_v21 = vadd.f32 1.0, %v1974_v47  ;;  %v3255_v12 = vadd.f32 %v3172_v18, %v2655_v10  ;;  %v3257_v52 = vmul.f32 0.7978846, %v876_v41 }
 0x21a   : > { %v3259_v40 = vmul.f32 0.7978846, %v877_v31  ;;  %v1056_v56 = vadd.f32 1.0, %v1976_v53  ;;  %v753_v36 = vmul.f32 %v689_v38, %v3217_v32  ;;  %v878_v13 = vadd.f32 %v814_v24, %v3184_v22 }
 0x21b   : > { %v1978_v51 = vpop.eup %1977  ;;  %v1182_v63 = vmul.f32 %v1118_v55, %v2953_v27  ;;  %v1121_v15 = vmul.f32 0.5, %v1057_v21  ;;  %v690_v34 = vmul.f32 %v3246_v14, %v3246_v14  ;;  %v879_v26 = vadd.f32 %v815_v4, %v3196_v48 }
 0x21c   : > { %v816_v18 = vmul.f32 0.044715, %v752_v49  ;;  %v1120_v7 = vmul.f32 0.5, %v1056_v56  ;;  %v1059_v23 = vadd.f32 1.0, %v1978_v51  ;;  %v755_v46 = vmul.f32 %v691_v16, %v3233_v5 }
 0x21d   : > { %v1980_v30 = vpop.eup %1979  ;;  %1407 = vmatmul.mubr.f32.gmra.mrb[30].mxu1 %v1182_v63  ;;  %v1185_v59 = vmul.f32 %v1121_v15, %v3024_v1  ;;  %v693_v33 = vmul.f32 %v3255_v12, %v3255_v12  ;;  %1987 = vtanh.f32 %v934_v37  ;;  %v817_v2 = vmul.f32 0.044715, %v753_v36 }
 0x21e   : > { %v1982_v27 = vpop.eup %1981  ;;  %v1123_v57 = vmul.f32 0.5, %v1059_v23  ;;  %v1058_v62 = vadd.f32 1.0, %v1980_v30  ;;  %v3273_v41 = vadd.f32 %v3165_v25, %v2653_v9  ;;  %v1184_v38 = vmul.f32 %v1120_v7, %v2995_v45 }
 0x21f   : > { %v1984_v31 = vpop.eup %1983  ;;  %1411 = vmatprep.mubr.f32.mxu1 %v1185_v59  ;;  %v754_v1 = vmul.f32 %v690_v34, %v3246_v14  ;;  %v1061_v24 = vadd.f32 1.0, %v1982_v27  ;;  %v3279_v42 = vadd.f32 %v3189_v44, %v2655_v10  ;;  %v3284_v49 = vadd.f32 %v3186_v6, %v2653_v9 }
 0x220   : > { %v1187_v37 = vmul.f32 %v1123_v57, %v3040_v11  ;;  %v1122_v47 = vmul.f32 0.5, %v1058_v62  ;;  %v1060_v4 = vadd.f32 1.0, %v1984_v31  ;;  %v819_v25 = vmul.f32 0.044715, %v755_v46 }
 0x221   : > { %1412 = vmatmul.mubr.f32.gmra.mrb[32].mxu1 %v1184_v38  ;;  %v1125_v53 = vmul.f32 0.5, %v1061_v24  ;;  %v757_v45 = vmul.f32 %v693_v33, %v3255_v12  ;;  %v695_v55 = vmul.f32 %v3279_v42, %v3279_v42  ;;  %v943_v16 = vmul.f32 0.7978846, %v879_v26 }
 0x222   : > { %v1986_v21 = vpop.eup %1985  ;;  %v881_v10 = vadd.f32 %v817_v2, %v3217_v32  ;;  %1416 = vmatprep.mubr.f32.mxu1 %v1187_v37  ;;  %v692_v11 = vmul.f32 %v3273_v41, %v3273_v41  ;;  %1989 = vtanh.f32 %v3236_v61  ;;  %v1186_v9 = vmul.f32 %v1122_v47, %v3032_v50 }
 0x223   : > { %v1189_v6 = vmul.f32 %v1125_v53, %v3049_v60  ;;  %v1124_v44 = vmul.f32 0.5, %v1060_v4  ;;  %v1063_v56 = vadd.f32 1.0, %v1986_v21  ;;  %v880_v36 = vadd.f32 %v816_v18, %v3209_v58 }
 0x224   : > { %v694_v51 = vmul.f32 %v3284_v49, %v3284_v49  ;;  %v759_v63 = vmul.f32 %v695_v55, %v3279_v42  ;;  %1991 = vtanh.f32 %v3229_v43  ;;  %v883_v15 = vadd.f32 %v819_v25, %v3233_v5 }
 0x225   : > { %1417 = vmatmul.mubr.f32.gmra.mrb[34].mxu1 %v1186_v9  ;;  %v821_v34 = vmul.f32 0.044715, %v757_v45  ;;  %v1127_v61 = vmul.f32 0.5, %v1063_v56  ;;  %1993 = vtanh.f32 %v3248_v35  ;;  %v942_v50 = vmul.f32 0.7978846, %v878_v13 }
 0x226   : > { %v818_v60 = vmul.f32 0.044715, %v754_v1  ;;  %1421 = vmatprep.mubr.f32.mxu1 %v1189_v6  ;;  %v756_v26 = vmul.f32 %v692_v11, %v3273_v41  ;;  %1995 = vtanh.f32 %v3242_v0  ;;  %v945_v7 = vmul.f32 0.7978846, %v881_v10 }
 0x227   : > { %v1988_v18 = vpop.eup %1987  ;;  %v1188_v23 = vmul.f32 %v1124_v44, %v3043_v8  ;;  %v1191_v43 = vmul.f32 %v1127_v61, %v3075_v3  ;;  %1997 = vtanh.f32 %v3259_v40  ;;  %v758_v30 = vmul.f32 %v694_v51, %v3284_v49 }
 0x228   : > { %v1062_v59 = vadd.f32 1.0, %v1988_v18  ;;  %v823_v46 = vmul.f32 0.044715, %v759_v63  ;;  %1999 = vtanh.f32 %v3257_v52  ;;  %v944_v35 = vmul.f32 0.7978846, %v880_v36 }
 0x229   : > { %v947_v13 = vmul.f32 0.7978846, %v883_v15  ;;  %1422 = vmatmul.mubr.f32.gmra.mrb[36].mxu1 %v1188_v23  ;;  %v885_v33 = vadd.f32 %v821_v34, %v3255_v12  ;;  %2001 = vtanh.f32 %v943_v16  ;;  %v882_v0 = vadd.f32 %v818_v60, %v3246_v14 }
 0x22a   : > { %v820_v27 = vmul.f32 0.044715, %v756_v26  ;;  %1426 = vmatprep.mubr.f32.mxu1 %v1191_v43  ;;  %v1126_v8 = vmul.f32 0.5, %v1062_v59  ;;  %2003 = vtanh.f32 %v942_v50  ;;  %v822_v40 = vmul.f32 0.044715, %v758_v30 }
 0x22b   : > { %2005 = vtanh.f32 %v945_v7  ;;  %v887_v57 = vadd.f32 %v823_v46, %v3279_v42  ;;  %v949_v52 = vmul.f32 0.7978846, %v885_v33  ;;  %v946_v38 = vmul.f32 0.7978846, %v882_v0 }
 0x22c   : > { %v1990_v3 = vpop.eup %1989  ;;  %v1190_v2 = vmul.f32 %v1126_v8, %v3072_v39  ;;  %2007 = vtanh.f32 %v947_v13  ;;  %v884_v1 = vadd.f32 %v820_v27, %v3273_v41  ;;  %v886_v25 = vadd.f32 %v822_v40, %v3284_v49 }
 0x22d   : > { %v1065_v62 = vadd.f32 1.0, %v1990_v3  ;;  %2009 = vtanh.f32 %v944_v35  ;;  %v951_v53 = vmul.f32 0.7978846, %v887_v57 }
 0x22e   : > { %v1992_v31 = vpop.eup %1991  ;;  %1427 = vmatmul.mubr.f32.gmra.mrb[38].mxu1 %v1190_v2  ;;  %2011 = vtanh.f32 %v949_v52  ;;  %v948_v11 = vmul.f32 0.7978846, %v884_v1  ;;  %v950_v50 = vmul.f32 0.7978846, %v886_v25 }
 0x22f   : > { %v1994_v24 = vpop.eup %1993  ;;  %v1129_v37 = vmul.f32 0.5, %v1065_v62  ;;  %v1064_v47 = vadd.f32 1.0, %v1992_v31  ;;  %2013 = vtanh.f32 %v946_v38 }
 0x230   : > { %v1996_v4 = vpop.eup %1995  ;;  %v1067_v45 = vadd.f32 1.0, %v1994_v24  ;;  %2015 = vtanh.f32 %v951_v53 }
 0x231   : > { %v1998_v39 = vpop.eup %1997  ;;  %v1193_v55 = vmul.f32 %v1129_v37, %v3115_v29  ;;  %v1128_v21 = vmul.f32 0.5, %v1064_v47  ;;  %v1066_v16 = vadd.f32 1.0, %v1996_v4  ;;  %2017 = vtanh.f32 %v948_v11 }
 0x232   : > { %v2000_v10 = vpop.eup %1999  ;;  %v1131_v9 = vmul.f32 0.5, %v1067_v45  ;;  %v1069_v6 = vadd.f32 1.0, %v1998_v39  ;;  %2019 = vtanh.f32 %v950_v50 }
 0x233   : > { %v2002_v44 = vpop.eup %2001  ;;  %1431 = vmatprep.mubr.f32.mxu1 %v1193_v55  ;;  %v1192_v56 = vmul.f32 %v1128_v21, %v3102_v17  ;;  %v1130_v36 = vmul.f32 0.5, %v1066_v16  ;;  %v1068_v51 = vadd.f32 1.0, %v2000_v10  ;;  %v2021_v55 = vld [vmem:[%s2543_s16] sm:$0xff]  ;;  %v2022_v16 = vld [vmem:[%s2543_s16 + $0x8] sm:$0xff] }
 0x234   : > { %v2004_v63 = vpop.eup %2003  ;;  %v1195_v15 = vmul.f32 %v1131_v9, %v3145_v54  ;;  %v1133_v34 = vmul.f32 0.5, %v1069_v6  ;;  %v1071_v61 = vadd.f32 1.0, %v2002_v44  ;;  %v2023_v44 = vld [vmem:[%s2543_s16 + $0x10] sm:$0xff] }
 0x235   : > { %v2006_v29 = vpop.eup %2005  ;;  %1432 = vmatmul.mubr.f32.gmra.mrb[40].mxu1 %v1192_v56  ;;  %v1194_v17 = vmul.f32 %v1130_v36, %v3128_v20  ;;  %v1132_v23 = vmul.f32 0.5, %v1068_v51  ;;  %v1070_v43 = vadd.f32 1.0, %v2004_v63 }
 0x236   : > { %1436 = vmatprep.mubr.f32.mxu1 %v1195_v15  ;;  %v1197_v60 = vmul.f32 %v1133_v34, %v3163_v19  ;;  %v1135_v26 = vmul.f32 0.5, %v1071_v61  ;;  %v1073_v18 = vadd.f32 1.0, %v2006_v29  ;;  %v2008_v7 = vpop.eup %2007  ;;  %v2024_v15 = vld [vmem:[%s2543_s16 + $0x18] sm:$0xff] }
 0x237   : > { %v2010_v30 = vpop.eup %2009  ;;  %v1075_v46 = vadd.f32 1.0, %v2008_v7  ;;  %v1196_v13 = vmul.f32 %v1132_v23, %v3155_v28  ;;  %v1134_v19 = vmul.f32 0.5, %v1070_v43  ;;  %v2026_v23 = vld [vmem:[%s2543_s16 + $0x28] sm:$0xff] }
 0x238   : > { %v1199_v54 = vmul.f32 %v1135_v26, %v3196_v48  ;;  %v1137_v59 = vmul.f32 0.5, %v1073_v18  ;;  %v2012_v35 = vpop.eup %2011  ;;  %v1072_v33 = vadd.f32 1.0, %v2010_v30 }
 0x239   : > { %1437 = vmatmul.mubr.f32.gmra.mrb[42].mxu1 %v1194_v17  ;;  %v2014_v0 = vpop.eup %2013  ;;  %v1139_v27 = vmul.f32 0.5, %v1075_v46  ;;  %v1077_v8 = vadd.f32 1.0, %v2012_v35  ;;  %v1198_v40 = vmul.f32 %v1134_v19, %v3184_v22  ;;  %v2027_v46 = vld [vmem:[%s2543_s16 + $0x30] sm:$0xff] }
 0x23a   : > { %1441 = vmatprep.mubr.f32.mxu1 %v1197_v60  ;;  %v1201_v20 = vmul.f32 %v1137_v59, %v3217_v32  ;;  %v2016_v3 = vpop.eup %2015  ;;  %v1136_v2 = vmul.f32 0.5, %v1072_v33  ;;  %v1074_v48 = vadd.f32 1.0, %v2014_v0  ;;  %v2025_v60 = vld [vmem:[%s2543_s16 + $0x20] sm:$0xff]  ;;  %v2028_v0 = vld [vmem:[%s2543_s16 + $0x38] sm:$0xff] }
 0x23b   : > { %v2018_v57 = vpop.eup %2017  ;;  %v1203_v52 = vmul.f32 %v1139_v27, %v3233_v5  ;;  %v1141_v28 = vmul.f32 0.5, %v1077_v8  ;;  %v1079_v62 = vadd.f32 1.0, %v2016_v3 }
 0x23c   : > { %v1200_v31 = vmul.f32 %v1136_v2, %v3209_v58  ;;  %v1138_v38 = vmul.f32 0.5, %v1074_v48  ;;  %v1076_v1 = vadd.f32 1.0, %v2018_v57  ;;  %v2020_v24 = vpop.eup %2019 }
 0x23d   : > { %1442 = vmatmul.mubr.f32.gmra.mrb[44].mxu1 %v1196_v13  ;;  %v1205_v32 = vmul.f32 %v1141_v28, %v3255_v12  ;;  %v1143_v37 = vmul.f32 0.5, %v1079_v62  ;;  %v1078_v4 = vadd.f32 1.0, %v2020_v24  ;;  %v3331_v12 = vld [vmem:[#allocation10] ss:$0 sm:$0xff]  ;;  %v2030_v28 = vld [vmem:[%s2543_s16 + $0x48] sm:$0xff]  ;;  %v2031_v24 = vld [vmem:[%s2543_s16 + $0x50] sm:$0xff] }
 0x23e   : > { %1446 = vmatprep.mubr.f32.mxu1 %v1199_v54  ;;  %v1202_v22 = vmul.f32 %v1138_v38, %v3246_v14  ;;  %v1140_v47 = vmul.f32 0.5, %v1076_v1 }
 0x23f   : > { %v1207_v5 = vmul.f32 %v1143_v37, %v3279_v42  ;;  %v1142_v25 = vmul.f32 0.5, %v1078_v4  ;;  %v2032_v4 = vld [vmem:[%s2543_s16 + $0x58] sm:$0xff] }
 0x240   : > { %v1204_v58 = vmul.f32 %v1140_v47, %v3273_v41 }
 0x241   : > { %1447 = vmatmul.mubr.f32.gmra.mrb[46].mxu1 %v1198_v40  ;;  %v1206_v53 = vmul.f32 %v1142_v25, %v3284_v49  ;;  %v2029_v40 = vld [vmem:[%s2543_s16 + $0x40] sm:$0xff] }
 0x242   : > { %1451 = vmatprep.mubr.f32.mxu1 %v1201_v20 }
 0x245   : > { %1452 = vmatmul.mubr.f32.gmra.mrb[48].mxu1 %v1200_v31 }
 0x246   : > { %1456 = vmatprep.mubr.f32.mxu1 %v1203_v52 }
 0x249   : > { %1457 = vmatmul.mubr.f32.gmra.mrb[50].mxu1 %v1202_v22 }
 0x24a   : > { %1461 = vmatprep.mubr.f32.mxu1 %v1205_v32 }
 0x24d   : > { %1462 = vmatmul.mubr.f32.gmra.mrb[52].mxu1 %v1204_v58 }
 0x24e   : > { %1466 = vmatprep.mubr.f32.mxu1 %v1207_v5 }
 0x251   : > { %1467 = vmatmul.mubr.f32.gmra.mrb[54].mxu1 %v1206_v53 }
 0x286   : > { %v1313_v14 = vpop.f32.mrb[64].mxu0 }
 0x287   : > { %v1314_v45 = vadd.f32 %v3331_v12, %v1313_v14  ;;  %v1315_v39 = vpop.f32.mrb[65].mxu0  ;;  %v2033_v14 = vld [vmem:[%s2543_s16 + $0x60] sm:$0xff] }
 0x289   : > { %v1472_v21 = vadd.f32 %v2021_v55, %v1314_v45 }
 0x28a   : > { %v1318_v41 = vpop.f32.mrb[66].mxu0 }
 0x28b   : > { %1504 = vst [vmem:[%s3337_s24] sm:$0xff] %v1472_v21  ;;  %v1319_v42 = vadd.f32 %v3331_v12, %v1318_v41  ;;  %v1320_v49 = vpop.f32.mrb[67].mxu0  ;;  %v2034_v41 = vld [vmem:[%s2543_s16 + $0x68] sm:$0xff] }
 0x28d   : > { %v1473_v10 = vadd.f32 %v2022_v16, %v1319_v42 }
 0x28e   : > { %v1323_v11 = vpop.f32.mrb[68].mxu0 }
 0x28f   : > { %1505 = vst [vmem:[%s3337_s24 + $0x8] sm:$0xff] %v1473_v10  ;;  %v1324_v9 = vadd.f32 %v3331_v12, %v1323_v11  ;;  %v1325_v6 = vpop.f32.mrb[69].mxu0  ;;  %v2035_v11 = vld [vmem:[%s2543_s16 + $0x70] sm:$0xff] }
 0x291   : > { %v1474_v56 = vadd.f32 %v2023_v44, %v1324_v9 }
 0x293   : > { %1506 = vst [vmem:[%s3337_s24 + $0x10] sm:$0xff] %v1474_v56 }
 0x29c   : > { %v1328_v36 = vpop.f32.mrb[70].mxu0 }
 0x29d   : > { %v1329_v51 = vadd.f32 %v3331_v12, %v1328_v36  ;;  %v1330_v63 = vpop.f32.mrb[71].mxu0  ;;  %v2036_v36 = vld [vmem:[%s2543_s16 + $0x78] sm:$0xff] }
 0x29f   : > { %v1475_v34 = vadd.f32 %v2024_v15, %v1329_v51 }
 0x2a1   : > { %1507 = vst [vmem:[%s3337_s24 + $0x18] sm:$0xff] %v1475_v34 }
 0x2a3   : > { %v1333_v61 = vpop.f32.mrb[0].mxu1 }
 0x2a4   : > { %v1334_v29 = vadd.f32 %v3331_v12, %v1333_v61  ;;  %v1335_v50 = vpop.f32.mrb[1].mxu1  ;;  %v2037_v61 = vld [vmem:[%s2543_s16 + $0x80] sm:$0xff] }
 0x2a6   : > { %v1476_v26 = vadd.f32 %v2025_v60, %v1334_v29 }
 0x2a7   : > { %v1338_v18 = vpop.f32.mrb[2].mxu1 }
 0x2a8   : > { %1508 = vst [vmem:[%s3337_s24 + $0x20] sm:$0xff] %v1476_v26  ;;  %v1339_v7 = vadd.f32 %v3331_v12, %v1338_v18  ;;  %v1340_v17 = vpop.f32.mrb[3].mxu1  ;;  %v2038_v18 = vld [vmem:[%s2543_s16 + $0x88] sm:$0xff] }
 0x2aa   : > { %v1477_v43 = vadd.f32 %v2026_v23, %v1339_v7 }
 0x2ab   : > { %v1343_v30 = vpop.f32.mrb[4].mxu1 }
 0x2ac   : > { %1509 = vst [vmem:[%s3337_s24 + $0x28] sm:$0xff] %v1477_v43  ;;  %v1344_v54 = vadd.f32 %v3331_v12, %v1343_v30  ;;  %v1345_v59 = vpop.f32.mrb[5].mxu1  ;;  %v2039_v30 = vld [vmem:[%s2543_s16 + $0x90] sm:$0xff] }
 0x2ae   : > { %v1478_v35 = vadd.f32 %v2027_v46, %v1344_v54 }
 0x2b0   : > { %v1348_v13 = vpop.f32.mrb[6].mxu1  ;;  %1510 = vst [vmem:[%s3337_s24 + $0x30] sm:$0xff] %v1478_v35 }
 0x2b1   : > { %v1349_v19 = vadd.f32 %v3331_v12, %v1348_v13  ;;  %v1350_v33 = vpop.f32.mrb[7].mxu1  ;;  %v2040_v13 = vld [vmem:[%s2543_s16 + $0x98] sm:$0xff] }
 0x2b3   : > { %v1479_v20 = vadd.f32 %v2028_v0, %v1349_v19 }
 0x2b5   : > { %1511 = vst [vmem:[%s3337_s24 + $0x38] sm:$0xff] %v1479_v20 }
 0x2b9   : > { %v1353_v27 = vpop.f32.mrb[8].mxu1 }
 0x2ba   : > { %v1354_v8 = vadd.f32 %v3331_v12, %v1353_v27  ;;  %v1355_v3 = vpop.f32.mrb[9].mxu1  ;;  %v2041_v27 = vld [vmem:[%s2543_s16 + $0xa0] sm:$0xff] }
 0x2bc   : > { %v1480_v2 = vadd.f32 %v2029_v40, %v1354_v8 }
 0x2bd   : > { %v1358_v48 = vpop.f32.mrb[10].mxu1 }
 0x2be   : > { %1512 = vst [vmem:[%s3337_s24 + $0x40] sm:$0xff] %v1480_v2  ;;  %v1359_v57 = vadd.f32 %v3331_v12, %v1358_v48  ;;  %v1360_v52 = vpop.f32.mrb[11].mxu1  ;;  %v2042_v48 = vld [vmem:[%s2543_s16 + $0xa8] sm:$0xff] }
 0x2c0   : > { %v1481_v62 = vadd.f32 %v2030_v28, %v1359_v57 }
 0x2c1   : > { %v1363_v31 = vpop.f32.mrb[12].mxu1 }
 0x2c2   : > { %1513 = vst [vmem:[%s3337_s24 + $0x48] sm:$0xff] %v1481_v62  ;;  %v1364_v38 = vadd.f32 %v3331_v12, %v1363_v31  ;;  %v1365_v1 = vpop.f32.mrb[13].mxu1  ;;  %v2043_v31 = vld [vmem:[%s2543_s16 + $0xb0] sm:$0xff] }
 0x2c4   : > { %v1482_v32 = vadd.f32 %v2031_v24, %v1364_v38 }
 0x2c6   : > { %1514 = vst [vmem:[%s3337_s24 + $0x50] sm:$0xff] %v1482_v32 }
 0x2c7   : > { %v1368_v37 = vpop.f32.mrb[14].mxu1 }
 0x2c8   : > { %v1369_v22 = vadd.f32 %v3331_v12, %v1368_v37  ;;  %v1370_v47 = vpop.f32.mrb[15].mxu1  ;;  %v2044_v37 = vld [vmem:[%s2543_s16 + $0xb8] sm:$0xff] }
 0x2ca   : > { %v1483_v5 = vadd.f32 %v2032_v4, %v1369_v22 }
 0x2cc   : > { %1515 = vst [vmem:[%s3337_s24 + $0x58] sm:$0xff] %v1483_v5  ;;  %v1373_v58 = vpop.f32.mrb[16].mxu1 }
 0x2cd   : > { %v1374_v25 = vadd.f32 %v3331_v12, %v1373_v58  ;;  %v1375_v53 = vpop.f32.mrb[17].mxu1  ;;  %v2045_v58 = vld [vmem:[%s2543_s16 + $0xc0] sm:$0xff] }
 0x2cf   : > { %v1484_v45 = vadd.f32 %v2033_v14, %v1374_v25 }
 0x2d0   : > { %v1378_v39 = vpop.f32.mrb[18].mxu1 }
 0x2d1   : > { %1516 = vst [vmem:[%s3337_s24 + $0x60] sm:$0xff] %v1484_v45  ;;  %v1379_v55 = vadd.f32 %v3331_v12, %v1378_v39  ;;  %v1380_v21 = vpop.f32.mrb[19].mxu1  ;;  %v2046_v39 = vld [vmem:[%s2543_s16 + $0xc8] sm:$0xff] }
 0x2d3   : > { %v1485_v42 = vadd.f32 %v2034_v41, %v1379_v55 }
 0x2d4   : > { %v1383_v49 = vpop.f32.mrb[20].mxu1 }
 0x2d5   : > { %1517 = vst [vmem:[%s3337_s24 + $0x68] sm:$0xff] %v1485_v42  ;;  %v1384_v16 = vadd.f32 %v3331_v12, %v1383_v49  ;;  %v1385_v10 = vpop.f32.mrb[21].mxu1  ;;  %v2047_v49 = vld [vmem:[%s2543_s16 + $0xd0] sm:$0xff] }
 0x2d7   : > { %v1486_v9 = vadd.f32 %v2035_v11, %v1384_v16 }
 0x2d8   : > { %v1388_v6 = vpop.f32.mrb[22].mxu1 }
 0x2d9   : > { %1518 = vst [vmem:[%s3337_s24 + $0x70] sm:$0xff] %v1486_v9  ;;  %v1389_v44 = vadd.f32 %v3331_v12, %v1388_v6  ;;  %v1390_v56 = vpop.f32.mrb[23].mxu1  ;;  %v2048_v6 = vld [vmem:[%s2543_s16 + $0xd8] sm:$0xff] }
 0x2db   : > { %v1487_v51 = vadd.f32 %v2036_v36, %v1389_v44 }
 0x2dd   : > { %1519 = vst [vmem:[%s3337_s24 + $0x78] sm:$0xff] %v1487_v51 }
 0x2e0   : > { %v1393_v63 = vpop.f32.mrb[24].mxu1 }
 0x2e1   : > { %v1394_v15 = vadd.f32 %v3331_v12, %v1393_v63  ;;  %v1395_v34 = vpop.f32.mrb[25].mxu1  ;;  %v2049_v63 = vld [vmem:[%s2543_s16 + $0xe0] sm:$0xff] }
 0x2e3   : > { %v1488_v29 = vadd.f32 %v2037_v61, %v1394_v15 }
 0x2e4   : > { %v1398_v50 = vpop.f32.mrb[26].mxu1 }
 0x2e5   : > { %1520 = vst [vmem:[%s3337_s24 + $0x80] sm:$0xff] %v1488_v29  ;;  %v1399_v60 = vadd.f32 %v3331_v12, %v1398_v50  ;;  %v1400_v26 = vpop.f32.mrb[27].mxu1  ;;  %v2050_v50 = vld [vmem:[%s2543_s16 + $0xe8] sm:$0xff] }
 0x2e7   : > { %v1489_v7 = vadd.f32 %v2038_v18, %v1399_v60 }
 0x2e8   : > { %v1403_v17 = vpop.f32.mrb[28].mxu1 }
 0x2e9   : > { %1521 = vst [vmem:[%s3337_s24 + $0x88] sm:$0xff] %v1489_v7  ;;  %v1404_v23 = vadd.f32 %v3331_v12, %v1403_v17  ;;  %v1405_v43 = vpop.f32.mrb[29].mxu1  ;;  %v2051_v17 = vld [vmem:[%s2543_s16 + $0xf0] sm:$0xff] }
 0x2eb   : > { %v1490_v54 = vadd.f32 %v2039_v30, %v1404_v23 }
 0x2ed   : > { %1522 = vst [vmem:[%s3337_s24 + $0x90] sm:$0xff] %v1490_v54 }
 0x2f0   : > { %v1408_v59 = vpop.f32.mrb[30].mxu1 }
 0x2f1   : > { %v1409_v46 = vadd.f32 %v3331_v12, %v1408_v59  ;;  %v1410_v35 = vpop.f32.mrb[31].mxu1  ;;  %v2052_v59 = vld [vmem:[%s2543_s16 + $0xf8] sm:$0xff] }
 0x2f3   : > { %v1491_v19 = vadd.f32 %v2040_v13, %v1409_v46 }
 0x2f4   : > { %v1413_v33 = vpop.f32.mrb[32].mxu1 }
 0x2f5   : > { %1523 = vst [vmem:[%s3337_s24 + $0x98] sm:$0xff] %v1491_v19  ;;  %v1414_v0 = vadd.f32 %v3331_v12, %v1413_v33  ;;  %v1415_v20 = vpop.f32.mrb[33].mxu1 }
 0x2f7   : > { %v1492_v8 = vadd.f32 %v2041_v27, %v1414_v0 }
 0x2f8   : > { %v1418_v3 = vpop.f32.mrb[34].mxu1 }
 0x2f9   : > { %1524 = vst [vmem:[%s3337_s24 + $0xa0] sm:$0xff] %v1492_v8  ;;  %v1419_v40 = vadd.f32 %v3331_v12, %v1418_v3  ;;  %v1420_v2 = vpop.f32.mrb[35].mxu1 }
 0x2fb   : > { %v1493_v57 = vadd.f32 %v2042_v48, %v1419_v40 }
 0x2fc   : > { %v1423_v52 = vpop.f32.mrb[36].mxu1 }
 0x2fd   : > { %1525 = vst [vmem:[%s3337_s24 + $0xa8] sm:$0xff] %v1493_v57  ;;  %v1424_v28 = vadd.f32 %v3331_v12, %v1423_v52  ;;  %v1425_v62 = vpop.f32.mrb[37].mxu1 }
 0x2ff   : > { %v1494_v38 = vadd.f32 %v2043_v31, %v1424_v28 }
 0x301   : > { %1526 = vst [vmem:[%s3337_s24 + $0xb0] sm:$0xff] %v1494_v38  ;;  %v1428_v1 = vpop.f32.mrb[38].mxu1 }
 0x302   : > { %v1429_v24 = vadd.f32 %v3331_v12, %v1428_v1  ;;  %v1430_v32 = vpop.f32.mrb[39].mxu1 }
 0x304   : > { %v1495_v22 = vadd.f32 %v2044_v37, %v1429_v24 }
 0x306   : > { %1527 = vst [vmem:[%s3337_s24 + $0xb8] sm:$0xff] %v1495_v22 }
 0x308   : > { %v1433_v47 = vpop.f32.mrb[40].mxu1 }
 0x309   : > { %v1434_v4 = vadd.f32 %v3331_v12, %v1433_v47  ;;  %v1435_v5 = vpop.f32.mrb[41].mxu1 }
 0x30b   : > { %v1496_v25 = vadd.f32 %v2045_v58, %v1434_v4 }
 0x30c   : > { %v1438_v53 = vpop.f32.mrb[42].mxu1 }
 0x30d   : > { %1528 = vst [vmem:[%s3337_s24 + $0xc0] sm:$0xff] %v1496_v25  ;;  %v1439_v14 = vadd.f32 %v3331_v12, %v1438_v53  ;;  %v1440_v45 = vpop.f32.mrb[43].mxu1 }
 0x30f   : > { %v1497_v55 = vadd.f32 %v2046_v39, %v1439_v14 }
 0x310   : > { %v1443_v21 = vpop.f32.mrb[44].mxu1 }
 0x311   : > { %1529 = vst [vmem:[%s3337_s24 + $0xc8] sm:$0xff] %v1497_v55  ;;  %v1444_v41 = vadd.f32 %v3331_v12, %v1443_v21  ;;  %v1445_v42 = vpop.f32.mrb[45].mxu1 }
 0x313   : > { %v1498_v16 = vadd.f32 %v2047_v49, %v1444_v41 }
 0x314   : > { %v1448_v10 = vpop.f32.mrb[46].mxu1 }
 0x315   : > { %1530 = vst [vmem:[%s3337_s24 + $0xd0] sm:$0xff] %v1498_v16  ;;  %v1449_v11 = vadd.f32 %v3331_v12, %v1448_v10  ;;  %v1450_v9 = vpop.f32.mrb[47].mxu1 }
 0x317   : > { %v1499_v44 = vadd.f32 %v2048_v6, %v1449_v11 }
 0x318   : > { %v1453_v56 = vpop.f32.mrb[48].mxu1 }
 0x319   : > { %1531 = vst [vmem:[%s3337_s24 + $0xd8] sm:$0xff] %v1499_v44  ;;  %v1454_v36 = vadd.f32 %v3331_v12, %v1453_v56  ;;  %v1455_v51 = vpop.f32.mrb[49].mxu1 }
 0x31b   : > { %v1500_v15 = vadd.f32 %v2049_v63, %v1454_v36 }
 0x31c   : > { %v1458_v34 = vpop.f32.mrb[50].mxu1 }
 0x31d   : > { %1532 = vst [vmem:[%s3337_s24 + $0xe0] sm:$0xff] %v1500_v15  ;;  %v1459_v61 = vadd.f32 %v3331_v12, %v1458_v34  ;;  %v1460_v29 = vpop.f32.mrb[51].mxu1 }
 0x31f   : > { %v1501_v60 = vadd.f32 %v2050_v50, %v1459_v61 }
 0x320   : > { %v1463_v26 = vpop.f32.mrb[52].mxu1 }
 0x321   : > { %1533 = vst [vmem:[%s3337_s24 + $0xe8] sm:$0xff] %v1501_v60  ;;  %v1464_v18 = vadd.f32 %v3331_v12, %v1463_v26  ;;  %v1465_v7 = vpop.f32.mrb[53].mxu1 }
 0x323   : > { %v1502_v23 = vadd.f32 %v2051_v17, %v1464_v18 }
 0x324   : > { %v1468_v43 = vpop.f32.mrb[54].mxu1 }
 0x325   : > { %1534 = vst [vmem:[%s3337_s24 + $0xf0] sm:$0xff] %v1502_v23  ;;  %v1469_v30 = vadd.f32 %v3331_v12, %v1468_v43  ;;  %v1470_v54 = vpop.f32.mrb[55].mxu1 }
 0x327   : > { %v1503_v46 = vadd.f32 %v2052_v59, %v1469_v30 }
 0x329   : > { %1535 = vst [vmem:[%s3337_s24 + $0xf8] sm:$0xff] %v1503_v46 }
 0x32a   : > { %2208 = shalt.err (!%p2205_p13)
}
 0x32b   : > { %s2209_s23 = scalar_lea.hbm %s3436_s6, 4096  ;;  %s2213_s11 = scalar_lea.hbm %s3489_s5, 8192 }
 0x32c   : > { %p2210_p9 = scmp.ne.s32.totalorder %s3436_s6, %s2209_s23  ;;  %p2214_p6 = scmp.lt.u32.totalorder %s3436_s6, %s3489_s5 }
 0x32d   : > { %p2215_p10 = scmp.lt.u32.totalorder %s2213_s11, %s2209_s23  ;;  %p2217_p4 = scmp.lt.u32.totalorder %s2209_s23, %s3436_s6 }
 0x32e   : > { %p2211_p0 = pnand %p2210_p9, %p2485_p8 }
 0x32f   : > { %p2216_p3 = por %p2215_p10, %p2214_p6 }
 0x330   : > { %p2212_p11 = pneg %p2211_p0 }
 0x331   : > { %p2218_p5 = por %p2217_p4, %p2216_p3 }
 0x333   : > { %p2219_p7 = pnand %p2218_p5, %p2212_p11 }
 0x335   : > { %2222 = shalt.err (!%p2219_p7)
}
 0x336   : > { %s2283_s26 = smov 128   ;;  %s2284_s15 = smov 8  }
 0x337   : > { %1816 = dma.vmem_to_hbm [thread:$0]  (%p2485_p8), %s3438_s14, 4096, %s3436_s6, %s1537_s22, %s2283_s26, %s2283_s26, %s2284_s15  }
 0x338 PF: > { %s1565_s28 = sand.u32 1, %s2257_s18   ;;  %p3507_p12 = scmp.ne.s32.totalorder %s3494_s25, 0 }
 0x339   : > { %p3508_p2 = scmp.ge.s32.totalorder %s2269_s21, 2  ;;  %s1566_s17 = scalar_lea.sflag [#allocation4], %s1565_s28 }
 0x33b   : > { %p1836_p1 = pnand %p3508_p2, %p3507_p12 }
 0x33d   : > { %2252 = dma.done.wait (!%p1836_p1), %s1566_s17, 4096  }
 0x33e   : > { %2254 = vsyncadd (!%p1836_p1), %s1566_s17, 4294963200  ;;  %p20_p13 = scmp.ge.s32.totalorder %s2472_s12, 4   ;;  %s3509_s18 = smov %s2261_s19 }
 0x33f   : > { %s3510_s19 = smov %s2265_s20  ;;  %s3511_s20 = smov %s2481_s30 }
 0x340   : > { %s3512_s21 = smov %s2472_s12  ;;  %22 = sbr.rel (!%p20_p13) target bundleno = 7 (0x7), region = 101 }
 0x347   :  { %1571 = vsyncpa [#allocation3], 1 }
 0x348   :  { %1573 = vsyncpa [#allocation3 + $0x1], 1 }
 0x349   :  { %1574 = vsyncpa [#allocation6], 1 }
 0x34a   :  { %1575 = vsyncpa [#allocation9], 1 }
 0x34b   :  { %1576 = vsyncpa [#allocation4], 1 }
 0x34c   :  { %1578 = vsyncpa [#allocation4 + $0x1], 1 }

// kernel: tpu_custom_call.1
= control target key start
LH: loop header
LB: loop body
LE: loop exit
PB: predicated region body
PF: predicated region fallthrough
CT: control target
= control target key end

     0   :  { %10 = vsyncpa [#allocation3], 0  ;;  %s3484_s0 = inlined_call_operand.hbm [shape: f32[512,128], index: 0, kind: input, shape index: {}]   ;;  %s3485_s1 = inlined_call_operand.hbm [shape: f32[128,256], index: 1, kind: input, shape index: {}]   ;;  %s3486_s2 = inlined_call_operand.hbm [shape: f32[1,256], index: 2, kind: input, shape index: {}]   ;;  %s3487_s3 = inlined_call_operand.hbm [shape: f32[256,128], index: 3, kind: input, shape index: {}]   ;;  %s3488_s4 = inlined_call_operand.hbm [shape: f32[1,128], index: 4, kind: input, shape index: {}]   ;;  %s3489_s5 = inlined_call_operand.hbm [shape: f32[512,128], index: 5, kind: output, shape index: {}]  }
   0x1   :  { %12 = vsyncpa [#allocation3 + $0x1], 0 }
   0x2   :  { %13 = vsyncpa [#allocation6], 0 }
   0x3   :  { %14 = vsyncpa [#allocation9], 0 }
   0x4   :  { %15 = vsyncpa [#allocation4], 0 }
   0x5   :  { %17 = vsyncpa [#allocation4 + $0x1], 0  ;;  %s2315_s18 = smov 0   ;;  %s2317_s19 = smov 0  }
   0x6   :  { %s2319_s20 = smov 0   ;;  %s2321_s21 = smov 0  }
   0x7 LB: > { %s2336_s22 = sadd.s32 4294967295, %s2269_s21   ;;  %s1661_s23 = sadd.s32 4294967294, %s2269_s21   ;;  %s2269_s21 = sphi %s2321_s21, %s3512_s21   ;;  %s2265_s20 = sphi %s2319_s20, %s3511_s20   ;;  %s2261_s19 = sphi %s2317_s19, %s3510_s19   ;;  %s2257_s18 = sphi %s2315_s18, %s3509_s18  }
   0x8   : > { %p43_p0 = scmp.ne.s32.totalorder %s2261_s19, %s2257_s18  ;;  %p3490_p1 = scmp.eq.s32.totalorder %s2336_s22, 0 }
   0x9   : > { %p157_p3 = scmp.eq.s32.totalorder %s1661_s23, 1  ;;  %p1662_p5 = scmp.ge.s32.totalorder %s2269_s21, 1 }
   0xa   : > { %p2345_p4 = por %p3490_p1, %p43_p0  ;;  %p164_p7 = scmp.lt.s32.totalorder %s2269_s21, 3 }
   0xb   : > { %p2350_p6 = por %p157_p3, %p43_p0  ;;  %s2271_s27 = smov [#allocation5]  }
   0xc   : > { %s3493_s24 = scalar_select %p2345_p4, 1, 0 }
   0xd   : > { %s3494_s25 = scalar_select %p2350_p6, 1, 0 }
   0xe   : > { %p2355_p8 = pnand %p1662_p5, %p164_p7  ;;  %s176_s28 = sshll.u32 %s2271_s27, 4  ;;  %s2359_s28 = int_to_ptr.vmem [resolvable:$true] %s176_s28 }
   0xf   : > { %s2272_s30 = smov [#allocation8]   ;;  %s2053_s9 = scalar_lea.hbm %s3485_s1, 4096 }
  0x10   : > { %s3495_s26 = scalar_select %p2355_p8, 1, 0 }
  0x11   : > { %p1818_p9 = pneg %p2355_p8  ;;  %s200_s6 = sshll.u32 %s2272_s30, 4  ;;  %s2370_s6 = int_to_ptr.vmem [resolvable:$true] %s200_s6 }
  0x12   : > { %p2054_p12 = scmp.ne.s32.totalorder %s3485_s1, %s2053_s9  ;;  %p2060_p5 = scmp.lt.u32.totalorder %s2053_s9, %s3485_s1 }
  0x13   : > { %p2366_p11 = pnand %p1818_p9, %p3490_p1 }
  0x15   : > { %p2380_p13 = pneg %p2366_p11 }
  0x17   : > { %p2056_p0 = pnand %p2380_p13, %p2054_p12 }
  0x19   : > { %p2057_p3 = pneg %p2056_p0 }
  0x1b   : > { %p2062_p7 = pnand %p2060_p5, %p2057_p3 }
  0x1d   : > { %2065 = shalt.err (!%p2062_p7)
}
  0x1e   : > { %s2066_s15 = scalar_lea.vmem %s2359_s28, 4096  ;;  %p2074_p2 = scmp.lt.s32.totalorder %s2359_s28, %s2359_s28 }
  0x1f   : > { %p2067_p9 = scmp.ne.s32.totalorder %s2359_s28, %s2066_s15  ;;  %p2075_p6 = scmp.lt.s32.totalorder %s2066_s15, %s2066_s15 }
  0x21   : > { %p2069_p10 = pnand %p2067_p9, %p2380_p13  ;;  %p2076_p12 = por %p2075_p6, %p2074_p2 }
  0x23   : > { %p2070_p1 = pneg %p2069_p10 }
  0x25   : > { %p2077_p0 = pnand %p2076_p12, %p2070_p1 }
  0x27   : > { %2080 = shalt.err (!%p2077_p0)
}
  0x28   : > { %s2273_s16 = smov 256   ;;  %s2274_s17 = smov 16  }
  0x29   : > { %1821 = dma.hbm_to_vmem [thread:$0]  (!%p2366_p11), %s3485_s1, 4096, %s2359_s28, [#allocation6], %s2273_s16, %s2273_s16, %s2274_s17  }
  0x2a   : > { %s2081_s8 = scalar_lea.hbm %s3487_s3, 4096 }
  0x2b   : > { %p2082_p2 = scmp.ne.s32.totalorder %s3487_s3, %s2081_s8  ;;  %p2088_p10 = scmp.lt.u32.totalorder %s2081_s8, %s3487_s3 }
  0x2d   : > { %p2084_p1 = pnand %p2082_p2, %p2380_p13 }
  0x2f   : > { %p2085_p6 = pneg %p2084_p1 }
  0x31   : > { %p2090_p3 = pnand %p2088_p10, %p2085_p6 }
  0x33   : > { %2093 = shalt.err (!%p2090_p3)
}
  0x34   : > { %s2094_s28 = scalar_lea.vmem %s2370_s6, 4096  ;;  %p2102_p12 = scmp.lt.s32.totalorder %s2370_s6, %s2370_s6 }
  0x35   : > { %p2095_p5 = scmp.ne.s32.totalorder %s2370_s6, %s2094_s28  ;;  %p2103_p0 = scmp.lt.s32.totalorder %s2094_s28, %s2094_s28 }
  0x37   : > { %p2097_p7 = pnand %p2095_p5, %p2380_p13  ;;  %p2104_p2 = por %p2103_p0, %p2102_p12 }
  0x39   : > { %p2098_p9 = pneg %p2097_p7 }
  0x3b   : > { %p2105_p1 = pnand %p2104_p2, %p2098_p9 }
  0x3d   : > { %2108 = shalt.err (!%p2105_p1)
}
  0x3e   : > { %s2275_s14 = smov 128   ;;  %s2276_s15 = smov 8  }
  0x3f   : > { %1827 = dma.hbm_to_vmem [thread:$0]  (!%p2366_p11), %s3487_s3, 4096, %s2370_s6, [#allocation9], %s2275_s14, %s2275_s14, %s2276_s15  }
  0x40   : > { %s2277_s23 = smov [#allocation7]   ;;  %s2278_s30 = smov [#allocation10]  }
  0x41   : > { %s190_s27 = sshll.u32 %s2277_s23, 4  ;;  %s214_s7 = sshll.u32 %s2278_s30, 4  ;;  %s191_s27 = int_to_ptr.vmem [resolvable:$true] %s190_s27  ;;  %s2427_s7 = int_to_ptr.vmem [resolvable:$true] %s214_s7 }
  0x42   : > { %s2109_s10 = scalar_lea.hbm %s3486_s2, 32 }
  0x43   : > { %p2110_p6 = scmp.ne.s32.totalorder %s3486_s2, %s2109_s10  ;;  %p2116_p5 = scmp.lt.u32.totalorder %s2109_s10, %s3486_s2 }
  0x45   : > { %p2112_p10 = pnand %p2110_p6, %p2380_p13 }
  0x47   : > { %p2113_p3 = pneg %p2112_p10 }
  0x49   : > { %p2118_p7 = pnand %p2116_p5, %p2113_p3 }
  0x4b   : > { %2121 = shalt.err (!%p2118_p7)
}
  0x4c   : > { %s2122_s16 = scalar_lea.vmem %s191_s27, 32  ;;  %p2130_p2 = scmp.lt.s32.totalorder %s191_s27, %s191_s27 }
  0x4d   : > { %p2123_p9 = scmp.ne.s32.totalorder %s191_s27, %s2122_s16  ;;  %p2131_p1 = scmp.lt.s32.totalorder %s2122_s16, %s2122_s16 }
  0x4f   : > { %p2125_p12 = pnand %p2123_p9, %p2380_p13  ;;  %p2132_p4 = por %p2131_p1, %p2130_p2 }
  0x51   : > { %p2126_p0 = pneg %p2125_p12 }
  0x53   : > { %p2133_p8 = pnand %p2132_p4, %p2126_p0 }
  0x55   : > { %2136 = shalt.err (!%p2133_p8)
}
  0x56   : > { %1824 = dma.hbm_to_vmem [thread:$0]  (!%p2366_p11), %s3486_s2, 32, %s191_s27, [#allocation6]  }
  0x57   : > { %s2137_s9 = scalar_lea.hbm %s3488_s4, 16 }
  0x58   : > { %p2138_p6 = scmp.ne.s32.totalorder %s3488_s4, %s2137_s9  ;;  %p2144_p4 = scmp.lt.u32.totalorder %s2137_s9, %s3488_s4 }
  0x5a   : > { %p2140_p10 = pnand %p2138_p6, %p2380_p13 }
  0x5c   : > { %p2141_p3 = pneg %p2140_p10 }
  0x5e   : > { %p2146_p8 = pnand %p2144_p4, %p2141_p3 }
  0x60   : > { %2149 = shalt.err (!%p2146_p8)
}
  0x61   : > { %s2150_s27 = scalar_lea.vmem %s2427_s7, 16  ;;  %s2157_s6 = scalar_lea.vmem %s2427_s7, 32 }
  0x62   : > { %p2151_p5 = scmp.ne.s32.totalorder %s2427_s7, %s2150_s27  ;;  %p2158_p12 = scmp.lt.s32.totalorder %s2427_s7, %s2427_s7 }
  0x63   : > { %p2159_p0 = scmp.lt.s32.totalorder %s2157_s6, %s2150_s27 }
  0x64   : > { %p2153_p7 = pnand %p2151_p5, %p2380_p13 }
  0x65   : > { %p2160_p2 = por %p2159_p0, %p2158_p12 }
  0x66   : > { %p2154_p9 = pneg %p2153_p7 }
  0x68   : > { %p2161_p1 = pnand %p2160_p2, %p2154_p9 }
  0x6a   : > { %2164 = shalt.err (!%p2161_p1)
}
  0x6b   : > { %1830 = dma.hbm_to_vmem [thread:$0]  (!%p2366_p11), %s3488_s4, 16, %s2427_s7, [#allocation9]  }
  0x6c   : > { %s2472_s12 = sadd.s32 1, %s2269_s21   ;;  %s30_s23 = sadd.s32 1, %s2265_s20 }
  0x6d   : > { %s27_s29 = ssub.s32 %s2269_s21, %s2472_s12  ;;  %p37_p6 = scmp.ne.s32.totalorder %s2265_s20, %s2261_s19 }
  0x6e   : > { %p28_p13 = scmp.eq.s32.totalorder %s27_s29, 0  ;;  %p38_p10 = scmp.eq.s32.totalorder %s2269_s21, 0 }
  0x6f   : > { %p3498_p4 = scmp.eq.s32.totalorder %s2336_s22, 1  ;;  %p1843_p5 = scmp.lt.s32.totalorder %s2269_s21, 2 }
  0x70   : > { %s2481_s30 = scalar_select %p28_p13, %s2265_s20, %s30_s23  }
  0x71   : > { %p39_p3 = por %p38_p10, %p37_p6  ;;  %p2485_p8 = por %p3498_p4, %p37_p6 }
  0x72   : > { %s225_s9 = sand.u32 1, %s2265_s20   ;;  %s1684_s7 = sshll.u32 %s2269_s21, 12 }
  0x73   : > { %s1668_s10 = sshll.u32 %s225_s9, 8  ;;  %s2495_s28 = scalar_lea.hbm %s3484_s0, %s1684_s7 }
  0x74   : > { %s229_s27 = scalar_lea.vmem [#allocation2], %s1668_s10  ;;  %p2499_p11 = pnand %p1843_p5, %p39_p3 }
  0x75   : > { %s236_s6 = sshll.u32 %s229_s27, 4  ;;  %s2503_s17 = scalar_lea.sflag [#allocation3], %s225_s9  ;;  %s2497_s6 = int_to_ptr.vmem [resolvable:$true] %s236_s6 }
  0x76   : > { %s2165_s29 = scalar_lea.hbm %s2495_s28, 4096  ;;  %p2167_p9 = pneg %p2499_p11 }
  0x77   : > { %p2166_p7 = scmp.ne.s32.totalorder %s2495_s28, %s2165_s29  ;;  %s2170_s7 = scalar_lea.hbm %s3484_s0, 8192 }
  0x78   : > { %p2171_p2 = scmp.lt.u32.totalorder %s2495_s28, %s3484_s0  ;;  %p2172_p1 = scmp.lt.u32.totalorder %s2170_s7, %s2165_s29 }
  0x79   : > { %p2168_p12 = pnand %p2167_p9, %p2166_p7  ;;  %p2174_p6 = scmp.lt.u32.totalorder %s2165_s29, %s2495_s28 }
  0x7a   : > { %p2173_p13 = por %p2172_p1, %p2171_p2 }
  0x7b   : > { %p2169_p0 = pneg %p2168_p12 }
  0x7c   : > { %p2175_p10 = por %p2174_p6, %p2173_p13 }
  0x7e   : > { %p2176_p3 = pnand %p2175_p10, %p2169_p0 }
  0x80   : > { %2179 = shalt.err (!%p2176_p3)
}
  0x81   : > { %s2180_s9 = scalar_lea.vmem %s2497_s6, 4096  ;;  %s2279_s27 = smov [#allocation2]  }
  0x82   : > { %p2181_p4 = scmp.ne.s32.totalorder %s2497_s6, %s2180_s9  ;;  %s2185_s23 = sshll.u32 %s2279_s27, 4  ;;  %s2186_s23 = int_to_ptr.vmem [resolvable:$false] %s2185_s23 }
  0x83   : > { %s2187_s10 = scalar_lea.vmem %s2186_s23, 8192  ;;  %p2188_p12 = scmp.lt.s32.totalorder %s2497_s6, %s2186_s23 }
  0x84   : > { %p2183_p5 = pnand %p2181_p4, %p2167_p9  ;;  %p2189_p2 = scmp.lt.s32.totalorder %s2187_s10, %s2180_s9 }
  0x86   : > { %p2184_p7 = pneg %p2183_p5  ;;  %p2190_p1 = por %p2189_p2, %p2188_p12 }
  0x88   : > { %p2191_p13 = pnand %p2190_p1, %p2184_p7 }
  0x8a   : > { %2194 = shalt.err (!%p2191_p13)
}
  0x8b   : > { %1834 = dma.hbm_to_vmem [thread:$0]  (!%p2499_p11), %s2495_s28, 4096, %s2497_s6, %s2503_s17, %s2275_s14, %s2275_s14, %s2276_s15  }
  0x8c   : > { %p3501_p9 = scmp.ne.s32.totalorder %s3495_s26, 0 }
  0x8d   : > { %s2537_s29 = sand.u32 (!%p3501_p9), 1, %s2261_s19   ;;  %p3502_p0 = scmp.ne.s32.totalorder (!%p3501_p9), %s3493_s24, 0 }
  0x8e   : > { %248 = sbr.rel (%p3501_p9) target bundleno = 824 (0x338), region = 40  ;;  %s1672_s7 = sshll.u32 (!%p3501_p9), %s2537_s29, 8 }
  0x8f   : > { %s251_s11 = scalar_lea.sflag (!%p3501_p9), [#allocation3], %s2537_s29  ;;  %s2543_s16 = scalar_lea.vmem (!%p3501_p9), [#allocation2], %s1672_s7 }
  0x95   : > { %2240 = dma.done.wait (%p3502_p0), %s251_s11, 4096  }
  0x96   : > { %2242 = vsyncadd (%p3502_p0), %s251_s11, 4294963200  ;;  %p3503_p11 = scmp.eq.s32.totalorder %s2336_s22, 0 }
  0x98   : > { %2244 = dma.done.wait (%p3503_p11), [#allocation6], 4128   ;;  %p3504_p6 = pmov %p3503_p11 }
  0x9a   : > { %2246 = vsyncadd (%p3504_p6), [#allocation6], 4294963168  ;;  %p3505_p10 = pmov %p3504_p6 }
  0x9b   : > { %p3506_p3 = pmov %p3504_p6 }
  0x9c   : > { %2248 = dma.done.wait (%p3505_p10), [#allocation9], 4112  }
  0x9d   : > { %2250 = vsyncadd (%p3506_p3), [#allocation9], 4294963184  ;;  %v2280_v0 = vmov 0.0   ;;  %v332_v1 = vld [vmem:[#allocation5 + $0x8] sm:$0xff]  ;;  %v334_v2 = vld [vmem:[#allocation5 + $0x18] sm:$0xff]  ;;  %v2281_v53 = vmov 0.0|0.0  }
  0x9e   : > { %439 = vmatprep.mubr.f32.mxu0 %v2280_v0  ;;  %v331_v3 = vld [vmem:[#allocation5] sm:$0xff]  ;;  %v1686_v4 = vpack.c.bf16 %v334_v2, %v332_v1  ;;  %v333_v5 = vld [vmem:[#allocation5 + $0x10] sm:$0xff]  ;;  %v336_v6 = vld [vmem:[#allocation5 + $0x28] sm:$0xff]  ;;  %1766 = vmatprep.subr.bf16.mxu1 %v2281_v53  ;;  %s3337_s24 = scalar_lea.vmem [#allocation11], %s1672_s7  ;;  %s1685_s26 = sshll.u32 %s2336_s22, 12 }
  0x9f   : > { %v338_v7 = vld [vmem:[#allocation5 + $0x38] sm:$0xff]  ;;  %v1688_v8 = vpack.c.bf16 %v333_v5, %v331_v3  ;;  %v335_v10 = vld [vmem:[#allocation5 + $0x20] sm:$0xff]  ;;  %v337_v11 = vld [vmem:[#allocation5 + $0x30] sm:$0xff]  ;;  %s1550_s14 = sshll.u32 %s3337_s24, 4  ;;  %s3436_s6 = scalar_lea.hbm %s3489_s5, %s1685_s26  ;;  %s3438_s14 = int_to_ptr.vmem [resolvable:$true] %s1550_s14 }
  0xa0   : > { %v1690_v9 = vpack.c.bf16 %v338_v7, %v336_v6  ;;  %v340_v12 = vld [vmem:[#allocation5 + $0x48] sm:$0xff]  ;;  %1687 = vmatprep.subr.bf16.mxu0 %v1686_v4  ;;  %v342_v13 = vld [vmem:[#allocation5 + $0x58] sm:$0xff]  ;;  %v1692_v14 = vpack.c.bf16 %v337_v11, %v335_v10  ;;  %v339_v16 = vld [vmem:[#allocation5 + $0x40] sm:$0xff]  ;;  %s1537_s22 = scalar_lea.sflag [#allocation4], %s2537_s29  ;;  %s2195_s17 = scalar_lea.vmem %s3438_s14, 4096 }
  0xa1   : > { %1689 = vmatpush1.bf16.msra.mxu0 %v1688_v8  ;;  %v1694_v15 = vpack.c.bf16 %v342_v13, %v340_v12  ;;  %v341_v17 = vld [vmem:[#allocation5 + $0x50] sm:$0xff]  ;;  %v344_v18 = vld [vmem:[#allocation5 + $0x68] sm:$0xff]  ;;  %v346_v19 = vld [vmem:[#allocation5 + $0x78] sm:$0xff]  ;;  %p2196_p4 = scmp.ne.s32.totalorder %s3438_s14, %s2195_s17  ;;  %s2282_s13 = smov [#allocation11]  }
  0xa2   : > { %1691 = vmatprep.subr.bf16.mxu0 %v1690_v9  ;;  %v1696_v20 = vpack.c.bf16 %v341_v17, %v339_v16  ;;  %v1698_v21 = vpack.c.bf16 %v346_v19, %v344_v18  ;;  %v343_v22 = vld [vmem:[#allocation5 + $0x60] sm:$0xff]  ;;  %v345_v23 = vld [vmem:[#allocation5 + $0x70] sm:$0xff]  ;;  %v348_v24 = vld [vmem:[#allocation5 + $0x88] sm:$0xff]  ;;  %s2199_s9 = sshll.u32 %s2282_s13, 4  ;;  %s2200_s9 = int_to_ptr.vmem [resolvable:$false] %s2199_s9 }
  0xa3   : > { %v350_v25 = vld [vmem:[#allocation5 + $0x98] sm:$0xff]  ;;  %v1700_v26 = vpack.c.bf16 %v345_v23, %v343_v22  ;;  %v347_v28 = vld [vmem:[#allocation5 + $0x80] sm:$0xff]  ;;  %v349_v29 = vld [vmem:[#allocation5 + $0x90] sm:$0xff]  ;;  %p2197_p5 = pnand %p2196_p4, %p2485_p8  ;;  %s2201_s27 = scalar_lea.vmem %s2200_s9, 8192 }
  0xa4   : > { %v1702_v27 = vpack.c.bf16 %v350_v25, %v348_v24  ;;  %v352_v30 = vld [vmem:[#allocation5 + $0xa8] sm:$0xff]  ;;  %v354_v31 = vld [vmem:[#allocation5 + $0xb8] sm:$0xff]  ;;  %v1704_v32 = vpack.c.bf16 %v349_v29, %v347_v28  ;;  %v351_v34 = vld [vmem:[#allocation5 + $0xa0] sm:$0xff]  ;;  %p2202_p12 = scmp.lt.s32.totalorder %s3438_s14, %s2200_s9  ;;  %p2203_p2 = scmp.lt.s32.totalorder %s2201_s27, %s2195_s17 }
  0xa5   : > { %1693 = vmatpush1.bf16.msra.mxu0 %v1692_v14  ;;  %v1706_v33 = vpack.c.bf16 %v354_v31, %v352_v30  ;;  %v353_v35 = vld [vmem:[#allocation5 + $0xb0] sm:$0xff]  ;;  %v356_v36 = vld [vmem:[#allocation5 + $0xc8] sm:$0xff]  ;;  %v358_v37 = vld [vmem:[#allocation5 + $0xd8] sm:$0xff]  ;;  %p2198_p7 = pneg %p2197_p5 }
  0xa6   : > { %1695 = vmatprep.subr.bf16.mxu0 %v1694_v15  ;;  %v1708_v38 = vpack.c.bf16 %v353_v35, %v351_v34  ;;  %v1710_v39 = vpack.c.bf16 %v358_v37, %v356_v36  ;;  %v355_v40 = vld [vmem:[#allocation5 + $0xc0] sm:$0xff]  ;;  %v357_v41 = vld [vmem:[#allocation5 + $0xd0] sm:$0xff]  ;;  %v360_v42 = vld [vmem:[#allocation5 + $0xe8] sm:$0xff]  ;;  %p2204_p1 = por %p2203_p2, %p2202_p12 }
  0xa7   : > { %v362_v43 = vld [vmem:[#allocation5 + $0xf8] sm:$0xff]  ;;  %v1712_v44 = vpack.c.bf16 %v357_v41, %v355_v40  ;;  %v359_v46 = vld [vmem:[#allocation5 + $0xe0] sm:$0xff]  ;;  %v361_v47 = vld [vmem:[#allocation5 + $0xf0] sm:$0xff] }
  0xa8   : > { %v1714_v45 = vpack.c.bf16 %v362_v43, %v360_v42  ;;  %v1716_v48 = vpack.c.bf16 %v361_v47, %v359_v46  ;;  %v1208_v49 = vld [vmem:[#allocation8] sm:$0xff]  ;;  %v1209_v50 = vld [vmem:[#allocation8 + $0x8] sm:$0xff]  ;;  %v1210_v54 = vld [vmem:[#allocation8 + $0x10] sm:$0xff]  ;;  %p2205_p13 = pnand %p2204_p1, %p2198_p7 }
  0xa9   : > { %1697 = vmatpush1.bf16.msra.mxu0 %v1696_v20  ;;  %v299_v51 = vld [vmem:[%s2543_s16] sm:$0xff]  ;;  %v1719_v52 = vpack.c.bf16 %v1209_v50, %v1208_v49  ;;  %v300_v56 = vld [vmem:[%s2543_s16 + $0x8] sm:$0xff]  ;;  %v301_v60 = vld [vmem:[%s2543_s16 + $0x10] sm:$0xff] }
  0xaa   : > { %1699 = vmatprep.subr.bf16.mxu0 %v1698_v21  ;;  %v1211_v55 = vld [vmem:[#allocation8 + $0x18] sm:$0xff]  ;;  %v1212_v58 = vld [vmem:[#allocation8 + $0x20] sm:$0xff]  ;;  %v1213_v59 = vld [vmem:[#allocation8 + $0x28] sm:$0xff] }
  0xab   : > { %1782 = vmatpush1.bf16.msra.mxu1 %v1719_v52  ;;  %v1722_v57 = vpack.c.bf16 %v1211_v55, %v1210_v54  ;;  %v1725_v61 = vpack.c.bf16 %v1213_v59, %v1212_v58  ;;  %v1214_v62 = vld [vmem:[#allocation8 + $0x30] sm:$0xff]  ;;  %v1215_v63 = vld [vmem:[#allocation8 + $0x38] sm:$0xff]  ;;  %v1216_v3 = vld [vmem:[#allocation8 + $0x40] sm:$0xff] }
  0xac   : > { %1767 = vmatprep.subr.bf16.mxu1 %v2281_v53  ;;  %v302_v1 = vld [vmem:[%s2543_s16 + $0x18] sm:$0xff]  ;;  %v1728_v2 = vpack.c.bf16 %v1215_v63, %v1214_v62  ;;  %v1217_v4 = vld [vmem:[#allocation8 + $0x48] sm:$0xff]  ;;  %v303_v5 = vld [vmem:[%s2543_s16 + $0x20] sm:$0xff] }
  0xad   : > { %1701 = vmatpush1.bf16.msra.mxu0 %v1700_v26  ;;  %v1731_v6 = vpack.c.bf16 %v1217_v4, %v1216_v3  ;;  %v1218_v7 = vld [vmem:[#allocation8 + $0x50] sm:$0xff]  ;;  %v1219_v8 = vld [vmem:[#allocation8 + $0x58] sm:$0xff]  ;;  %v304_v9 = vld [vmem:[%s2543_s16 + $0x28] sm:$0xff] }
  0xae   : > { %1703 = vmatprep.subr.bf16.mxu0 %v1702_v27  ;;  %v1734_v10 = vpack.c.bf16 %v1219_v8, %v1218_v7  ;;  %v1220_v11 = vld [vmem:[#allocation8 + $0x60] sm:$0xff]  ;;  %v1221_v12 = vld [vmem:[#allocation8 + $0x68] sm:$0xff]  ;;  %v1222_v15 = vld [vmem:[#allocation8 + $0x70] sm:$0xff] }
  0xaf   : > { %1783 = vmatpush1.bf16.msra.mxu1 %v1722_v57  ;;  %v305_v13 = vld [vmem:[%s2543_s16 + $0x30] sm:$0xff]  ;;  %v1737_v14 = vpack.c.bf16 %v1221_v12, %v1220_v11  ;;  %v1223_v16 = vld [vmem:[#allocation8 + $0x78] sm:$0xff]  ;;  %v308_v20 = vld [vmem:[%s2543_s16 + $0x48] sm:$0xff] }
  0xb0   : > { %1768 = vmatprep.subr.bf16.mxu1 %v2281_v53  ;;  %v306_v17 = vld [vmem:[%s2543_s16 + $0x38] sm:$0xff]  ;;  %v1740_v18 = vpack.c.bf16 %v1223_v16, %v1222_v15  ;;  %v307_v19 = vld [vmem:[%s2543_s16 + $0x40] sm:$0xff]  ;;  %v309_v21 = vld [vmem:[%s2543_s16 + $0x50] sm:$0xff] }
  0xb1   : > { %1705 = vmatpush1.bf16.msra.mxu0 %v1704_v32  ;;  %v310_v22 = vld [vmem:[%s2543_s16 + $0x58] sm:$0xff]  ;;  %v311_v23 = vld [vmem:[%s2543_s16 + $0x60] sm:$0xff]  ;;  %v312_v24 = vld [vmem:[%s2543_s16 + $0x68] sm:$0xff] }
  0xb2   : > { %1707 = vmatprep.subr.bf16.mxu0 %v1706_v33  ;;  %v313_v25 = vld [vmem:[%s2543_s16 + $0x70] sm:$0xff]  ;;  %v314_v26 = vld [vmem:[%s2543_s16 + $0x78] sm:$0xff]  ;;  %v315_v27 = vld [vmem:[%s2543_s16 + $0x80] sm:$0xff] }
  0xb3   : > { %1784 = vmatpush1.bf16.msra.mxu1 %v1725_v61  ;;  %v316_v28 = vld [vmem:[%s2543_s16 + $0x88] sm:$0xff]  ;;  %v317_v29 = vld [vmem:[%s2543_s16 + $0x90] sm:$0xff]  ;;  %v318_v30 = vld [vmem:[%s2543_s16 + $0x98] sm:$0xff] }
  0xb4   : > { %1769 = vmatprep.subr.bf16.mxu1 %v2281_v53  ;;  %v319_v31 = vld [vmem:[%s2543_s16 + $0xa0] sm:$0xff]  ;;  %v320_v32 = vld [vmem:[%s2543_s16 + $0xa8] sm:$0xff]  ;;  %v321_v36 = vld [vmem:[%s2543_s16 + $0xb0] sm:$0xff] }
  0xb5   : > { %1709 = vmatpush1.bf16.msra.mxu0 %v1708_v38  ;;  %v1224_v33 = vld [vmem:[#allocation8 + $0x80] sm:$0xff]  ;;  %v1225_v34 = vld [vmem:[#allocation8 + $0x88] sm:$0xff]  ;;  %v1226_v37 = vld [vmem:[#allocation8 + $0x90] sm:$0xff] }
  0xb6   : > { %1711 = vmatprep.subr.bf16.mxu0 %v1710_v39  ;;  %v1743_v35 = vpack.c.bf16 %v1225_v34, %v1224_v33  ;;  %v1227_v38 = vld [vmem:[#allocation8 + $0x98] sm:$0xff]  ;;  %v1228_v41 = vld [vmem:[#allocation8 + $0xa0] sm:$0xff]  ;;  %v1229_v42 = vld [vmem:[#allocation8 + $0xa8] sm:$0xff] }
  0xb7   : > { %1785 = vmatpush1.bf16.msra.mxu1 %v1728_v2  ;;  %v1746_v39 = vpack.c.bf16 %v1227_v38, %v1226_v37  ;;  %v322_v40 = vld [vmem:[%s2543_s16 + $0xb8] sm:$0xff]  ;;  %v1749_v43 = vpack.c.bf16 %v1229_v42, %v1228_v41  ;;  %v1232_v49 = vld [vmem:[#allocation8 + $0xc0] sm:$0xff]  ;;  %v1233_v50 = vld [vmem:[#allocation8 + $0xc8] sm:$0xff] }
  0xb8   : > { %1770 = vmatprep.subr.bf16.mxu1 %v2281_v53  ;;  %v1231_v46 = vld [vmem:[#allocation8 + $0xb8] sm:$0xff]  ;;  %v1234_v54 = vld [vmem:[#allocation8 + $0xd0] sm:$0xff]  ;;  %v1236_v58 = vld [vmem:[#allocation8 + $0xe0] sm:$0xff] }
  0xb9   : > { %1713 = vmatpush1.bf16.msra.mxu0 %v1712_v44  ;;  %v323_v44 = vld [vmem:[%s2543_s16 + $0xc0] sm:$0xff]  ;;  %v1237_v59 = vld [vmem:[#allocation8 + $0xe8] sm:$0xff]  ;;  %v1238_v62 = vld [vmem:[#allocation8 + $0xf0] sm:$0xff] }
  0xba   : > { %1715 = vmatprep.subr.bf16.mxu0 %v1714_v45  ;;  %v1230_v45 = vld [vmem:[#allocation8 + $0xb0] sm:$0xff]  ;;  %v1235_v55 = vld [vmem:[#allocation8 + $0xd8] sm:$0xff] }
  0xbb   : > { %1786 = vmatpush1.bf16.msra.mxu1 %v1731_v6  ;;  %v1752_v47 = vpack.c.bf16 %v1231_v46, %v1230_v45  ;;  %v1239_v63 = vld [vmem:[#allocation8 + $0xf8] sm:$0xff]  ;;  %v329_v3 = vld [vmem:[%s2543_s16 + $0xf0] sm:$0xff] }
  0xbc   : > { %1771 = vmatprep.subr.bf16.mxu1 %v2281_v53  ;;  %v330_v4 = vld [vmem:[%s2543_s16 + $0xf8] sm:$0xff]  ;;  %v363_v8 = vld [vmem:[#allocation7] sm:$0x3] }
  0xbd   : > { %1717 = vmatpush1.bf16.msra.mxu0 %v1716_v48  ;;  %v324_v48 = vld [vmem:[%s2543_s16 + $0xc8] sm:$0xff] }
  0xbe   : > { %1718 = vmatprep.subr.bf16.mxu0 %v2281_v53 }
  0xbf   : > { %1787 = vmatpush1.bf16.msra.mxu1 %v1734_v10 }
  0xc0   : > { %440 = vmatmul.mubr.f32.vlgmr.msra.gmra.mrb[0].mxu0 %v299_v51  ;;  %1772 = vmatprep.subr.bf16.mxu1 %v2281_v53  ;;  %v1755_v51 = vpack.c.bf16 %v1233_v50, %v1232_v49 }
  0xc1   : > { %445 = vmatprep.mubr.f32.mxu0 %v2280_v0  ;;  %1720 = vmatpush1.bf16.msra.mxu0 %v1719_v52  ;;  %v325_v52 = vld [vmem:[%s2543_s16 + $0xd0] sm:$0xff] }
  0xc2   : > { %1721 = vmatprep.subr.bf16.mxu0 %v2281_v53 }
  0xc3   : > { %1788 = vmatpush1.bf16.msra.mxu1 %v1737_v14 }
  0xc4   : > { %446 = vmatmul.mubr.f32.gmra.mrb[2].mxu0 %v300_v56  ;;  %1773 = vmatprep.subr.bf16.mxu1 %v2281_v53  ;;  %v1758_v56 = vpack.c.bf16 %v1235_v55, %v1234_v54 }
  0xc5   : > { %451 = vmatprep.mubr.f32.mxu0 %v2280_v0  ;;  %1723 = vmatpush1.bf16.msra.mxu0 %v1722_v57  ;;  %v326_v57 = vld [vmem:[%s2543_s16 + $0xd8] sm:$0xff] }
  0xc6   : > { %1724 = vmatprep.subr.bf16.mxu0 %v2281_v53 }
  0xc7   : > { %1789 = vmatpush1.bf16.msra.mxu1 %v1740_v18 }
  0xc8   : > { %452 = vmatmul.mubr.f32.gmra.mrb[4].mxu0 %v301_v60  ;;  %1774 = vmatprep.subr.bf16.mxu1 %v2281_v53  ;;  %v1761_v60 = vpack.c.bf16 %v1237_v59, %v1236_v58 }
  0xc9   : > { %457 = vmatprep.mubr.f32.mxu0 %v2280_v0  ;;  %1726 = vmatpush1.bf16.msra.mxu0 %v1725_v61  ;;  %v327_v61 = vld [vmem:[%s2543_s16 + $0xe0] sm:$0xff] }
  0xca   : > { %1727 = vmatprep.subr.bf16.mxu0 %v2281_v53 }
  0xcb   : > { %1790 = vmatpush1.bf16.msra.mxu1 %v1743_v35 }
  0xcc   : > { %458 = vmatmul.mubr.f32.gmra.mrb[6].mxu0 %v302_v1  ;;  %1775 = vmatprep.subr.bf16.mxu1 %v2281_v53  ;;  %v1764_v1 = vpack.c.bf16 %v1239_v63, %v1238_v62 }
  0xcd   : > { %463 = vmatprep.mubr.f32.mxu0 %v2280_v0  ;;  %1729 = vmatpush1.bf16.msra.mxu0 %v1728_v2  ;;  %v328_v2 = vld [vmem:[%s2543_s16 + $0xe8] sm:$0xff] }
  0xce   : > { %1730 = vmatprep.subr.bf16.mxu0 %v2281_v53 }
  0xcf   : > { %1791 = vmatpush1.bf16.msra.mxu1 %v1746_v39 }
  0xd0   : > { %464 = vmatmul.mubr.f32.gmra.mrb[8].mxu0 %v303_v5  ;;  %1776 = vmatprep.subr.bf16.mxu1 %v2281_v53  ;;  %v365_v5 = vlaneseq }
  0xd1   : > { %469 = vmatprep.mubr.f32.mxu0 %v2280_v0  ;;  %1732 = vmatpush1.bf16.msra.mxu0 %v1731_v6 }
  0xd2   : > { %1733 = vmatprep.subr.bf16.mxu0 %v2281_v53  ;;  %v366_v6 = vshrl.u32 %v365_v5, 7 }
  0xd3   : > { %1792 = vmatpush1.bf16.msra.mxu1 %v1749_v43 }
  0xd4   : > { %470 = vmatmul.mubr.f32.gmra.mrb[10].mxu0 %v304_v9  ;;  %1777 = vmatprep.subr.bf16.mxu1 %v2281_v53  ;;  %v367_v7 = vsub.s32 0, %v366_v6 }
  0xd5   : > { %475 = vmatprep.mubr.f32.mxu0 %v2280_v0  ;;  %1735 = vmatpush1.bf16.msra.mxu0 %v1734_v10 }
  0xd6   : > { %1736 = vmatprep.subr.bf16.mxu0 %v2281_v53  ;;  %v2653_v9 = vrot.slane %v363_v8, %v367_v7 }
  0xd7   : > { %1793 = vmatpush1.bf16.msra.mxu1 %v1752_v47 }
  0xd8   : > { %476 = vmatmul.mubr.f32.gmra.mrb[12].mxu0 %v305_v13  ;;  %1778 = vmatprep.subr.bf16.mxu1 %v2281_v53 }
  0xd9   : > { %481 = vmatprep.mubr.f32.mxu0 %v2280_v0  ;;  %1738 = vmatpush1.bf16.msra.mxu0 %v1737_v14 }
  0xda   : > { %1739 = vmatprep.subr.bf16.mxu0 %v2281_v53 }
  0xdb   : > { %1794 = vmatpush1.bf16.msra.mxu1 %v1755_v51 }
  0xdc   : > { %482 = vmatmul.mubr.f32.gmra.mrb[14].mxu0 %v306_v17  ;;  %1779 = vmatprep.subr.bf16.mxu1 %v2281_v53 }
  0xdd   : > { %487 = vmatprep.mubr.f32.mxu0 %v2280_v0  ;;  %1741 = vmatpush1.bf16.msra.mxu0 %v1740_v18 }
  0xde   : > { %1742 = vmatprep.subr.bf16.mxu0 %v2281_v53 }
  0xdf   : > { %1795 = vmatpush1.bf16.msra.mxu1 %v1758_v56 }
  0xe0   : > { %488 = vmatmul.mubr.f32.gmra.mrb[16].mxu0 %v307_v19  ;;  %1780 = vmatprep.subr.bf16.mxu1 %v2281_v53 }
  0xe1   : > { %493 = vmatprep.mubr.f32.mxu0 %v2280_v0  ;;  %1744 = vmatpush1.bf16.msra.mxu0 %v1743_v35 }
  0xe2   : > { %1745 = vmatprep.subr.bf16.mxu0 %v2281_v53 }
  0xe3   : > { %1796 = vmatpush1.bf16.msra.mxu1 %v1761_v60 }
  0xe4   : > { %494 = vmatmul.mubr.f32.gmra.mrb[18].mxu0 %v308_v20  ;;  %1781 = vmatprep.subr.bf16.mxu1 %v2281_v53 }
  0xe5   : > { %499 = vmatprep.mubr.f32.mxu0 %v2280_v0  ;;  %1747 = vmatpush1.bf16.msra.mxu0 %v1746_v39 }
  0xe6   : > { %1748 = vmatprep.subr.bf16.mxu0 %v2281_v53 }
  0xe7   : > { %1797 = vmatpush1.bf16.msra.mxu1 %v1764_v1 }
  0xe8   : > { %500 = vmatmul.mubr.f32.gmra.mrb[20].mxu0 %v309_v21 }
  0xe9   : > { %505 = vmatprep.mubr.f32.mxu0 %v2280_v0  ;;  %1750 = vmatpush1.bf16.msra.mxu0 %v1749_v43 }
  0xea   : > { %1751 = vmatprep.subr.bf16.mxu0 %v2281_v53 }
  0xec   : > { %506 = vmatmul.mubr.f32.gmra.mrb[22].mxu0 %v310_v22 }
  0xed   : > { %511 = vmatprep.mubr.f32.mxu0 %v2280_v0  ;;  %1753 = vmatpush1.bf16.msra.mxu0 %v1752_v47 }
  0xee   : > { %1754 = vmatprep.subr.bf16.mxu0 %v2281_v53 }
  0xf0   : > { %512 = vmatmul.mubr.f32.gmra.mrb[24].mxu0 %v311_v23 }
  0xf1   : > { %517 = vmatprep.mubr.f32.mxu0 %v2280_v0  ;;  %1756 = vmatpush1.bf16.msra.mxu0 %v1755_v51 }
  0xf2   : > { %1757 = vmatprep.subr.bf16.mxu0 %v2281_v53 }
  0xf4   : > { %518 = vmatmul.mubr.f32.gmra.mrb[26].mxu0 %v312_v24 }
  0xf5   : > { %523 = vmatprep.mubr.f32.mxu0 %v2280_v0  ;;  %1759 = vmatpush1.bf16.msra.mxu0 %v1758_v56 }
  0xf6   : > { %1760 = vmatprep.subr.bf16.mxu0 %v2281_v53 }
  0xf8   : > { %524 = vmatmul.mubr.f32.gmra.mrb[28].mxu0 %v313_v25 }
  0xf9   : > { %529 = vmatprep.mubr.f32.mxu0 %v2280_v0  ;;  %1762 = vmatpush1.bf16.msra.mxu0 %v1761_v60 }
  0xfa   : > { %1763 = vmatprep.subr.bf16.mxu0 %v2281_v53  ;;  %v371_v53 = vsub.s32 1, %v366_v6 }
  0xfc   : > { %530 = vmatmul.mubr.f32.gmra.mrb[30].mxu0 %v314_v26  ;;  %v2655_v10 = vrot.slane %v363_v8, %v371_v53 }
  0xfd   : > { %535 = vmatprep.mubr.f32.mxu0 %v2280_v0  ;;  %1765 = vmatpush1.bf16.msra.mxu0 %v1764_v1 }
 0x100   : > { %536 = vmatmul.mubr.f32.gmra.mrb[32].mxu0 %v315_v27 }
 0x101   : > { %541 = vmatprep.mubr.f32.mxu0 %v2280_v0 }
 0x104   : > { %542 = vmatmul.mubr.f32.gmra.mrb[34].mxu0 %v316_v28 }
 0x105   : > { %547 = vmatprep.mubr.f32.mxu0 %v2280_v0 }
 0x108   : > { %548 = vmatmul.mubr.f32.gmra.mrb[36].mxu0 %v317_v29 }
 0x109   : > { %553 = vmatprep.mubr.f32.mxu0 %v2280_v0 }
 0x10c   : > { %554 = vmatmul.mubr.f32.gmra.mrb[38].mxu0 %v318_v30 }
 0x10d   : > { %559 = vmatprep.mubr.f32.mxu0 %v2280_v0 }
 0x110   : > { %560 = vmatmul.mubr.f32.gmra.mrb[40].mxu0 %v319_v31 }
 0x111   : > { %565 = vmatprep.mubr.f32.mxu0 %v2280_v0 }
 0x114   : > { %566 = vmatmul.mubr.f32.gmra.mrb[42].mxu0 %v320_v32 }
 0x115   : > { %571 = vmatprep.mubr.f32.mxu0 %v2280_v0 }
 0x118   : > { %572 = vmatmul.mubr.f32.gmra.mrb[44].mxu0 %v321_v36 }
 0x119   : > { %577 = vmatprep.mubr.f32.mxu0 %v2280_v0 }
 0x11c   : > { %578 = vmatmul.mubr.f32.gmra.mrb[46].mxu0 %v322_v40 }
 0x11d   : > { %583 = vmatprep.mubr.f32.mxu0 %v2280_v0 }
 0x120   : > { %584 = vmatmul.mubr.f32.gmra.mrb[48].mxu0 %v323_v44 }
 0x121   : > { %589 = vmatprep.mubr.f32.mxu0 %v2280_v0 }
 0x124   : > { %590 = vmatmul.mubr.f32.gmra.mrb[50].mxu0 %v324_v48 }
 0x125   : > { %595 = vmatprep.mubr.f32.mxu0 %v2280_v0 }
 0x128   : > { %596 = vmatmul.mubr.f32.gmra.mrb[52].mxu0 %v325_v52 }
 0x129   : > { %601 = vmatprep.mubr.f32.mxu0 %v2280_v0 }
 0x12c   : > { %602 = vmatmul.mubr.f32.gmra.mrb[54].mxu0 %v326_v57 }
 0x12d   : > { %607 = vmatprep.mubr.f32.mxu0 %v2280_v0 }
 0x130   : > { %608 = vmatmul.mubr.f32.gmra.mrb[56].mxu0 %v327_v61 }
 0x131   : > { %613 = vmatprep.mubr.f32.mxu0 %v2280_v0 }
 0x134   : > { %614 = vmatmul.mubr.f32.gmra.mrb[58].mxu0 %v328_v2 }
 0x135   : > { %619 = vmatprep.mubr.f32.mxu0 %v2280_v0 }
 0x138   : > { %620 = vmatmul.mubr.f32.gmra.mrb[60].mxu0 %v329_v3 }
 0x139   : > { %625 = vmatprep.mubr.f32.mxu0 %v2280_v0 }
 0x13c   : > { %626 = vmatmul.mubr.f32.gmra.mrb[62].mxu0 %v330_v4 }
 0x193   : > { %v441_v11 = vpop.f32.mrb[0].mxu0 }
 0x194   : > { %v2658_v12 = vadd.f32 %v441_v11, %v2653_v9  ;;  %v443_v13 = vpop.f32.mrb[1].mxu0 }
 0x195   : > { %v2661_v14 = vadd.f32 %v443_v13, %v2655_v10 }
 0x196   : > { %v632_v0 = vmul.f32 %v2658_v12, %v2658_v12 }
 0x197   : > { %v633_v15 = vmul.f32 %v2661_v14, %v2661_v14  ;;  %v447_v16 = vpop.f32.mrb[2].mxu0 }
 0x198   : > { %v696_v17 = vmul.f32 %v632_v0, %v2658_v12  ;;  %v2669_v18 = vadd.f32 %v447_v16, %v2653_v9  ;;  %v449_v19 = vpop.f32.mrb[3].mxu0 }
 0x199   : > { %v697_v20 = vmul.f32 %v633_v15, %v2661_v14  ;;  %v2673_v21 = vadd.f32 %v449_v19, %v2655_v10 }
 0x19a   : > { %v760_v22 = vmul.f32 0.044715, %v696_v17  ;;  %v634_v23 = vmul.f32 %v2669_v18, %v2669_v18 }
 0x19b   : > { %v761_v24 = vmul.f32 0.044715, %v697_v20  ;;  %v635_v25 = vmul.f32 %v2673_v21, %v2673_v21  ;;  %v453_v26 = vpop.f32.mrb[4].mxu0 }
 0x19c   : > { %v824_v27 = vadd.f32 %v760_v22, %v2658_v12  ;;  %v698_v28 = vmul.f32 %v634_v23, %v2669_v18  ;;  %v2682_v29 = vadd.f32 %v453_v26, %v2653_v9  ;;  %v455_v30 = vpop.f32.mrb[5].mxu0 }
 0x19d   : > { %v825_v31 = vadd.f32 %v761_v24, %v2661_v14  ;;  %v699_v32 = vmul.f32 %v635_v25, %v2673_v21  ;;  %v2687_v33 = vadd.f32 %v455_v30, %v2655_v10 }
 0x19e   : > { %v888_v34 = vmul.f32 0.7978846, %v824_v27  ;;  %v762_v35 = vmul.f32 0.044715, %v698_v28  ;;  %v636_v36 = vmul.f32 %v2682_v29, %v2682_v29 }
 0x19f   : > { %v889_v37 = vmul.f32 0.7978846, %v825_v31  ;;  %v763_v38 = vmul.f32 0.044715, %v699_v32  ;;  %v637_v39 = vmul.f32 %v2687_v33, %v2687_v33  ;;  %v459_v40 = vpop.f32.mrb[6].mxu0 }
 0x1a0   : > { %1893 = vtanh.f32 %v888_v34  ;;  %v826_v41 = vadd.f32 %v762_v35, %v2669_v18  ;;  %v700_v42 = vmul.f32 %v636_v36, %v2682_v29  ;;  %v2696_v43 = vadd.f32 %v459_v40, %v2653_v9  ;;  %v461_v44 = vpop.f32.mrb[7].mxu0 }
 0x1a1   : > { %v827_v45 = vadd.f32 %v763_v38, %v2673_v21  ;;  %v701_v46 = vmul.f32 %v637_v39, %v2687_v33  ;;  %v2701_v47 = vadd.f32 %v461_v44, %v2655_v10  ;;  %1895 = vtanh.f32 %v889_v37 }
 0x1a2   : > { %v890_v48 = vmul.f32 0.7978846, %v826_v41  ;;  %v764_v49 = vmul.f32 0.044715, %v700_v42  ;;  %v638_v56 = vmul.f32 %v2696_v43, %v2696_v43 }
 0x1a3   : > { %v891_v50 = vmul.f32 0.7978846, %v827_v45  ;;  %v765_v51 = vmul.f32 0.044715, %v701_v46  ;;  %v639_v52 = vmul.f32 %v2701_v47, %v2701_v47  ;;  %v465_v54 = vpop.f32.mrb[8].mxu0 }
 0x1a4   : > { %v828_v55 = vadd.f32 %v764_v49, %v2682_v29  ;;  %v2709_v57 = vadd.f32 %v465_v54, %v2653_v9  ;;  %v467_v58 = vpop.f32.mrb[9].mxu0  ;;  %1897 = vtanh.f32 %v890_v48  ;;  %v702_v2 = vmul.f32 %v638_v56, %v2696_v43 }
 0x1a5   : > { %v829_v59 = vadd.f32 %v765_v51, %v2687_v33  ;;  %v703_v60 = vmul.f32 %v639_v52, %v2701_v47  ;;  %1899 = vtanh.f32 %v891_v50  ;;  %v2721_v8 = vadd.f32 %v467_v58, %v2655_v10 }
 0x1a6   : > { %v892_v61 = vmul.f32 0.7978846, %v828_v55  ;;  %v640_v3 = vmul.f32 %v2709_v57, %v2709_v57  ;;  %v766_v16 = vmul.f32 0.044715, %v702_v2 }
 0x1a7   : > { %v893_v62 = vmul.f32 0.7978846, %v829_v59  ;;  %v767_v63 = vmul.f32 0.044715, %v703_v60  ;;  %v471_v1 = vpop.f32.mrb[10].mxu0  ;;  %v641_v26 = vmul.f32 %v2721_v8, %v2721_v8 }
 0x1a8   : > { %v2717_v4 = vadd.f32 %v471_v1, %v2653_v9  ;;  %v473_v5 = vpop.f32.mrb[11].mxu0  ;;  %v704_v17 = vmul.f32 %v640_v3, %v2709_v57  ;;  %v830_v36 = vadd.f32 %v766_v16, %v2696_v43 }
 0x1a9   : > { %v831_v6 = vadd.f32 %v767_v63, %v2701_v47  ;;  %1901 = vtanh.f32 %v893_v62  ;;  %v2724_v53 = vadd.f32 %v473_v5, %v2655_v10  ;;  %v705_v56 = vmul.f32 %v641_v26, %v2721_v8 }
 0x1aa   : > { %v1894_v7 = vpop.eup %1893  ;;  %1903 = vtanh.f32 %v892_v61  ;;  %v642_v19 = vmul.f32 %v2717_v4, %v2717_v4  ;;  %v768_v37 = vmul.f32 0.044715, %v704_v17  ;;  %v894_v54 = vmul.f32 0.7978846, %v830_v36 }
 0x1ab   : > { %v1896_v11 = vpop.eup %1895  ;;  %v1016_v13 = vadd.f32 1.0, %v1894_v7  ;;  %v895_v0 = vmul.f32 0.7978846, %v831_v6  ;;  %v477_v15 = vpop.f32.mrb[12].mxu0  ;;  %v643_v27 = vmul.f32 %v2724_v53, %v2724_v53  ;;  %v769_v17 = vmul.f32 0.044715, %v705_v56 }
 0x1ac   : > { %v479_v20 = vpop.f32.mrb[13].mxu0  ;;  %v1017_v22 = vadd.f32 1.0, %v1896_v11  ;;  %v2737_v31 = vadd.f32 %v477_v15, %v2653_v9  ;;  %v706_v38 = vmul.f32 %v642_v19, %v2717_v4  ;;  %v832_v55 = vadd.f32 %v768_v37, %v2709_v57 }
 0x1ad   : > { %v1080_v23 = vmul.f32 0.5, %v1016_v13  ;;  %v2730_v24 = vadd.f32 %v479_v20, %v2655_v10  ;;  %1905 = vtanh.f32 %v895_v0  ;;  %v707_v46 = vmul.f32 %v643_v27, %v2724_v53 }
 0x1ae   : > { %v1898_v25 = vpop.eup %1897  ;;  %v1081_v28 = vmul.f32 0.5, %v1017_v22  ;;  %v644_v50 = vmul.f32 %v2737_v31, %v2737_v31  ;;  %v770_v59 = vmul.f32 0.044715, %v706_v38  ;;  %v896_v0 = vmul.f32 0.7978846, %v832_v55 }
 0x1af   : > { %v1900_v30 = vpop.eup %1899  ;;  %v645_v32 = vmul.f32 %v2730_v24, %v2730_v24  ;;  %v483_v34 = vpop.f32.mrb[14].mxu0  ;;  %v1018_v35 = vadd.f32 1.0, %v1898_v25  ;;  %v1144_v41 = vmul.f32 %v1080_v23, %v2658_v12  ;;  %v771_v63 = vmul.f32 0.044715, %v707_v46 }
 0x1b0   : > { %v485_v39 = vpop.f32.mrb[15].mxu0  ;;  %v1145_v40 = vmul.f32 %v1081_v28, %v2661_v14  ;;  %v2746_v42 = vadd.f32 %v483_v34, %v2653_v9  ;;  %v1019_v45 = vadd.f32 1.0, %v1900_v30  ;;  %v708_v5 = vmul.f32 %v644_v50, %v2737_v31 }
 0x1b1   : > { %v2749_v44 = vadd.f32 %v485_v39, %v2655_v10  ;;  %v1082_v48 = vmul.f32 0.5, %v1018_v35  ;;  %v709_v51 = vmul.f32 %v645_v32, %v2730_v24  ;;  %v834_v25 = vadd.f32 %v770_v59, %v2717_v4 }
 0x1b2   : > { %1311 = vmatprep.mubr.f32.mxu0 %v1145_v40  ;;  %v1083_v12 = vmul.f32 0.5, %v1019_v45  ;;  %v646_v60 = vmul.f32 %v2746_v42, %v2746_v42  ;;  %v835_v26 = vadd.f32 %v771_v63, %v2724_v53  ;;  %v772_v30 = vmul.f32 0.044715, %v708_v5 }
 0x1b3   : > { %v1902_v49 = vpop.eup %1901  ;;  %v489_v14 = vpop.f32.mrb[16].mxu0  ;;  %1312 = vmatmul.mubr.f32.vlgmr.msra.gmra.mrb[64].mxu0 %v1144_v41  ;;  %v647_v61 = vmul.f32 %v2749_v44, %v2749_v44  ;;  %v1146_v2 = vmul.f32 %v1082_v48, %v2669_v18  ;;  %v773_v6 = vmul.f32 0.044715, %v709_v51  ;;  %1907 = vtanh.f32 %v894_v54 }
 0x1b4   : > { %v1904_v52 = vpop.eup %1903  ;;  %v491_v58 = vpop.f32.mrb[17].mxu0  ;;  %v1147_v62 = vmul.f32 %v1083_v12, %v2673_v21  ;;  %v2763_v1 = vadd.f32 %v489_v14, %v2653_v9  ;;  %v1021_v3 = vadd.f32 1.0, %v1902_v49  ;;  %v710_v18 = vmul.f32 %v646_v60, %v2746_v42 }
 0x1b5   : > { %v2768_v7 = vadd.f32 %v491_v58, %v2655_v10  ;;  %v1020_v13 = vadd.f32 1.0, %v1904_v52  ;;  %v711_v20 = vmul.f32 %v647_v61, %v2749_v44  ;;  %v837_v32 = vadd.f32 %v773_v6, %v2730_v24 }
 0x1b6   : > { %1316 = vmatprep.mubr.f32.mxu0 %v1147_v62  ;;  %v1085_v16 = vmul.f32 0.5, %v1021_v3  ;;  %v648_v27 = vmul.f32 %v2763_v1, %v2763_v1  ;;  %v774_v41 = vmul.f32 0.044715, %v710_v18  ;;  %v836_v51 = vadd.f32 %v772_v30, %v2737_v31 }
 0x1b7   : > { %v495_v11 = vpop.f32.mrb[18].mxu0  ;;  %1317 = vmatmul.mubr.f32.gmra.mrb[66].mxu0 %v1146_v2  ;;  %v1906_v19 = vpop.eup %1905  ;;  %v1084_v23 = vmul.f32 0.5, %v1020_v13  ;;  %v649_v34 = vmul.f32 %v2768_v7, %v2768_v7  ;;  %v775_v45 = vmul.f32 0.044715, %v711_v20  ;;  %v833_v55 = vadd.f32 %v769_v17, %v2721_v8 }
 0x1b8   : > { %v2771_v15 = vadd.f32 %v495_v11, %v2653_v9  ;;  %v497_v21 = vpop.f32.mrb[19].mxu0  ;;  %v1149_v28 = vmul.f32 %v1085_v16, %v2687_v33  ;;  %v1023_v40 = vadd.f32 1.0, %v1906_v19  ;;  %v712_v48 = vmul.f32 %v648_v27, %v2763_v1 }
 0x1b9   : > { %v2776_v22 = vadd.f32 %v497_v21, %v2655_v10  ;;  %v1148_v36 = vmul.f32 %v1084_v23, %v2682_v29  ;;  %v898_v29 = vmul.f32 0.7978846, %v834_v25  ;;  %v713_v14 = vmul.f32 %v649_v34, %v2768_v7 }
 0x1ba   : > { %v650_v37 = vmul.f32 %v2771_v15, %v2771_v15  ;;  %1321 = vmatprep.mubr.f32.mxu0 %v1149_v28  ;;  %v1087_v50 = vmul.f32 0.5, %v1023_v40  ;;  %v899_v56 = vmul.f32 0.7978846, %v835_v26  ;;  %v901_v61 = vmul.f32 0.7978846, %v837_v32 }
 0x1bb   : > { %v501_v35 = vpop.f32.mrb[20].mxu0  ;;  %v651_v38 = vmul.f32 %v2776_v22, %v2776_v22  ;;  %1322 = vmatmul.mubr.f32.gmra.mrb[68].mxu0 %v1148_v36  ;;  %v838_v62 = vadd.f32 %v774_v41, %v2746_v42  ;;  %v839_v63 = vadd.f32 %v775_v45, %v2749_v44  ;;  %v897_v2 = vmul.f32 0.7978846, %v833_v55 }
 0x1bc   : > { %v2792_v39 = vadd.f32 %v501_v35, %v2653_v9  ;;  %v503_v33 = vpop.f32.mrb[21].mxu0  ;;  %v714_v54 = vmul.f32 %v650_v37, %v2771_v15  ;;  %v1151_v59 = vmul.f32 %v1087_v50, %v2701_v47  ;;  %v776_v3 = vmul.f32 0.044715, %v712_v48 }
 0x1bd   : > { %v2795_v46 = vadd.f32 %v503_v33, %v2655_v10  ;;  %v715_v58 = vmul.f32 %v651_v38, %v2776_v22  ;;  %1909 = vtanh.f32 %v896_v0  ;;  %v900_v11 = vmul.f32 0.7978846, %v836_v51  ;;  %v1908_v27 = vpop.eup %1907 }
 0x1be   : > { %v652_v49 = vmul.f32 %v2792_v39, %v2792_v39  ;;  %1326 = vmatprep.mubr.f32.mxu0 %v1151_v59  ;;  %v777_v13 = vmul.f32 0.044715, %v713_v14  ;;  %1911 = vtanh.f32 %v897_v2  ;;  %v778_v16 = vmul.f32 0.044715, %v714_v54 }
 0x1bf   : > { %v653_v12 = vmul.f32 %v2795_v46, %v2795_v46  ;;  %v507_v52 = vpop.f32.mrb[22].mxu0  ;;  %v779_v17 = vmul.f32 0.044715, %v715_v58  ;;  %1913 = vtanh.f32 %v899_v56  ;;  %v902_v18 = vmul.f32 0.7978846, %v838_v62 }
 0x1c0   : > { %v509_v60 = vpop.f32.mrb[23].mxu0  ;;  %v716_v5 = vmul.f32 %v652_v49, %v2792_v39  ;;  %v2812_v6 = vadd.f32 %v507_v52, %v2653_v9  ;;  %v903_v20 = vmul.f32 0.7978846, %v839_v63  ;;  %1915 = vtanh.f32 %v898_v29 }
 0x1c1   : > { %v717_v21 = vmul.f32 %v653_v12, %v2795_v46  ;;  %v2816_v23 = vadd.f32 %v509_v60, %v2655_v10  ;;  %v840_v25 = vadd.f32 %v776_v3, %v2763_v1  ;;  %1917 = vtanh.f32 %v901_v61 }
 0x1c2   : > { %v780_v26 = vmul.f32 0.044715, %v716_v5  ;;  %v654_v0 = vmul.f32 %v2812_v6, %v2812_v6  ;;  %v841_v28 = vadd.f32 %v777_v13, %v2768_v7  ;;  %1919 = vtanh.f32 %v900_v11 }
 0x1c3   : > { %v513_v47 = vpop.f32.mrb[24].mxu0  ;;  %v781_v30 = vmul.f32 0.044715, %v717_v21  ;;  %v842_v35 = vadd.f32 %v778_v16, %v2771_v15  ;;  %v843_v36 = vadd.f32 %v779_v17, %v2776_v22  ;;  %v1022_v37 = vadd.f32 1.0, %v1908_v27 }
 0x1c4   : > { %v515_v19 = vpop.f32.mrb[25].mxu0  ;;  %v2823_v32 = vadd.f32 %v513_v47, %v2653_v9  ;;  %v655_v40 = vmul.f32 %v2816_v23, %v2816_v23  ;;  %1921 = vtanh.f32 %v903_v20  ;;  %v2835_v45 = vmul.f32 0.7978846, %v840_v25 }
 0x1c5   : > { %v2828_v38 = vadd.f32 %v515_v19, %v2655_v10  ;;  %v844_v29 = vadd.f32 %v780_v26, %v2792_v39  ;;  %v718_v48 = vmul.f32 %v654_v0, %v2812_v6  ;;  %v1086_v49 = vmul.f32 0.5, %v1022_v37 }
 0x1c6   : > { %v2839_v50 = vmul.f32 0.7978846, %v841_v28  ;;  %v845_v51 = vadd.f32 %v781_v30, %v2795_v46  ;;  %v656_v14 = vmul.f32 %v2823_v32, %v2823_v32  ;;  %1923 = vtanh.f32 %v902_v18 }
 0x1c7   : > { %v519_v34 = vpop.f32.mrb[26].mxu0  ;;  %v1910_v52 = vpop.eup %1909  ;;  %v2844_v55 = vmul.f32 0.7978846, %v842_v35  ;;  %v2846_v56 = vmul.f32 0.7978846, %v843_v36  ;;  %v1150_v54 = vmul.f32 %v1086_v49, %v2696_v43  ;;  %v657_v58 = vmul.f32 %v2828_v38, %v2828_v38 }
 0x1c8   : > { %v521_v33 = vpop.f32.mrb[27].mxu0  ;;  %v2833_v41 = vadd.f32 %v519_v34, %v2653_v9  ;;  %v1912_v60 = vpop.eup %1911  ;;  %v719_v61 = vmul.f32 %v655_v40, %v2816_v23  ;;  %v1024_v62 = vadd.f32 1.0, %v1910_v52  ;;  %v2857_v5 = vmul.f32 0.7978846, %v844_v29 }
 0x1c9   : > { %v2855_v2 = vadd.f32 %v521_v33, %v2655_v10  ;;  %v1914_v3 = vpop.eup %1913  ;;  %v782_v11 = vmul.f32 0.044715, %v718_v48  ;;  %1327 = vmatmul.mubr.f32.gmra.mrb[70].mxu0 %v1150_v54  ;;  %v1025_v43 = vadd.f32 1.0, %v1912_v60  ;;  %v2862_v47 = vmul.f32 0.7978846, %v845_v51 }
 0x1ca   : > { %v658_v63 = vmul.f32 %v2833_v41, %v2833_v41  ;;  %v1916_v21 = vpop.eup %1915  ;;  %v720_v16 = vmul.f32 %v656_v14, %v2823_v32  ;;  %v1088_v17 = vmul.f32 0.5, %v1024_v62  ;;  %v1027_v19 = vadd.f32 1.0, %v1914_v3 }
 0x1cb   : > { %v525_v12 = vpop.f32.mrb[28].mxu0  ;;  %v1918_v18 = vpop.eup %1917  ;;  %v1089_v20 = vmul.f32 0.5, %v1025_v43  ;;  %v721_v25 = vmul.f32 %v657_v58, %v2828_v38  ;;  %v1026_v26 = vadd.f32 1.0, %v1916_v21  ;;  %v659_v35 = vmul.f32 %v2855_v2, %v2855_v2 }
 0x1cc   : > { %v527_v59 = vpop.f32.mrb[29].mxu0  ;;  %v2860_v13 = vadd.f32 %v525_v12, %v2653_v9  ;;  %v1920_v28 = vpop.eup %1919  ;;  %v1091_v30 = vmul.f32 0.5, %v1027_v19  ;;  %v722_v34 = vmul.f32 %v658_v63, %v2833_v41  ;;  %v1029_v36 = vadd.f32 1.0, %v1918_v18 }
 0x1cd   : > { %v2867_v0 = vadd.f32 %v527_v59, %v2655_v10  ;;  %v783_v33 = vmul.f32 0.044715, %v719_v61  ;;  %v1153_v40 = vmul.f32 %v1089_v20, %v2721_v8  ;;  %v1090_v29 = vmul.f32 0.5, %v1026_v26 }
 0x1ce   : > { %v660_v48 = vmul.f32 %v2860_v13, %v2860_v13  ;;  %v1922_v49 = vpop.eup %1921  ;;  %v1152_v51 = vmul.f32 %v1088_v17, %v2709_v57  ;;  %v1155_v14 = vmul.f32 %v1091_v30, %v2724_v53  ;;  %v1093_v12 = vmul.f32 0.5, %v1029_v36 }
 0x1cf   : > { %v531_v27 = vpop.f32.mrb[30].mxu0  ;;  %v1028_v52 = vadd.f32 1.0, %v1920_v28  ;;  %1331 = vmatprep.mubr.f32.mxu1 %v1153_v40  ;;  %v784_v58 = vmul.f32 0.044715, %v720_v16  ;;  %v785_v59 = vmul.f32 0.044715, %v721_v25  ;;  %v661_v60 = vmul.f32 %v2867_v0, %v2867_v0 }
 0x1d0   : > { %v533_v37 = vpop.f32.mrb[31].mxu0  ;;  %v1031_v61 = vadd.f32 1.0, %v1922_v49  ;;  %v1924_v62 = vpop.eup %1923  ;;  %1332 = vmatmul.mubr.f32.vlgmr.msra.gmra.mrb[0].mxu1 %v1152_v51  ;;  %v786_v63 = vmul.f32 0.044715, %v722_v34  ;;  %v723_v3 = vmul.f32 %v659_v35, %v2855_v2  ;;  %v2881_v57 = vadd.f32 %v531_v27, %v2653_v9 }
 0x1d1   : > { %v2884_v53 = vadd.f32 %v533_v37, %v2655_v10  ;;  %1336 = vmatprep.mubr.f32.mxu1 %v1155_v14  ;;  %v1154_v43 = vmul.f32 %v1090_v29, %v2717_v4  ;;  %v1157_v21 = vmul.f32 %v1093_v12, %v2730_v24  ;;  %v724_v16 = vmul.f32 %v660_v48, %v2860_v13 }
 0x1d2   : > { %v1095_v17 = vmul.f32 0.5, %v1031_v61  ;;  %v1092_v19 = vmul.f32 0.5, %v1028_v52  ;;  %v725_v18 = vmul.f32 %v661_v60, %v2867_v0  ;;  %v1030_v20 = vadd.f32 1.0, %v1924_v62 }
 0x1d3   : > { %v537_v54 = vpop.f32.mrb[32].mxu0  ;;  %1925 = vtanh.f32 %v2839_v50  ;;  %v846_v26 = vadd.f32 %v782_v11, %v2812_v6  ;;  %v847_v27 = vadd.f32 %v783_v33, %v2816_v23  ;;  %v662_v28 = vmul.f32 %v2881_v57, %v2881_v57 }
 0x1d4   : > { %v539_v8 = vpop.f32.mrb[33].mxu0  ;;  %v663_v4 = vmul.f32 %v2884_v53, %v2884_v53  ;;  %v848_v30 = vadd.f32 %v784_v58, %v2823_v32  ;;  %v849_v34 = vadd.f32 %v785_v59, %v2828_v38  ;;  %1337 = vmatmul.mubr.f32.gmra.mrb[2].mxu1 %v1154_v43  ;;  %v2900_v35 = vadd.f32 %v537_v54, %v2653_v9 }
 0x1d5   : > { %1927 = vtanh.f32 %v2835_v45  ;;  %v850_v50 = vadd.f32 %v786_v63, %v2833_v41  ;;  %v787_v11 = vmul.f32 0.044715, %v723_v3  ;;  %1341 = vmatprep.mubr.f32.mxu1 %v1157_v21  ;;  %v1159_v36 = vmul.f32 %v1095_v17, %v2749_v44 }
 0x1d6   : > { %1929 = vtanh.f32 %v2846_v56  ;;  %v788_v37 = vmul.f32 0.044715, %v724_v16  ;;  %v1156_v33 = vmul.f32 %v1092_v19, %v2737_v31  ;;  %v789_v40 = vmul.f32 0.044715, %v725_v18 }
 0x1d7   : > { %v543_v25 = vpop.f32.mrb[34].mxu0  ;;  %v1094_v29 = vmul.f32 0.5, %v1030_v20  ;;  %v2907_v49 = vmul.f32 0.7978846, %v846_v26  ;;  %v726_v51 = vmul.f32 %v662_v28, %v2881_v57  ;;  %v727_v45 = vmul.f32 %v663_v4, %v2884_v53 }
 0x1d8   : > { %v545_v24 = vpop.f32.mrb[35].mxu0  ;;  %1931 = vtanh.f32 %v2844_v55  ;;  %v911_v12 = vmul.f32 0.7978846, %v847_v27  ;;  %v2912_v52 = vmul.f32 0.7978846, %v848_v30  ;;  %1342 = vmatmul.mubr.f32.gmra.mrb[4].mxu1 %v1156_v33  ;;  %v664_v44 = vmul.f32 %v2900_v35, %v2900_v35 }
 0x1d9   : > { %v2917_v31 = vadd.f32 %v539_v8, %v2655_v10  ;;  %v2919_v56 = vmul.f32 0.7978846, %v849_v34  ;;  %v851_v54 = vadd.f32 %v787_v11, %v2855_v2  ;;  %1346 = vmatprep.mubr.f32.mxu1 %v1159_v36  ;;  %v2923_v58 = vadd.f32 %v543_v25, %v2653_v9 }
 0x1da   : > { %1933 = vtanh.f32 %v2862_v47  ;;  %v2926_v55 = vmul.f32 0.7978846, %v850_v50  ;;  %v852_v59 = vadd.f32 %v788_v37, %v2860_v13  ;;  %v853_v60 = vadd.f32 %v789_v40, %v2867_v0 }
 0x1db   : > { %v549_v48 = vpop.f32.mrb[36].mxu0  ;;  %v1158_v61 = vmul.f32 %v1094_v29, %v2746_v42  ;;  %v790_v8 = vmul.f32 0.044715, %v726_v51  ;;  %v791_v62 = vmul.f32 0.044715, %v727_v45  ;;  %1935 = vtanh.f32 %v2857_v5 }
 0x1dc   : > { %v551_v14 = vpop.f32.mrb[37].mxu0  ;;  %v728_v43 = vmul.f32 %v664_v44, %v2900_v35  ;;  %v665_v47 = vmul.f32 %v2917_v31, %v2917_v31  ;;  %v2936_v21 = vadd.f32 %v545_v24, %v2655_v10  ;;  %1937 = vtanh.f32 %v911_v12 }
 0x1dd   : > { %v1926_v3 = vpop.eup %1925  ;;  %1347 = vmatmul.mubr.f32.gmra.mrb[6].mxu1 %v1158_v61  ;;  %v2938_v17 = vmul.f32 0.7978846, %v851_v54  ;;  %v666_v19 = vmul.f32 %v2923_v58, %v2923_v58  ;;  %v2943_v5 = vadd.f32 %v549_v48, %v2653_v9  ;;  %v2945_v20 = vmul.f32 0.7978846, %v852_v59 }
 0x1de   : > { %v1033_v42 = vadd.f32 1.0, %v1926_v3  ;;  %v2947_v25 = vmul.f32 0.7978846, %v853_v60  ;;  %v2950_v26 = vadd.f32 %v551_v14, %v2655_v10  ;;  %v2956_v24 = vadd.f32 %v790_v8, %v2881_v57 }
 0x1df   : > { %v555_v63 = vpop.f32.mrb[38].mxu0  ;;  %v1928_v18 = vpop.eup %1927  ;;  %v855_v30 = vadd.f32 %v791_v62, %v2884_v53  ;;  %v792_v36 = vmul.f32 0.044715, %v728_v43  ;;  %v729_v37 = vmul.f32 %v665_v47, %v2917_v31  ;;  %v667_v40 = vmul.f32 %v2936_v21, %v2936_v21 }
 0x1e0   : > { %v557_v16 = vpop.f32.mrb[39].mxu0  ;;  %v2953_v27 = vadd.f32 %v555_v63, %v2653_v9  ;;  %v1930_v4 = vpop.eup %1929  ;;  %v1097_v34 = vmul.f32 0.5, %v1033_v42  ;;  %v1032_v50 = vadd.f32 1.0, %v1928_v18  ;;  %v730_v45 = vmul.f32 %v666_v19, %v2923_v58 }
 0x1e1   : > { %v1035_v33 = vadd.f32 1.0, %v1930_v4  ;;  %v668_v14 = vmul.f32 %v2943_v5, %v2943_v5  ;;  %v669_v54 = vmul.f32 %v2950_v26, %v2950_v26  ;;  %v2974_v8 = vmul.f32 0.7978846, %v855_v30 }
 0x1e2   : > { %v1932_v29 = vpop.eup %1931  ;;  %v1161_v48 = vmul.f32 %v1097_v34, %v2768_v7  ;;  %v1096_v51 = vmul.f32 0.5, %v1032_v50  ;;  %v670_v59 = vmul.f32 %v2953_v27, %v2953_v27  ;;  %1939 = vtanh.f32 %v2907_v49 }
 0x1e3   : > { %v561_v28 = vpop.f32.mrb[40].mxu0  ;;  %v1099_v12 = vmul.f32 0.5, %v1035_v33  ;;  %v1034_v44 = vadd.f32 1.0, %v1932_v29  ;;  %v2979_v62 = vadd.f32 %v557_v16, %v2655_v10  ;;  %v793_v3 = vmul.f32 0.044715, %v729_v37 }
 0x1e4   : > { %v2959_v11 = vpop.f32.mrb[41].mxu0  ;;  %v1934_v61 = vpop.eup %1933  ;;  %1351 = vmatprep.mubr.f32.mxu1 %v1161_v48  ;;  %v1160_v7 = vmul.f32 %v1096_v51, %v2763_v1  ;;  %v794_v18 = vmul.f32 0.044715, %v730_v45  ;;  %v731_v4 = vmul.f32 %v667_v40, %v2936_v21  ;;  %v732_v30 = vmul.f32 %v668_v14, %v2943_v5 }
 0x1e5   : > { %v1163_v43 = vmul.f32 %v1099_v12, %v2776_v22  ;;  %v1098_v47 = vmul.f32 0.5, %v1034_v44  ;;  %v1037_v42 = vadd.f32 1.0, %v1934_v61  ;;  %v1936_v19 = vpop.eup %1935  ;;  %1941 = vtanh.f32 %v2919_v56 }
 0x1e6   : > { %1352 = vmatmul.mubr.f32.gmra.mrb[8].mxu1 %v1160_v7  ;;  %v1938_v1 = vpop.eup %1937  ;;  %v1036_v16 = vadd.f32 1.0, %v1936_v19  ;;  %v733_v34 = vmul.f32 %v669_v54, %v2950_v26  ;;  %v734_v50 = vmul.f32 %v670_v59, %v2953_v27  ;;  %v856_v37 = vadd.f32 %v792_v36, %v2900_v35 }
 0x1e7   : > { %v2972_v60 = vpop.f32.mrb[42].mxu0  ;;  %1356 = vmatprep.mubr.f32.mxu1 %v1163_v43  ;;  %v1101_v49 = vmul.f32 0.5, %v1037_v42  ;;  %v1162_v33 = vmul.f32 %v1098_v47, %v2771_v15  ;;  %v1039_v29 = vadd.f32 1.0, %v1938_v1  ;;  %v671_v40 = vmul.f32 %v2979_v62, %v2979_v62 }
 0x1e8   : > { %v2981_v63 = vpop.f32.mrb[43].mxu0  ;;  %v1100_v51 = vmul.f32 0.5, %v1036_v16  ;;  %v2995_v45 = vadd.f32 %v561_v28, %v2653_v9  ;;  %1943 = vtanh.f32 %v2912_v52  ;;  %v857_v14 = vadd.f32 %v793_v3, %v2917_v31 }
 0x1e9   : > { %v1165_v56 = vmul.f32 %v1101_v49, %v2795_v46  ;;  %v795_v12 = vmul.f32 0.044715, %v731_v4  ;;  %v796_v36 = vmul.f32 0.044715, %v732_v30  ;;  %v1103_v44 = vmul.f32 0.5, %v1039_v29 }
 0x1ea   : > { %1357 = vmatmul.mubr.f32.gmra.mrb[10].mxu1 %v1162_v33  ;;  %v858_v15 = vadd.f32 %v794_v18, %v2923_v58  ;;  %v797_v54 = vmul.f32 0.044715, %v733_v34  ;;  %v798_v59 = vmul.f32 0.044715, %v734_v50  ;;  %1945 = vtanh.f32 %v2938_v17 }
 0x1eb   : > { %v573_v22 = vpop.f32.mrb[44].mxu0  ;;  %1361 = vmatprep.mubr.f32.mxu1 %v1165_v56  ;;  %v1164_v61 = vmul.f32 %v1100_v51, %v2792_v39  ;;  %v1167_v28 = vmul.f32 %v1103_v44, %v2816_v23  ;;  %v735_v52 = vmul.f32 %v671_v40, %v2979_v62  ;;  %1947 = vtanh.f32 %v2926_v55 }
 0x1ec   : > { %v575_v48 = vpop.f32.mrb[45].mxu0  ;;  %v918_v3 = vmul.f32 0.7978846, %v2956_v24  ;;  %v672_v43 = vmul.f32 %v2995_v45, %v2995_v45  ;;  %1949 = vtanh.f32 %v2947_v25  ;;  %v1940_v47 = vpop.eup %1939  ;;  %v3009_v42 = vmul.f32 0.7978846, %v856_v37 }
 0x1ed   : > { %v859_v17 = vadd.f32 %v795_v12, %v2936_v21  ;;  %v860_v39 = vadd.f32 %v796_v36, %v2943_v5  ;;  %1951 = vtanh.f32 %v2945_v20  ;;  %v3014_v23 = vmul.f32 0.7978846, %v857_v14 }
 0x1ee   : > { %1362 = vmatmul.mubr.f32.gmra.mrb[12].mxu1 %v1164_v61  ;;  %v3016_v55 = vmul.f32 0.7978846, %v858_v15  ;;  %v861_v24 = vadd.f32 %v797_v54, %v2950_v26  ;;  %v1038_v19 = vadd.f32 1.0, %v1940_v47  ;;  %v862_v4 = vadd.f32 %v798_v59, %v2953_v27 }
 0x1ef   : > { %v579_v46 = vpop.f32.mrb[46].mxu0  ;;  %1366 = vmatprep.mubr.f32.mxu1 %v1167_v28  ;;  %v1942_v25 = vpop.eup %1941  ;;  %v799_v30 = vmul.f32 0.044715, %v735_v52  ;;  %v3024_v1 = vadd.f32 %v2959_v11, %v2655_v10  ;;  %1953 = vtanh.f32 %v2974_v8  ;;  %v736_v34 = vmul.f32 %v672_v43, %v2995_v45 }
 0x1f0   : > { %v581_v7 = vpop.f32.mrb[47].mxu0  ;;  %v1102_v49 = vmul.f32 0.5, %v1038_v19  ;;  %v1041_v16 = vadd.f32 1.0, %v1942_v25  ;;  %v3032_v50 = vadd.f32 %v2972_v60, %v2653_v9  ;;  %v3034_v37 = vmul.f32 0.7978846, %v859_v17 }
 0x1f1   : > { %v3036_v33 = vmul.f32 0.7978846, %v860_v39  ;;  %v3040_v11 = vadd.f32 %v2981_v63, %v2655_v10  ;;  %v3043_v8 = vadd.f32 %v573_v22, %v2653_v9  ;;  %v3045_v40 = vmul.f32 0.7978846, %v861_v24 }
 0x1f2   : > { %v1944_v29 = vpop.eup %1943  ;;  %v1166_v56 = vmul.f32 %v1102_v49, %v2812_v6  ;;  %v1105_v51 = vmul.f32 0.5, %v1041_v16  ;;  %v3049_v60 = vadd.f32 %v575_v48, %v2655_v10  ;;  %v3053_v12 = vmul.f32 0.7978846, %v862_v4 }
 0x1f3   : > { %v3019_v18 = vpop.f32.mrb[48].mxu0  ;;  %v3056_v36 = vadd.f32 %v799_v30, %v2979_v62  ;;  %v1040_v63 = vadd.f32 1.0, %v1944_v29  ;;  %v673_v22 = vmul.f32 %v3024_v1, %v3024_v1  ;;  %v800_v54 = vmul.f32 0.044715, %v736_v34 }
 0x1f4   : > { %v3027_v20 = vpop.f32.mrb[49].mxu0  ;;  %v1946_v15 = vpop.eup %1945  ;;  %1367 = vmatmul.mubr.f32.gmra.mrb[14].mxu1 %v1166_v56  ;;  %v1169_v6 = vmul.f32 %v1105_v51, %v2828_v38  ;;  %v674_v48 = vmul.f32 %v3032_v50, %v3032_v50  ;;  %1955 = vtanh.f32 %v918_v3  ;;  %v675_v52 = vmul.f32 %v3040_v11, %v3040_v11 }
 0x1f5   : > { %v1948_v59 = vpop.eup %1947  ;;  %v1104_v61 = vmul.f32 0.5, %v1040_v63  ;;  %v1043_v28 = vadd.f32 1.0, %v1946_v15  ;;  %v676_v43 = vmul.f32 %v3043_v8, %v3043_v8  ;;  %v677_v38 = vmul.f32 %v3049_v60, %v3049_v60 }
 0x1f6   : > { %v1950_v47 = vpop.eup %1949  ;;  %1371 = vmatprep.mubr.f32.mxu1 %v1169_v6  ;;  %v1042_v17 = vadd.f32 1.0, %v1948_v59  ;;  %v3072_v39 = vadd.f32 %v579_v46, %v2653_v9  ;;  %v3075_v3 = vadd.f32 %v581_v7, %v2655_v10  ;;  %v737_v4 = vmul.f32 %v673_v22, %v3024_v1 }
 0x1f7   : > { %v3051_v14 = vpop.f32.mrb[50].mxu0  ;;  %v1952_v19 = vpop.eup %1951  ;;  %v1168_v25 = vmul.f32 %v1104_v61, %v2823_v32  ;;  %v1107_v30 = vmul.f32 0.5, %v1043_v28  ;;  %v1045_v49 = vadd.f32 1.0, %v1950_v47  ;;  %v864_v34 = vadd.f32 %v800_v54, %v2995_v45 }
 0x1f8   : > { %v3060_v44 = vpop.f32.mrb[51].mxu0  ;;  %v738_v29 = vmul.f32 %v674_v48, %v3032_v50  ;;  %v1106_v46 = vmul.f32 0.5, %v1042_v17  ;;  %v1044_v56 = vadd.f32 1.0, %v1952_v19  ;;  %v739_v63 = vmul.f32 %v675_v52, %v3040_v11 }
 0x1f9   : > { %v1954_v51 = vpop.eup %1953  ;;  %1372 = vmatmul.mubr.f32.gmra.mrb[16].mxu1 %v1168_v25  ;;  %v1171_v7 = vmul.f32 %v1107_v30, %v2855_v2  ;;  %v1109_v15 = vmul.f32 0.5, %v1045_v49  ;;  %v740_v32 = vmul.f32 %v676_v43, %v3043_v8  ;;  %v741_v22 = vmul.f32 %v677_v38, %v3049_v60 }
 0x1fa   : > { %v1047_v6 = vadd.f32 1.0, %v1954_v51  ;;  %v678_v59 = vmul.f32 %v3072_v39, %v3072_v39  ;;  %v679_v54 = vmul.f32 %v3075_v3, %v3075_v3  ;;  %v1170_v61 = vmul.f32 %v1106_v46, %v2833_v41 }
 0x1fb   : > { %v3077_v24 = vpop.f32.mrb[52].mxu0  ;;  %1376 = vmatprep.mubr.f32.mxu1 %v1171_v7  ;;  %v1173_v2 = vmul.f32 %v1109_v15, %v2867_v0  ;;  %v1108_v28 = vmul.f32 0.5, %v1044_v56  ;;  %1957 = vtanh.f32 %v3014_v23  ;;  %v801_v43 = vmul.f32 0.044715, %v737_v4 }
 0x1fc   : > { %v3081_v16 = vpop.f32.mrb[53].mxu0  ;;  %v1111_v47 = vmul.f32 0.5, %v1047_v6  ;;  %v3102_v17 = vadd.f32 %v3019_v18, %v2653_v9  ;;  %1959 = vtanh.f32 %v3009_v42  ;;  %v802_v38 = vmul.f32 0.044715, %v738_v29 }
 0x1fd   : > { %1377 = vmatmul.mubr.f32.gmra.mrb[18].mxu1 %v1170_v61  ;;  %v803_v19 = vmul.f32 0.044715, %v739_v63  ;;  %v804_v25 = vmul.f32 0.044715, %v740_v32  ;;  %1961 = vtanh.f32 %v3034_v37  ;;  %v805_v0 = vmul.f32 0.044715, %v741_v22 }
 0x1fe   : > { %v1956_v41 = vpop.eup %1955  ;;  %1381 = vmatprep.mubr.f32.mxu1 %v1173_v2  ;;  %v1175_v23 = vmul.f32 %v1111_v47, %v2884_v53  ;;  %v742_v4 = vmul.f32 %v678_v59, %v3072_v39  ;;  %1963 = vtanh.f32 %v3016_v55  ;;  %v1172_v18 = vmul.f32 %v1108_v28, %v2860_v13 }
 0x1ff   : > { %v3093_v48 = vpop.f32.mrb[54].mxu0  ;;  %v1046_v42 = vadd.f32 1.0, %v1956_v41  ;;  %v743_v49 = vmul.f32 %v679_v54, %v3075_v3  ;;  %v3115_v29 = vadd.f32 %v3027_v20, %v2655_v10  ;;  %v927_v46 = vmul.f32 0.7978846, %v3056_v36 }
 0x200   : > { %v3098_v52 = vpop.f32.mrb[55].mxu0  ;;  %v865_v53 = vadd.f32 %v801_v43, %v3024_v1  ;;  %v680_v55 = vmul.f32 %v3102_v17, %v3102_v17  ;;  %1965 = vtanh.f32 %v3045_v40  ;;  %v866_v13 = vadd.f32 %v802_v38, %v3032_v50 }
 0x201   : > { %v867_v56 = vadd.f32 %v803_v19, %v3040_v11  ;;  %1382 = vmatmul.mubr.f32.gmra.mrb[20].mxu1 %v1172_v18  ;;  %v1110_v51 = vmul.f32 0.5, %v1046_v42  ;;  %v3128_v20 = vadd.f32 %v3051_v14, %v2653_v9  ;;  %v3130_v7 = vmul.f32 0.7978846, %v864_v34 }
 0x202   : > { %v868_v36 = vadd.f32 %v804_v25, %v3043_v8  ;;  %v869_v63 = vadd.f32 %v805_v0, %v3049_v60  ;;  %1386 = vmatprep.mubr.f32.mxu1 %v1175_v23  ;;  %1967 = vtanh.f32 %v3036_v33  ;;  %v806_v15 = vmul.f32 0.044715, %v742_v4 }
 0x203   : > { %v3109_v30 = vpop.f32.mrb[56].mxu0  ;;  %v1174_v32 = vmul.f32 %v1110_v51, %v2881_v57  ;;  %v807_v22 = vmul.f32 0.044715, %v743_v49  ;;  %v681_v6 = vmul.f32 %v3115_v29, %v3115_v29  ;;  %v929_v34 = vmul.f32 0.7978846, %v865_v53 }
 0x204   : > { %v3117_v37 = vpop.f32.mrb[57].mxu0  ;;  %v744_v59 = vmul.f32 %v680_v55, %v3102_v17  ;;  %v3145_v54 = vadd.f32 %v3060_v44, %v2655_v10  ;;  %1969 = vtanh.f32 %v927_v46  ;;  %v3147_v61 = vmul.f32 0.7978846, %v866_v13 }
 0x205   : > { %v1958_v33 = vpop.eup %1957  ;;  %v3149_v2 = vmul.f32 0.7978846, %v867_v56  ;;  %1387 = vmatmul.mubr.f32.gmra.mrb[22].mxu1 %v1174_v32  ;;  %v682_v57 = vmul.f32 %v3128_v20, %v3128_v20  ;;  %v3155_v28 = vadd.f32 %v3077_v24, %v2653_v9  ;;  %v3157_v47 = vmul.f32 0.7978846, %v868_v36 }
 0x206   : > { %v1960_v43 = vpop.eup %1959  ;;  %v3159_v38 = vmul.f32 0.7978846, %v869_v63  ;;  %v1049_v44 = vadd.f32 1.0, %v1958_v33  ;;  %v3163_v19 = vadd.f32 %v3081_v16, %v2655_v10  ;;  %v3168_v0 = vadd.f32 %v806_v15, %v3072_v39 }
 0x207   : > { %v3135_v40 = vpop.f32.mrb[58].mxu0  ;;  %v1962_v41 = vpop.eup %1961  ;;  %v871_v23 = vadd.f32 %v807_v22, %v3075_v3  ;;  %v1048_v24 = vadd.f32 1.0, %v1960_v43  ;;  %v745_v4 = vmul.f32 %v681_v6, %v3115_v29  ;;  %v808_v46 = vmul.f32 0.044715, %v744_v59 }
 0x208   : > { %v3140_v14 = vpop.f32.mrb[59].mxu0  ;;  %v1964_v42 = vpop.eup %1963  ;;  %v1113_v49 = vmul.f32 0.5, %v1049_v44  ;;  %v1051_v53 = vadd.f32 1.0, %v1962_v41  ;;  %v683_v16 = vmul.f32 %v3145_v54, %v3145_v54  ;;  %v746_v13 = vmul.f32 %v682_v57, %v3128_v20 }
 0x209   : > { %v1112_v55 = vmul.f32 0.5, %v1048_v24  ;;  %v1050_v56 = vadd.f32 1.0, %v1964_v42  ;;  %v684_v51 = vmul.f32 %v3155_v28, %v3155_v28  ;;  %v685_v32 = vmul.f32 %v3163_v19, %v3163_v19 }
 0x20a   : > { %v1966_v36 = vpop.eup %1965  ;;  %v1177_v63 = vmul.f32 %v1113_v49, %v2917_v31  ;;  %v1115_v15 = vmul.f32 0.5, %v1051_v53  ;;  %v3184_v22 = vadd.f32 %v3093_v48, %v2653_v9  ;;  %v809_v33 = vmul.f32 0.044715, %v745_v4 }
 0x20b   : > { %v3165_v25 = vpop.f32.mrb[60].mxu0  ;;  %v1176_v59 = vmul.f32 %v1112_v55, %v2900_v35  ;;  %v1114_v57 = vmul.f32 0.5, %v1050_v56  ;;  %v1053_v43 = vadd.f32 1.0, %v1966_v36  ;;  %v747_v24 = vmul.f32 %v683_v16, %v3145_v54 }
 0x20c   : > { %v3172_v18 = vpop.f32.mrb[61].mxu0  ;;  %v1968_v41 = vpop.eup %1967  ;;  %1391 = vmatprep.mubr.f32.mxu1 %v1177_v63  ;;  %v1179_v31 = vmul.f32 %v1115_v15, %v2936_v21  ;;  %1971 = vtanh.f32 %v3053_v12  ;;  %v3196_v48 = vadd.f32 %v3098_v52, %v2655_v10  ;;  %v810_v42 = vmul.f32 0.044715, %v746_v13 }
 0x20d   : > { %1392 = vmatmul.mubr.f32.gmra.mrb[24].mxu1 %v1176_v59  ;;  %v1117_v35 = vmul.f32 0.5, %v1053_v43  ;;  %v748_v4 = vmul.f32 %v684_v51, %v3155_v28  ;;  %v1052_v49 = vadd.f32 1.0, %v1968_v41  ;;  %v1178_v55 = vmul.f32 %v1114_v57, %v2923_v58 }
 0x20e   : > { %v1970_v53 = vpop.eup %1969  ;;  %1396 = vmatprep.mubr.f32.mxu1 %v1179_v31  ;;  %v749_v21 = vmul.f32 %v685_v32, %v3163_v19  ;;  %v686_v16 = vmul.f32 %v3184_v22, %v3184_v22  ;;  %1973 = vtanh.f32 %v929_v34  ;;  %v935_v13 = vmul.f32 0.7978846, %v871_v23 }
 0x20f   : > { %v3186_v6 = vpop.f32.mrb[62].mxu0  ;;  %v1181_v12 = vmul.f32 %v1117_v35, %v2950_v26  ;;  %v1116_v52 = vmul.f32 0.5, %v1052_v49  ;;  %v1055_v56 = vadd.f32 1.0, %v1970_v53  ;;  %1975 = vtanh.f32 %v3130_v7 }
 0x210   : > { %v3189_v44 = vpop.f32.mrb[63].mxu0  ;;  %v811_v36 = vmul.f32 0.044715, %v747_v24  ;;  %v687_v51 = vmul.f32 %v3196_v48, %v3196_v48  ;;  %v3209_v58 = vadd.f32 %v3109_v30, %v2653_v9  ;;  %v872_v63 = vadd.f32 %v808_v46, %v3102_v17 }
 0x211   : > { %v873_v15 = vadd.f32 %v809_v33, %v3115_v29  ;;  %1397 = vmatmul.mubr.f32.gmra.mrb[26].mxu1 %v1178_v55  ;;  %v1119_v34 = vmul.f32 0.5, %v1055_v56  ;;  %1977 = vtanh.f32 %v3149_v2  ;;  %v874_v26 = vadd.f32 %v810_v42, %v3128_v20 }
 0x212   : > { %1401 = vmatprep.mubr.f32.mxu1 %v1181_v12  ;;  %v812_v7 = vmul.f32 0.044715, %v748_v4  ;;  %v813_v23 = vmul.f32 0.044715, %v749_v21  ;;  %v3217_v32 = vadd.f32 %v3117_v37, %v2655_v10  ;;  %v1180_v30 = vmul.f32 %v1116_v52, %v2943_v5 }
 0x213   : > { %v1183_v59 = vmul.f32 %v1119_v34, %v2979_v62  ;;  %v750_v46 = vmul.f32 %v686_v16, %v3184_v22  ;;  %1979 = vtanh.f32 %v3147_v61  ;;  %v875_v33 = vadd.f32 %v811_v36, %v3145_v54 }
 0x214   : > { %v751_v2 = vmul.f32 %v687_v51, %v3196_v48  ;;  %v688_v57 = vmul.f32 %v3209_v58, %v3209_v58  ;;  %1981 = vtanh.f32 %v3159_v38  ;;  %v934_v37 = vmul.f32 0.7978846, %v3168_v0 }
 0x215   : > { %v3229_v43 = vmul.f32 0.7978846, %v872_v63  ;;  %1402 = vmatmul.mubr.f32.gmra.mrb[28].mxu1 %v1180_v30  ;;  %v3233_v5 = vadd.f32 %v3140_v14, %v2655_v10  ;;  %1983 = vtanh.f32 %v3157_v47  ;;  %v3236_v61 = vmul.f32 0.7978846, %v873_v15 }
 0x216   : > { %v1972_v62 = vpop.eup %1971  ;;  %v876_v41 = vadd.f32 %v812_v7, %v3155_v28  ;;  %v877_v31 = vadd.f32 %v813_v23, %v3163_v19  ;;  %1406 = vmatprep.mubr.f32.mxu1 %v1183_v59  ;;  %v689_v38 = vmul.f32 %v3217_v32, %v3217_v32  ;;  %v3242_v0 = vmul.f32 0.7978846, %v874_v26 }
 0x217   : > { %v814_v24 = vmul.f32 0.044715, %v750_v46  ;;  %v1054_v42 = vadd.f32 1.0, %v1972_v62  ;;  %v3246_v14 = vadd.f32 %v3135_v40, %v2653_v9  ;;  %v3248_v35 = vmul.f32 0.7978846, %v875_v33 }
 0x218   : > { %v1974_v47 = vpop.eup %1973  ;;  %v815_v4 = vmul.f32 0.044715, %v751_v2  ;;  %v752_v49 = vmul.f32 %v688_v57, %v3209_v58  ;;  %1985 = vtanh.f32 %v935_v13  ;;  %v691_v16 = vmul.f32 %v3233_v5, %v3233_v5 }
 0x219   : > { %v1976_v53 = vpop.eup %1975  ;;  %v1118_v55 = vmul.f32 0.5, %v1054_v42  ;;  %v1057_v21 = vadd.f32 1.0, %v1974_v47  ;;  %v3255_v12 = vadd.f32 %v3172_v18, %v2655_v10  ;;  %v3257_v52 = vmul.f32 0.7978846, %v876_v41 }
 0x21a   : > { %v3259_v40 = vmul.f32 0.7978846, %v877_v31  ;;  %v1056_v56 = vadd.f32 1.0, %v1976_v53  ;;  %v753_v36 = vmul.f32 %v689_v38, %v3217_v32  ;;  %v878_v13 = vadd.f32 %v814_v24, %v3184_v22 }
 0x21b   : > { %v1978_v51 = vpop.eup %1977  ;;  %v1182_v63 = vmul.f32 %v1118_v55, %v2953_v27  ;;  %v1121_v15 = vmul.f32 0.5, %v1057_v21  ;;  %v690_v34 = vmul.f32 %v3246_v14, %v3246_v14  ;;  %v879_v26 = vadd.f32 %v815_v4, %v3196_v48 }
 0x21c   : > { %v816_v18 = vmul.f32 0.044715, %v752_v49  ;;  %v1120_v7 = vmul.f32 0.5, %v1056_v56  ;;  %v1059_v23 = vadd.f32 1.0, %v1978_v51  ;;  %v755_v46 = vmul.f32 %v691_v16, %v3233_v5 }
 0x21d   : > { %v1980_v30 = vpop.eup %1979  ;;  %1407 = vmatmul.mubr.f32.gmra.mrb[30].mxu1 %v1182_v63  ;;  %v1185_v59 = vmul.f32 %v1121_v15, %v3024_v1  ;;  %v693_v33 = vmul.f32 %v3255_v12, %v3255_v12  ;;  %1987 = vtanh.f32 %v934_v37  ;;  %v817_v2 = vmul.f32 0.044715, %v753_v36 }
 0x21e   : > { %v1982_v27 = vpop.eup %1981  ;;  %v1123_v57 = vmul.f32 0.5, %v1059_v23  ;;  %v1058_v62 = vadd.f32 1.0, %v1980_v30  ;;  %v3273_v41 = vadd.f32 %v3165_v25, %v2653_v9  ;;  %v1184_v38 = vmul.f32 %v1120_v7, %v2995_v45 }
 0x21f   : > { %v1984_v31 = vpop.eup %1983  ;;  %1411 = vmatprep.mubr.f32.mxu1 %v1185_v59  ;;  %v754_v1 = vmul.f32 %v690_v34, %v3246_v14  ;;  %v1061_v24 = vadd.f32 1.0, %v1982_v27  ;;  %v3279_v42 = vadd.f32 %v3189_v44, %v2655_v10  ;;  %v3284_v49 = vadd.f32 %v3186_v6, %v2653_v9 }
 0x220   : > { %v1187_v37 = vmul.f32 %v1123_v57, %v3040_v11  ;;  %v1122_v47 = vmul.f32 0.5, %v1058_v62  ;;  %v1060_v4 = vadd.f32 1.0, %v1984_v31  ;;  %v819_v25 = vmul.f32 0.044715, %v755_v46 }
 0x221   : > { %1412 = vmatmul.mubr.f32.gmra.mrb[32].mxu1 %v1184_v38  ;;  %v1125_v53 = vmul.f32 0.5, %v1061_v24  ;;  %v757_v45 = vmul.f32 %v693_v33, %v3255_v12  ;;  %v695_v55 = vmul.f32 %v3279_v42, %v3279_v42  ;;  %v943_v16 = vmul.f32 0.7978846, %v879_v26 }
 0x222   : > { %v1986_v21 = vpop.eup %1985  ;;  %v881_v10 = vadd.f32 %v817_v2, %v3217_v32  ;;  %1416 = vmatprep.mubr.f32.mxu1 %v1187_v37  ;;  %v692_v11 = vmul.f32 %v3273_v41, %v3273_v41  ;;  %1989 = vtanh.f32 %v3236_v61  ;;  %v1186_v9 = vmul.f32 %v1122_v47, %v3032_v50 }
 0x223   : > { %v1189_v6 = vmul.f32 %v1125_v53, %v3049_v60  ;;  %v1124_v44 = vmul.f32 0.5, %v1060_v4  ;;  %v1063_v56 = vadd.f32 1.0, %v1986_v21  ;;  %v880_v36 = vadd.f32 %v816_v18, %v3209_v58 }
 0x224   : > { %v694_v51 = vmul.f32 %v3284_v49, %v3284_v49  ;;  %v759_v63 = vmul.f32 %v695_v55, %v3279_v42  ;;  %1991 = vtanh.f32 %v3229_v43  ;;  %v883_v15 = vadd.f32 %v819_v25, %v3233_v5 }
 0x225   : > { %1417 = vmatmul.mubr.f32.gmra.mrb[34].mxu1 %v1186_v9  ;;  %v821_v34 = vmul.f32 0.044715, %v757_v45  ;;  %v1127_v61 = vmul.f32 0.5, %v1063_v56  ;;  %1993 = vtanh.f32 %v3248_v35  ;;  %v942_v50 = vmul.f32 0.7978846, %v878_v13 }
 0x226   : > { %v818_v60 = vmul.f32 0.044715, %v754_v1  ;;  %1421 = vmatprep.mubr.f32.mxu1 %v1189_v6  ;;  %v756_v26 = vmul.f32 %v692_v11, %v3273_v41  ;;  %1995 = vtanh.f32 %v3242_v0  ;;  %v945_v7 = vmul.f32 0.7978846, %v881_v10 }
 0x227   : > { %v1988_v18 = vpop.eup %1987  ;;  %v1188_v23 = vmul.f32 %v1124_v44, %v3043_v8  ;;  %v1191_v43 = vmul.f32 %v1127_v61, %v3075_v3  ;;  %1997 = vtanh.f32 %v3259_v40  ;;  %v758_v30 = vmul.f32 %v694_v51, %v3284_v49 }
 0x228   : > { %v1062_v59 = vadd.f32 1.0, %v1988_v18  ;;  %v823_v46 = vmul.f32 0.044715, %v759_v63  ;;  %1999 = vtanh.f32 %v3257_v52  ;;  %v944_v35 = vmul.f32 0.7978846, %v880_v36 }
 0x229   : > { %v947_v13 = vmul.f32 0.7978846, %v883_v15  ;;  %1422 = vmatmul.mubr.f32.gmra.mrb[36].mxu1 %v1188_v23  ;;  %v885_v33 = vadd.f32 %v821_v34, %v3255_v12  ;;  %2001 = vtanh.f32 %v943_v16  ;;  %v882_v0 = vadd.f32 %v818_v60, %v3246_v14 }
 0x22a   : > { %v820_v27 = vmul.f32 0.044715, %v756_v26  ;;  %1426 = vmatprep.mubr.f32.mxu1 %v1191_v43  ;;  %v1126_v8 = vmul.f32 0.5, %v1062_v59  ;;  %2003 = vtanh.f32 %v942_v50  ;;  %v822_v40 = vmul.f32 0.044715, %v758_v30 }
 0x22b   : > { %2005 = vtanh.f32 %v945_v7  ;;  %v887_v57 = vadd.f32 %v823_v46, %v3279_v42  ;;  %v949_v52 = vmul.f32 0.7978846, %v885_v33  ;;  %v946_v38 = vmul.f32 0.7978846, %v882_v0 }
 0x22c   : > { %v1990_v3 = vpop.eup %1989  ;;  %v1190_v2 = vmul.f32 %v1126_v8, %v3072_v39  ;;  %2007 = vtanh.f32 %v947_v13  ;;  %v884_v1 = vadd.f32 %v820_v27, %v3273_v41  ;;  %v886_v25 = vadd.f32 %v822_v40, %v3284_v49 }
 0x22d   : > { %v1065_v62 = vadd.f32 1.0, %v1990_v3  ;;  %2009 = vtanh.f32 %v944_v35  ;;  %v951_v53 = vmul.f32 0.7978846, %v887_v57 }
 0x22e   : > { %v1992_v31 = vpop.eup %1991  ;;  %1427 = vmatmul.mubr.f32.gmra.mrb[38].mxu1 %v1190_v2  ;;  %2011 = vtanh.f32 %v949_v52  ;;  %v948_v11 = vmul.f32 0.7978846, %v884_v1  ;;  %v950_v50 = vmul.f32 0.7978846, %v886_v25 }
 0x22f   : > { %v1994_v24 = vpop.eup %1993  ;;  %v1129_v37 = vmul.f32 0.5, %v1065_v62  ;;  %v1064_v47 = vadd.f32 1.0, %v1992_v31  ;;  %2013 = vtanh.f32 %v946_v38 }
 0x230   : > { %v1996_v4 = vpop.eup %1995  ;;  %v1067_v45 = vadd.f32 1.0, %v1994_v24  ;;  %2015 = vtanh.f32 %v951_v53 }
 0x231   : > { %v1998_v39 = vpop.eup %1997  ;;  %v1193_v55 = vmul.f32 %v1129_v37, %v3115_v29  ;;  %v1128_v21 = vmul.f32 0.5, %v1064_v47  ;;  %v1066_v16 = vadd.f32 1.0, %v1996_v4  ;;  %2017 = vtanh.f32 %v948_v11 }
 0x232   : > { %v2000_v10 = vpop.eup %1999  ;;  %v1131_v9 = vmul.f32 0.5, %v1067_v45  ;;  %v1069_v6 = vadd.f32 1.0, %v1998_v39  ;;  %2019 = vtanh.f32 %v950_v50 }
 0x233   : > { %v2002_v44 = vpop.eup %2001  ;;  %1431 = vmatprep.mubr.f32.mxu1 %v1193_v55  ;;  %v1192_v56 = vmul.f32 %v1128_v21, %v3102_v17  ;;  %v1130_v36 = vmul.f32 0.5, %v1066_v16  ;;  %v1068_v51 = vadd.f32 1.0, %v2000_v10  ;;  %v2021_v55 = vld [vmem:[%s2543_s16] sm:$0xff]  ;;  %v2022_v16 = vld [vmem:[%s2543_s16 + $0x8] sm:$0xff] }
 0x234   : > { %v2004_v63 = vpop.eup %2003  ;;  %v1195_v15 = vmul.f32 %v1131_v9, %v3145_v54  ;;  %v1133_v34 = vmul.f32 0.5, %v1069_v6  ;;  %v1071_v61 = vadd.f32 1.0, %v2002_v44  ;;  %v2023_v44 = vld [vmem:[%s2543_s16 + $0x10] sm:$0xff] }
 0x235   : > { %v2006_v29 = vpop.eup %2005  ;;  %1432 = vmatmul.mubr.f32.gmra.mrb[40].mxu1 %v1192_v56  ;;  %v1194_v17 = vmul.f32 %v1130_v36, %v3128_v20  ;;  %v1132_v23 = vmul.f32 0.5, %v1068_v51  ;;  %v1070_v43 = vadd.f32 1.0, %v2004_v63 }
 0x236   : > { %1436 = vmatprep.mubr.f32.mxu1 %v1195_v15  ;;  %v1197_v60 = vmul.f32 %v1133_v34, %v3163_v19  ;;  %v1135_v26 = vmul.f32 0.5, %v1071_v61  ;;  %v1073_v18 = vadd.f32 1.0, %v2006_v29  ;;  %v2008_v7 = vpop.eup %2007  ;;  %v2024_v15 = vld [vmem:[%s2543_s16 + $0x18] sm:$0xff] }
 0x237   : > { %v2010_v30 = vpop.eup %2009  ;;  %v1075_v46 = vadd.f32 1.0, %v2008_v7  ;;  %v1196_v13 = vmul.f32 %v1132_v23, %v3155_v28  ;;  %v1134_v19 = vmul.f32 0.5, %v1070_v43  ;;  %v2026_v23 = vld [vmem:[%s2543_s16 + $0x28] sm:$0xff] }
 0x238   : > { %v1199_v54 = vmul.f32 %v1135_v26, %v3196_v48  ;;  %v1137_v59 = vmul.f32 0.5, %v1073_v18  ;;  %v2012_v35 = vpop.eup %2011  ;;  %v1072_v33 = vadd.f32 1.0, %v2010_v30 }
 0x239   : > { %1437 = vmatmul.mubr.f32.gmra.mrb[42].mxu1 %v1194_v17  ;;  %v2014_v0 = vpop.eup %2013  ;;  %v1139_v27 = vmul.f32 0.5, %v1075_v46  ;;  %v1077_v8 = vadd.f32 1.0, %v2012_v35  ;;  %v1198_v40 = vmul.f32 %v1134_v19, %v3184_v22  ;;  %v2027_v46 = vld [vmem:[%s2543_s16 + $0x30] sm:$0xff] }
 0x23a   : > { %1441 = vmatprep.mubr.f32.mxu1 %v1197_v60  ;;  %v1201_v20 = vmul.f32 %v1137_v59, %v3217_v32  ;;  %v2016_v3 = vpop.eup %2015  ;;  %v1136_v2 = vmul.f32 0.5, %v1072_v33  ;;  %v1074_v48 = vadd.f32 1.0, %v2014_v0  ;;  %v2025_v60 = vld [vmem:[%s2543_s16 + $0x20] sm:$0xff]  ;;  %v2028_v0 = vld [vmem:[%s2543_s16 + $0x38] sm:$0xff] }
 0x23b   : > { %v2018_v57 = vpop.eup %2017  ;;  %v1203_v52 = vmul.f32 %v1139_v27, %v3233_v5  ;;  %v1141_v28 = vmul.f32 0.5, %v1077_v8  ;;  %v1079_v62 = vadd.f32 1.0, %v2016_v3 }
 0x23c   : > { %v1200_v31 = vmul.f32 %v1136_v2, %v3209_v58  ;;  %v1138_v38 = vmul.f32 0.5, %v1074_v48  ;;  %v1076_v1 = vadd.f32 1.0, %v2018_v57  ;;  %v2020_v24 = vpop.eup %2019 }
 0x23d   : > { %1442 = vmatmul.mubr.f32.gmra.mrb[44].mxu1 %v1196_v13  ;;  %v1205_v32 = vmul.f32 %v1141_v28, %v3255_v12  ;;  %v1143_v37 = vmul.f32 0.5, %v1079_v62  ;;  %v1078_v4 = vadd.f32 1.0, %v2020_v24  ;;  %v3331_v12 = vld [vmem:[#allocation10] ss:$0 sm:$0xff]  ;;  %v2030_v28 = vld [vmem:[%s2543_s16 + $0x48] sm:$0xff]  ;;  %v2031_v24 = vld [vmem:[%s2543_s16 + $0x50] sm:$0xff] }
 0x23e   : > { %1446 = vmatprep.mubr.f32.mxu1 %v1199_v54  ;;  %v1202_v22 = vmul.f32 %v1138_v38, %v3246_v14  ;;  %v1140_v47 = vmul.f32 0.5, %v1076_v1 }
 0x23f   : > { %v1207_v5 = vmul.f32 %v1143_v37, %v3279_v42  ;;  %v1142_v25 = vmul.f32 0.5, %v1078_v4  ;;  %v2032_v4 = vld [vmem:[%s2543_s16 + $0x58] sm:$0xff] }
 0x240   : > { %v1204_v58 = vmul.f32 %v1140_v47, %v3273_v41 }
 0x241   : > { %1447 = vmatmul.mubr.f32.gmra.mrb[46].mxu1 %v1198_v40  ;;  %v1206_v53 = vmul.f32 %v1142_v25, %v3284_v49  ;;  %v2029_v40 = vld [vmem:[%s2543_s16 + $0x40] sm:$0xff] }
 0x242   : > { %1451 = vmatprep.mubr.f32.mxu1 %v1201_v20 }
 0x245   : > { %1452 = vmatmul.mubr.f32.gmra.mrb[48].mxu1 %v1200_v31 }
 0x246   : > { %1456 = vmatprep.mubr.f32.mxu1 %v1203_v52 }
 0x249   : > { %1457 = vmatmul.mubr.f32.gmra.mrb[50].mxu1 %v1202_v22 }
 0x24a   : > { %1461 = vmatprep.mubr.f32.mxu1 %v1205_v32 }
 0x24d   : > { %1462 = vmatmul.mubr.f32.gmra.mrb[52].mxu1 %v1204_v58 }
 0x24e   : > { %1466 = vmatprep.mubr.f32.mxu1 %v1207_v5 }
 0x251   : > { %1467 = vmatmul.mubr.f32.gmra.mrb[54].mxu1 %v1206_v53 }
 0x286   : > { %v1313_v14 = vpop.f32.mrb[64].mxu0 }
 0x287   : > { %v1314_v45 = vadd.f32 %v3331_v12, %v1313_v14  ;;  %v1315_v39 = vpop.f32.mrb[65].mxu0  ;;  %v2033_v14 = vld [vmem:[%s2543_s16 + $0x60] sm:$0xff] }
 0x289   : > { %v1472_v21 = vadd.f32 %v2021_v55, %v1314_v45 }
 0x28a   : > { %v1318_v41 = vpop.f32.mrb[66].mxu0 }
 0x28b   : > { %1504 = vst [vmem:[%s3337_s24] sm:$0xff] %v1472_v21  ;;  %v1319_v42 = vadd.f32 %v3331_v12, %v1318_v41  ;;  %v1320_v49 = vpop.f32.mrb[67].mxu0  ;;  %v2034_v41 = vld [vmem:[%s2543_s16 + $0x68] sm:$0xff] }
 0x28d   : > { %v1473_v10 = vadd.f32 %v2022_v16, %v1319_v42 }
 0x28e   : > { %v1323_v11 = vpop.f32.mrb[68].mxu0 }
 0x28f   : > { %1505 = vst [vmem:[%s3337_s24 + $0x8] sm:$0xff] %v1473_v10  ;;  %v1324_v9 = vadd.f32 %v3331_v12, %v1323_v11  ;;  %v1325_v6 = vpop.f32.mrb[69].mxu0  ;;  %v2035_v11 = vld [vmem:[%s2543_s16 + $0x70] sm:$0xff] }
 0x291   : > { %v1474_v56 = vadd.f32 %v2023_v44, %v1324_v9 }
 0x293   : > { %1506 = vst [vmem:[%s3337_s24 + $0x10] sm:$0xff] %v1474_v56 }
 0x29c   : > { %v1328_v36 = vpop.f32.mrb[70].mxu0 }
 0x29d   : > { %v1329_v51 = vadd.f32 %v3331_v12, %v1328_v36  ;;  %v1330_v63 = vpop.f32.mrb[71].mxu0  ;;  %v2036_v36 = vld [vmem:[%s2543_s16 + $0x78] sm:$0xff] }
 0x29f   : > { %v1475_v34 = vadd.f32 %v2024_v15, %v1329_v51 }
 0x2a1   : > { %1507 = vst [vmem:[%s3337_s24 + $0x18] sm:$0xff] %v1475_v34 }
 0x2a3   : > { %v1333_v61 = vpop.f32.mrb[0].mxu1 }
 0x2a4   : > { %v1334_v29 = vadd.f32 %v3331_v12, %v1333_v61  ;;  %v1335_v50 = vpop.f32.mrb[1].mxu1  ;;  %v2037_v61 = vld [vmem:[%s2543_s16 + $0x80] sm:$0xff] }
 0x2a6   : > { %v1476_v26 = vadd.f32 %v2025_v60, %v1334_v29 }
 0x2a7   : > { %v1338_v18 = vpop.f32.mrb[2].mxu1 }
 0x2a8   : > { %1508 = vst [vmem:[%s3337_s24 + $0x20] sm:$0xff] %v1476_v26  ;;  %v1339_v7 = vadd.f32 %v3331_v12, %v1338_v18  ;;  %v1340_v17 = vpop.f32.mrb[3].mxu1  ;;  %v2038_v18 = vld [vmem:[%s2543_s16 + $0x88] sm:$0xff] }
 0x2aa   : > { %v1477_v43 = vadd.f32 %v2026_v23, %v1339_v7 }
 0x2ab   : > { %v1343_v30 = vpop.f32.mrb[4].mxu1 }
 0x2ac   : > { %1509 = vst [vmem:[%s3337_s24 + $0x28] sm:$0xff] %v1477_v43  ;;  %v1344_v54 = vadd.f32 %v3331_v12, %v1343_v30  ;;  %v1345_v59 = vpop.f32.mrb[5].mxu1  ;;  %v2039_v30 = vld [vmem:[%s2543_s16 + $0x90] sm:$0xff] }
 0x2ae   : > { %v1478_v35 = vadd.f32 %v2027_v46, %v1344_v54 }
 0x2b0   : > { %v1348_v13 = vpop.f32.mrb[6].mxu1  ;;  %1510 = vst [vmem:[%s3337_s24 + $0x30] sm:$0xff] %v1478_v35 }
 0x2b1   : > { %v1349_v19 = vadd.f32 %v3331_v12, %v1348_v13  ;;  %v1350_v33 = vpop.f32.mrb[7].mxu1  ;;  %v2040_v13 = vld [vmem:[%s2543_s16 + $0x98] sm:$0xff] }
 0x2b3   : > { %v1479_v20 = vadd.f32 %v2028_v0, %v1349_v19 }
 0x2b5   : > { %1511 = vst [vmem:[%s3337_s24 + $0x38] sm:$0xff] %v1479_v20 }
 0x2b9   : > { %v1353_v27 = vpop.f32.mrb[8].mxu1 }
 0x2ba   : > { %v1354_v8 = vadd.f32 %v3331_v12, %v1353_v27  ;;  %v1355_v3 = vpop.f32.mrb[9].mxu1  ;;  %v2041_v27 = vld [vmem:[%s2543_s16 + $0xa0] sm:$0xff] }
 0x2bc   : > { %v1480_v2 = vadd.f32 %v2029_v40, %v1354_v8 }
 0x2bd   : > { %v1358_v48 = vpop.f32.mrb[10].mxu1 }
 0x2be   : > { %1512 = vst [vmem:[%s3337_s24 + $0x40] sm:$0xff] %v1480_v2  ;;  %v1359_v57 = vadd.f32 %v3331_v12, %v1358_v48  ;;  %v1360_v52 = vpop.f32.mrb[11].mxu1  ;;  %v2042_v48 = vld [vmem:[%s2543_s16 + $0xa8] sm:$0xff] }
 0x2c0   : > { %v1481_v62 = vadd.f32 %v2030_v28, %v1359_v57 }
 0x2c1   : > { %v1363_v31 = vpop.f32.mrb[12].mxu1 }
 0x2c2   : > { %1513 = vst [vmem:[%s3337_s24 + $0x48] sm:$0xff] %v1481_v62  ;;  %v1364_v38 = vadd.f32 %v3331_v12, %v1363_v31  ;;  %v1365_v1 = vpop.f32.mrb[13].mxu1  ;;  %v2043_v31 = vld [vmem:[%s2543_s16 + $0xb0] sm:$0xff] }
 0x2c4   : > { %v1482_v32 = vadd.f32 %v2031_v24, %v1364_v38 }
 0x2c6   : > { %1514 = vst [vmem:[%s3337_s24 + $0x50] sm:$0xff] %v1482_v32 }
 0x2c7   : > { %v1368_v37 = vpop.f32.mrb[14].mxu1 }
 0x2c8   : > { %v1369_v22 = vadd.f32 %v3331_v12, %v1368_v37  ;;  %v1370_v47 = vpop.f32.mrb[15].mxu1  ;;  %v2044_v37 = vld [vmem:[%s2543_s16 + $0xb8] sm:$0xff] }
 0x2ca   : > { %v1483_v5 = vadd.f32 %v2032_v4, %v1369_v22 }
 0x2cc   : > { %1515 = vst [vmem:[%s3337_s24 + $0x58] sm:$0xff] %v1483_v5  ;;  %v1373_v58 = vpop.f32.mrb[16].mxu1 }
 0x2cd   : > { %v1374_v25 = vadd.f32 %v3331_v12, %v1373_v58  ;;  %v1375_v53 = vpop.f32.mrb[17].mxu1  ;;  %v2045_v58 = vld [vmem:[%s2543_s16 + $0xc0] sm:$0xff] }
 0x2cf   : > { %v1484_v45 = vadd.f32 %v2033_v14, %v1374_v25 }
 0x2d0   : > { %v1378_v39 = vpop.f32.mrb[18].mxu1 }
 0x2d1   : > { %1516 = vst [vmem:[%s3337_s24 + $0x60] sm:$0xff] %v1484_v45  ;;  %v1379_v55 = vadd.f32 %v3331_v12, %v1378_v39  ;;  %v1380_v21 = vpop.f32.mrb[19].mxu1  ;;  %v2046_v39 = vld [vmem:[%s2543_s16 + $0xc8] sm:$0xff] }
 0x2d3   : > { %v1485_v42 = vadd.f32 %v2034_v41, %v1379_v55 }
 0x2d4   : > { %v1383_v49 = vpop.f32.mrb[20].mxu1 }
 0x2d5   : > { %1517 = vst [vmem:[%s3337_s24 + $0x68] sm:$0xff] %v1485_v42  ;;  %v1384_v16 = vadd.f32 %v3331_v12, %v1383_v49  ;;  %v1385_v10 = vpop.f32.mrb[21].mxu1  ;;  %v2047_v49 = vld [vmem:[%s2543_s16 + $0xd0] sm:$0xff] }
 0x2d7   : > { %v1486_v9 = vadd.f32 %v2035_v11, %v1384_v16 }
 0x2d8   : > { %v1388_v6 = vpop.f32.mrb[22].mxu1 }
 0x2d9   : > { %1518 = vst [vmem:[%s3337_s24 + $0x70] sm:$0xff] %v1486_v9  ;;  %v1389_v44 = vadd.f32 %v3331_v12, %v1388_v6  ;;  %v1390_v56 = vpop.f32.mrb[23].mxu1  ;;  %v2048_v6 = vld [vmem:[%s2543_s16 + $0xd8] sm:$0xff] }
 0x2db   : > { %v1487_v51 = vadd.f32 %v2036_v36, %v1389_v44 }
 0x2dd   : > { %1519 = vst [vmem:[%s3337_s24 + $0x78] sm:$0xff] %v1487_v51 }
 0x2e0   : > { %v1393_v63 = vpop.f32.mrb[24].mxu1 }
 0x2e1   : > { %v1394_v15 = vadd.f32 %v3331_v12, %v1393_v63  ;;  %v1395_v34 = vpop.f32.mrb[25].mxu1  ;;  %v2049_v63 = vld [vmem:[%s2543_s16 + $0xe0] sm:$0xff] }
 0x2e3   : > { %v1488_v29 = vadd.f32 %v2037_v61, %v1394_v15 }
 0x2e4   : > { %v1398_v50 = vpop.f32.mrb[26].mxu1 }
 0x2e5   : > { %1520 = vst [vmem:[%s3337_s24 + $0x80] sm:$0xff] %v1488_v29  ;;  %v1399_v60 = vadd.f32 %v3331_v12, %v1398_v50  ;;  %v1400_v26 = vpop.f32.mrb[27].mxu1  ;;  %v2050_v50 = vld [vmem:[%s2543_s16 + $0xe8] sm:$0xff] }
 0x2e7   : > { %v1489_v7 = vadd.f32 %v2038_v18, %v1399_v60 }
 0x2e8   : > { %v1403_v17 = vpop.f32.mrb[28].mxu1 }
 0x2e9   : > { %1521 = vst [vmem:[%s3337_s24 + $0x88] sm:$0xff] %v1489_v7  ;;  %v1404_v23 = vadd.f32 %v3331_v12, %v1403_v17  ;;  %v1405_v43 = vpop.f32.mrb[29].mxu1  ;;  %v2051_v17 = vld [vmem:[%s2543_s16 + $0xf0] sm:$0xff] }
 0x2eb   : > { %v1490_v54 = vadd.f32 %v2039_v30, %v1404_v23 }
 0x2ed   : > { %1522 = vst [vmem:[%s3337_s24 + $0x90] sm:$0xff] %v1490_v54 }
 0x2f0   : > { %v1408_v59 = vpop.f32.mrb[30].mxu1 }
 0x2f1   : > { %v1409_v46 = vadd.f32 %v3331_v12, %v1408_v59  ;;  %v1410_v35 = vpop.f32.mrb[31].mxu1  ;;  %v2052_v59 = vld [vmem:[%s2543_s16 + $0xf8] sm:$0xff] }
 0x2f3   : > { %v1491_v19 = vadd.f32 %v2040_v13, %v1409_v46 }
 0x2f4   : > { %v1413_v33 = vpop.f32.mrb[32].mxu1 }
 0x2f5   : > { %1523 = vst [vmem:[%s3337_s24 + $0x98] sm:$0xff] %v1491_v19  ;;  %v1414_v0 = vadd.f32 %v3331_v12, %v1413_v33  ;;  %v1415_v20 = vpop.f32.mrb[33].mxu1 }
 0x2f7   : > { %v1492_v8 = vadd.f32 %v2041_v27, %v1414_v0 }
 0x2f8   : > { %v1418_v3 = vpop.f32.mrb[34].mxu1 }
 0x2f9   : > { %1524 = vst [vmem:[%s3337_s24 + $0xa0] sm:$0xff] %v1492_v8  ;;  %v1419_v40 = vadd.f32 %v3331_v12, %v1418_v3  ;;  %v1420_v2 = vpop.f32.mrb[35].mxu1 }
 0x2fb   : > { %v1493_v57 = vadd.f32 %v2042_v48, %v1419_v40 }
 0x2fc   : > { %v1423_v52 = vpop.f32.mrb[36].mxu1 }
 0x2fd   : > { %1525 = vst [vmem:[%s3337_s24 + $0xa8] sm:$0xff] %v1493_v57  ;;  %v1424_v28 = vadd.f32 %v3331_v12, %v1423_v52  ;;  %v1425_v62 = vpop.f32.mrb[37].mxu1 }
 0x2ff   : > { %v1494_v38 = vadd.f32 %v2043_v31, %v1424_v28 }
 0x301   : > { %1526 = vst [vmem:[%s3337_s24 + $0xb0] sm:$0xff] %v1494_v38  ;;  %v1428_v1 = vpop.f32.mrb[38].mxu1 }
 0x302   : > { %v1429_v24 = vadd.f32 %v3331_v12, %v1428_v1  ;;  %v1430_v32 = vpop.f32.mrb[39].mxu1 }
 0x304   : > { %v1495_v22 = vadd.f32 %v2044_v37, %v1429_v24 }
 0x306   : > { %1527 = vst [vmem:[%s3337_s24 + $0xb8] sm:$0xff] %v1495_v22 }
 0x308   : > { %v1433_v47 = vpop.f32.mrb[40].mxu1 }
 0x309   : > { %v1434_v4 = vadd.f32 %v3331_v12, %v1433_v47  ;;  %v1435_v5 = vpop.f32.mrb[41].mxu1 }
 0x30b   : > { %v1496_v25 = vadd.f32 %v2045_v58, %v1434_v4 }
 0x30c   : > { %v1438_v53 = vpop.f32.mrb[42].mxu1 }
 0x30d   : > { %1528 = vst [vmem:[%s3337_s24 + $0xc0] sm:$0xff] %v1496_v25  ;;  %v1439_v14 = vadd.f32 %v3331_v12, %v1438_v53  ;;  %v1440_v45 = vpop.f32.mrb[43].mxu1 }
 0x30f   : > { %v1497_v55 = vadd.f32 %v2046_v39, %v1439_v14 }
 0x310   : > { %v1443_v21 = vpop.f32.mrb[44].mxu1 }
 0x311   : > { %1529 = vst [vmem:[%s3337_s24 + $0xc8] sm:$0xff] %v1497_v55  ;;  %v1444_v41 = vadd.f32 %v3331_v12, %v1443_v21  ;;  %v1445_v42 = vpop.f32.mrb[45].mxu1 }
 0x313   : > { %v1498_v16 = vadd.f32 %v2047_v49, %v1444_v41 }
 0x314   : > { %v1448_v10 = vpop.f32.mrb[46].mxu1 }
 0x315   : > { %1530 = vst [vmem:[%s3337_s24 + $0xd0] sm:$0xff] %v1498_v16  ;;  %v1449_v11 = vadd.f32 %v3331_v12, %v1448_v10  ;;  %v1450_v9 = vpop.f32.mrb[47].mxu1 }
 0x317   : > { %v1499_v44 = vadd.f32 %v2048_v6, %v1449_v11 }
 0x318   : > { %v1453_v56 = vpop.f32.mrb[48].mxu1 }
 0x319   : > { %1531 = vst [vmem:[%s3337_s24 + $0xd8] sm:$0xff] %v1499_v44  ;;  %v1454_v36 = vadd.f32 %v3331_v12, %v1453_v56  ;;  %v1455_v51 = vpop.f32.mrb[49].mxu1 }
 0x31b   : > { %v1500_v15 = vadd.f32 %v2049_v63, %v1454_v36 }
 0x31c   : > { %v1458_v34 = vpop.f32.mrb[50].mxu1 }
 0x31d   : > { %1532 = vst [vmem:[%s3337_s24 + $0xe0] sm:$0xff] %v1500_v15  ;;  %v1459_v61 = vadd.f32 %v3331_v12, %v1458_v34  ;;  %v1460_v29 = vpop.f32.mrb[51].mxu1 }
 0x31f   : > { %v1501_v60 = vadd.f32 %v2050_v50, %v1459_v61 }
 0x320   : > { %v1463_v26 = vpop.f32.mrb[52].mxu1 }
 0x321   : > { %1533 = vst [vmem:[%s3337_s24 + $0xe8] sm:$0xff] %v1501_v60  ;;  %v1464_v18 = vadd.f32 %v3331_v12, %v1463_v26  ;;  %v1465_v7 = vpop.f32.mrb[53].mxu1 }
 0x323   : > { %v1502_v23 = vadd.f32 %v2051_v17, %v1464_v18 }
 0x324   : > { %v1468_v43 = vpop.f32.mrb[54].mxu1 }
 0x325   : > { %1534 = vst [vmem:[%s3337_s24 + $0xf0] sm:$0xff] %v1502_v23  ;;  %v1469_v30 = vadd.f32 %v3331_v12, %v1468_v43  ;;  %v1470_v54 = vpop.f32.mrb[55].mxu1 }
 0x327   : > { %v1503_v46 = vadd.f32 %v2052_v59, %v1469_v30 }
 0x329   : > { %1535 = vst [vmem:[%s3337_s24 + $0xf8] sm:$0xff] %v1503_v46 }
 0x32a   : > { %2208 = shalt.err (!%p2205_p13)
}
 0x32b   : > { %s2209_s23 = scalar_lea.hbm %s3436_s6, 4096  ;;  %s2213_s11 = scalar_lea.hbm %s3489_s5, 8192 }
 0x32c   : > { %p2210_p9 = scmp.ne.s32.totalorder %s3436_s6, %s2209_s23  ;;  %p2214_p6 = scmp.lt.u32.totalorder %s3436_s6, %s3489_s5 }
 0x32d   : > { %p2215_p10 = scmp.lt.u32.totalorder %s2213_s11, %s2209_s23  ;;  %p2217_p4 = scmp.lt.u32.totalorder %s2209_s23, %s3436_s6 }
 0x32e   : > { %p2211_p0 = pnand %p2210_p9, %p2485_p8 }
 0x32f   : > { %p2216_p3 = por %p2215_p10, %p2214_p6 }
 0x330   : > { %p2212_p11 = pneg %p2211_p0 }
 0x331   : > { %p2218_p5 = por %p2217_p4, %p2216_p3 }
 0x333   : > { %p2219_p7 = pnand %p2218_p5, %p2212_p11 }
 0x335   : > { %2222 = shalt.err (!%p2219_p7)
}
 0x336   : > { %s2283_s26 = smov 128   ;;  %s2284_s15 = smov 8  }
 0x337   : > { %1816 = dma.vmem_to_hbm [thread:$0]  (%p2485_p8), %s3438_s14, 4096, %s3436_s6, %s1537_s22, %s2283_s26, %s2283_s26, %s2284_s15  }
 0x338 PF: > { %s1565_s28 = sand.u32 1, %s2257_s18   ;;  %p3507_p12 = scmp.ne.s32.totalorder %s3494_s25, 0 }
 0x339   : > { %p3508_p2 = scmp.ge.s32.totalorder %s2269_s21, 2  ;;  %s1566_s17 = scalar_lea.sflag [#allocation4], %s1565_s28 }
 0x33b   : > { %p1836_p1 = pnand %p3508_p2, %p3507_p12 }
 0x33d   : > { %2252 = dma.done.wait (!%p1836_p1), %s1566_s17, 4096  }
 0x33e   : > { %2254 = vsyncadd (!%p1836_p1), %s1566_s17, 4294963200  ;;  %p20_p13 = scmp.ge.s32.totalorder %s2472_s12, 4   ;;  %s3509_s18 = smov %s2261_s19 }
 0x33f   : > { %s3510_s19 = smov %s2265_s20  ;;  %s3511_s20 = smov %s2481_s30 }
 0x340   : > { %s3512_s21 = smov %s2472_s12  ;;  %22 = sbr.rel (!%p20_p13) target bundleno = 7 (0x7), region = 101 }
 0x347   :  { %1571 = vsyncpa [#allocation3], 1 }
 0x348   :  { %1573 = vsyncpa [#allocation3 + $0x1], 1 }
 0x349   :  { %1574 = vsyncpa [#allocation6], 1 }
 0x34a   :  { %1575 = vsyncpa [#allocation9], 1 }
 0x34b   :  { %1576 = vsyncpa [#allocation4], 1 }
 0x34c   :  { %1578 = vsyncpa [#allocation4 + $0x1], 1 }

</bundles_post_ra>
